<compile_context>
chip_gen: v7x
topology: tpu7x:2x2x1
jax: 0.10.0
libtpu: 0.0.40
codegen_flags: <defaults>
</compile_context>

<pallas_src>
import numpy as np
import jax
import jax.numpy as jnp
from jax.experimental import pallas as pl
from jax.experimental.pallas import tpu as pltpu

_PACK = 128  # logical coordinate rows packed into one lane-dense output row


def _linear_distance_encoding_kernel(dist_ref, w_ref, loc_ref, out_ref):
    # dist_ref : (tile, PACK)    f32  (c1 - c0) / scale, 128 logical rows per row
    # w_ref    : (PACK, PACK*L)  f32  0/1 one-hot expander: W[p, p*L + l] = 1
    # loc_ref  : (1, PACK*L)     f32  locs / scale tiled PACK times ([p*L + l] order)
    # out_ref  : (tile, PACK*L)       lane-dense packed embedding
    #
    # rep[r, p*L + l] = dist[r, p]  — the xL lane replication rides on the MXU.
    # Precision.HIGHEST keeps the replication ~exact (W is 0/1, dist is f32).
    rep = jnp.dot(
        dist_ref[...],
        w_ref[...],
        precision=jax.lax.Precision.HIGHEST,
        preferred_element_type=jnp.float32,
    )
    # max(0, 1 - |d/scale - loc/scale|); the module's outer torch.abs is a no-op
    # because the clamped value is already >= 0.
    out_ref[...] = jnp.maximum(1.0 - jnp.abs(rep - loc_ref[...]), 0.0).astype(out_ref.dtype)


def _build_expander(n_locs: int) -> np.ndarray:
    """W[p, p*L + l] = 1, so (dist @ W)[r, p*L + l] = dist[r, p]."""
    L = int(n_locs)
    w = np.zeros((_PACK, _PACK * L), np.float32)
    p = np.arange(_PACK)
    for l in range(L):
        w[p, p * L + l] = 1.0
    return w


def linear_distance_encoding(coordinates,
                             locs=(0, 100, 200, 300, 400, 500, 600, 700, 800),
                             tile_rows=1024,
                             out_dtype=jnp.float32):
    """coordinates: (N, 2) -> (N, len(locs)), matching LinearDistanceEncoding.forward."""
    coords = jnp.asarray(coordinates, jnp.float32)
    n = int(coords.shape[0])
    assert coords.ndim == 2 and coords.shape[1] == 2, "coordinates must be (N, 2)"

    locs_np = np.asarray(locs, dtype=np.float32)
    L = int(locs_np.shape[0])
    assert L >= 2, "need at least two locs"
    scale = float(locs_np[1] - locs_np[0])  # the module's `scales` (a single scalar)
    assert scale != 0.0, "locs[1] - locs[0] must be nonzero"
    inv_scale = 1.0 / scale

    # ---- tiling: work in units of 8 packed rows (sublane alignment) -------------
    g = -(-n // _PACK)                       # packed rows needed
    u = -(-g // 8)                           # 8-row (sublane) units
    tr_u = max(1, min(int(tile_rows) // 8, u))
    if u >= 2:
        tr_u = min(tr_u, -(-u // 2))         # >= 2 grid steps -> both v7x TensorCores busy
    grid = -(-u // tr_u)
    tr_u = -(-u // grid)                     # rebalance so final padding stays small
    grid = -(-u // tr_u)
    tile = tr_u * 8                          # packed rows per block (multiple of 8)
    g_pad = grid * tile
    n_pad = g_pad * _PACK

    # Pair difference + fold-in of 1/scale in one fused XLA elementwise pass.
    # Doing the subtraction here (not on the MXU) keeps it exact in f32 even for
    # genomic-scale coordinates (~1e8).  dist is packed lane-dense: (g_pad, 128).
    dist_scaled = (coords[:, 1] - coords[:, 0]) * jnp.float32(inv_scale)
    if n_pad != n:
        dist_scaled = jnp.pad(dist_scaled, (0, n_pad - n))   # padded rows sliced off below
    dist_packed = dist_scaled.reshape(g_pad, _PACK)

    lane = _PACK * L
    w = jnp.asarray(_build_expander(L))                       # (128, 128*L), 0/1
    loc_lane = jnp.asarray(
        np.tile(locs_np * np.float32(inv_scale), _PACK).astype(np.float32).reshape(1, lane))

    cost = pl.CostEstimate(
        flops=2 * g_pad * _PACK * lane,
        transcendentals=0,
        bytes_accessed=(g_pad * _PACK + _PACK * lane + lane + g_pad * lane) * 4,
    )

    out_packed = pl.pallas_call(
        _linear_distance_encoding_kernel,
        out_shape=jax.ShapeDtypeStruct((g_pad, lane), out_dtype),
        grid_spec=pltpu.PrefetchScalarGridSpec(
            num_scalar_prefetch=0,
            grid=(grid,),
            in_specs=[
                pl.BlockSpec((tile, _PACK), lambda i: (i, 0)),    # dist, lane-dense
                pl.BlockSpec((_PACK, lane), lambda i: (0, 0)),    # W: constant index -> DMA'd once
                pl.BlockSpec((1, lane), lambda i: (0, 0)),        # locs: constant index -> resident
            ],
            out_specs=pl.BlockSpec((tile, lane), lambda i: (i, 0)),
        ),
        compiler_params=pltpu.CompilerParams(
            dimension_semantics=("parallel",),
            vmem_limit_bytes=32 * 1024 * 1024,                    # explicit; safe on v5e/v6e/v7x
        ),
        cost_estimate=cost,
    )(dist_packed, w, loc_lane)

    # (g_pad, 128*L) row-major is byte-identical to (n_pad, L) row-major: reshape is free.
    return out_packed.reshape(n_pad, L)[:n]


def linear_distance_encoding_ref(coordinates, locs=(0, 100, 200, 300, 400, 500, 600, 700, 800)):
    locs = jnp.asarray(locs, jnp.float32)
    scales = jnp.ones_like(locs) * (locs[1] - locs[0])
    coords = jnp.asarray(coordinates, jnp.float32)
    dist = coords[:, 1] - coords[:, 0]
    return jnp.abs(jnp.clip(scales - jnp.abs(dist[:, None] - locs), 0.0, None) / scales)


if __name__ == "__main__":
    key = jax.random.PRNGKey(0)
    k0, k1 = jax.random.split(key)

    # Small but realistic: genomic-scale start positions (~1e8) exercise the
    # large-coordinate precision path; N=2500 is deliberately not a multiple of
    # 128 (exercises padding) and produces a 2-step grid with default tiling.
    N = 2500
    starts = jax.random.randint(k0, (N,), 0, 100_000_000)
    lengths = jax.random.randint(k1, (N,), 0, 1000)   # fragment lengths on the hat supports
    coords = jnp.stack([starts, starts + lengths], axis=1).astype(jnp.float32)

    out = jax.block_until_ready(linear_distance_encoding(coords))
    ref = linear_distance_encoding_ref(coords)
    assert out.shape == (N, 9) and out.dtype == jnp.float32
    err = float(jnp.max(jnp.abs(out - ref)))
    # The 0/1 one-hot replication matmul at Precision.HIGHEST is ~exact; 1e-4
    # also covers a worst-case hi/lo split, while real layout/indexing bugs
    # would show up as O(0.1..1) errors on these [0, 1] hat weights.
    assert err < 1e-4, f"max abs error {err}"

    # Also exercise the tiny single-block (grid=1) path.
    coords_small = coords[:100]
    out_small = jax.block_until_ready(linear_distance_encoding(coords_small))
    ref_small = linear_distance_encoding_ref(coords_small)
    assert out_small.shape == (100, 9)
    assert float(jnp.max(jnp.abs(out_small - ref_small))) < 1e-4

    print("KERNEL_OK")
</pallas_src>

<mosaic_0001>
module attributes {stable_mosaic.version = 11 : i64} {
  func.func @_linear_distance_encoding_kernel(%arg0: i32, %arg1: memref<16x128xf32, #tpu.memory_space<vmem>>, %arg2: memref<128x1152xf32, #tpu.memory_space<vmem>>, %arg3: memref<1x1152xf32, #tpu.memory_space<vmem>>, %arg4: memref<16x1152xf32, #tpu.memory_space<vmem>>) attributes {dimension_semantics = [#tpu.dimension_semantics<parallel>], iteration_bounds = array<i64: 2>, scalar_prefetch = 0 : i64, scratch_operands = 0 : i64, tpu.core_type = #tpu.core_type<tc>, window_params = [{transform_indices = @transform_0, window_bounds = array<i64: 16, 128>}, {pipeline_mode = #tpu.pipeline_mode<synchronous>, transform_indices = @transform_1, window_bounds = array<i64: 128, 1152>}, {pipeline_mode = #tpu.pipeline_mode<synchronous>, transform_indices = @transform_2, window_bounds = array<i64: 1, 1152>}, {transform_indices = @transform_3, window_bounds = array<i64: 16, 1152>}]} {
    %c0 = arith.constant 0 : index
    %c0_0 = arith.constant 0 : index
    %0 = vector.load %arg1[%c0, %c0_0] : memref<16x128xf32, #tpu.memory_space<vmem>>, vector<16x128xf32>
    %c0_1 = arith.constant 0 : index
    %c0_2 = arith.constant 0 : index
    %1 = vector.load %arg2[%c0_1, %c0_2] : memref<128x1152xf32, #tpu.memory_space<vmem>>, vector<128x1152xf32>
    %cst = arith.constant dense<0.000000e+00> : vector<16x1152xf32>
    %2 = tpu.matmul %0, %1, %cst {dimension_numbers = #tpu.dot_dimension_numbers<[1], [0], [0], [1], [0, 0, 1, 1], [], []>, precision = #tpu.contract_precision<fp32>} : vector<16x128xf32>, vector<128x1152xf32>, vector<16x1152xf32> -> vector<16x1152xf32>
    %c0_3 = arith.constant 0 : index
    %c0_4 = arith.constant 0 : index
    %3 = vector.load %arg3[%c0_3, %c0_4] : memref<1x1152xf32, #tpu.memory_space<vmem>>, vector<1x1152xf32>
    %4 = vector.broadcast %3 : vector<1x1152xf32> to vector<16x1152xf32>
    %5 = arith.subf %2, %4 : vector<16x1152xf32>
    %6 = math.absf %5 : vector<16x1152xf32>
    %cst_5 = arith.constant 1.000000e+00 : f32
    %7 = vector.broadcast %cst_5 : f32 to vector<16x1152xf32>
    %8 = arith.subf %7, %6 : vector<16x1152xf32>
    %cst_6 = arith.constant 0.000000e+00 : f32
    %9 = vector.broadcast %cst_6 : f32 to vector<16x1152xf32>
    %10 = arith.maximumf %8, %9 : vector<16x1152xf32>
    %c0_7 = arith.constant 0 : index
    %c0_8 = arith.constant 0 : index
    %11 = vector.load %arg4[%c0_7, %c0_8] : memref<16x1152xf32, #tpu.memory_space<vmem>>, vector<16x1152xf32>
    tpu.vector_store %arg4[%c0_7, %c0_8], %10 {strides = array<i32>} : memref<16x1152xf32, #tpu.memory_space<vmem>>, vector<16x1152xf32>,
    return
  }
  func.func @transform_0(%arg0: i32) -> (i32, i32) {
    %c0_i32 = arith.constant 0 : i32
    %c0_i32_0 = arith.constant 0 : i32
    return %arg0, %c0_i32 : i32, i32
  }
  func.func @transform_1(%arg0: i32) -> (i32, i32) {
    %c0_i32 = arith.constant 0 : i32
    %c0_i32_0 = arith.constant 0 : i32
    %c0_i32_1 = arith.constant 0 : i32
    return %c0_i32, %c0_i32_0 : i32, i32
  }
  func.func @transform_2(%arg0: i32) -> (i32, i32) {
    %c0_i32 = arith.constant 0 : i32
    %c0_i32_0 = arith.constant 0 : i32
    %c0_i32_1 = arith.constant 0 : i32
    return %c0_i32, %c0_i32_0 : i32, i32
  }
  func.func @transform_3(%arg0: i32) -> (i32, i32) {
    %c0_i32 = arith.constant 0 : i32
    %c0_i32_0 = arith.constant 0 : i32
    return %arg0, %c0_i32 : i32, i32
  }
}

</mosaic_0001>

<bundles_post_ra>
// kernel: tpu_custom_call.1
= control target key start
LH: loop header
LB: loop body
LE: loop exit
PB: predicated region body
PF: predicated region fallthrough
CT: control target
= control target key end

     0   :  { %8 = vsyncpa [#allocation3], 0  ;;  %s8960_s0 = inlined_call_operand.hbm [shape: f32[32,128], index: 0, kind: input, shape index: {}]   ;;  %s8961_s1 = inlined_call_operand.hbm [shape: f32[128,1152], index: 1, kind: input, shape index: {}]   ;;  %s8962_s2 = inlined_call_operand.hbm [shape: f32[1,1152], index: 2, kind: input, shape index: {}]   ;;  %s8963_s3 = inlined_call_operand.hbm [shape: f32[32,1152], index: 3, kind: output, shape index: {}]  }
   0x1   :  { %10 = vsyncpa [#allocation3 + $0x1], 0 }
   0x2   :  { %11 = vsyncpa [#allocation6], 0 }
   0x3   :  { %12 = vsyncpa [#allocation4], 0 }
   0x4   :  { %14 = vsyncpa [#allocation4 + $0x1], 0  ;;  %s6562_s12 = smov 0   ;;  %s6564_s13 = smov 0  }
   0x5   :  { %s6566_s14 = smov 0   ;;  %s6568_s15 = smov 0  }
   0x6 LB: > { %s6583_s16 = sadd.s32 4294967295, %s6529_s15   ;;  %s4910_s17 = sadd.s32 4294967294, %s6529_s15   ;;  %s6529_s15 = sphi %s6568_s15, %s9932_s15   ;;  %s6525_s14 = sphi %s6566_s14, %s9931_s14   ;;  %s6521_s13 = sphi %s6564_s13, %s9930_s13   ;;  %s6517_s12 = sphi %s6562_s12, %s9929_s12  }
   0x7   : > { %p40_p0 = scmp.ne.s32.totalorder %s6521_s13, %s6517_s12  ;;  %p8964_p1 = scmp.eq.s32.totalorder %s6583_s16, 0 }
   0x8   : > { %p112_p3 = scmp.eq.s32.totalorder %s4910_s17, 1  ;;  %p4911_p5 = scmp.ge.s32.totalorder %s6529_s15, 1 }
   0x9   : > { %p6592_p4 = por %p8964_p1, %p40_p0  ;;  %p119_p7 = scmp.lt.s32.totalorder %s6529_s15, 3 }
   0xa   : > { %p6597_p6 = por %p112_p3, %p40_p0  ;;  %s6531_s21 = smov [#allocation5]  }
   0xb   : > { %s9303_s18 = scalar_select %p6592_p4, 1, 0 }
   0xc   : > { %s9304_s19 = scalar_select %p6597_p6, 1, 0 }
   0xd   : > { %p6602_p8 = pnand %p4911_p5, %p119_p7  ;;  %s131_s22 = sshll.u32 %s6531_s21, 4  ;;  %s6606_s22 = int_to_ptr.vmem [resolvable:$true] %s131_s22 }
   0xe   : > { %s6532_s24 = smov [#allocation7]   ;;  %s6373_s28 = scalar_lea.hbm %s8961_s1, 18432 }
   0xf   : > { %p6311_p9 = pneg %p6602_p8  ;;  %s145_s25 = sshll.u32 %s6532_s24, 4  ;;  %s6617_s25 = int_to_ptr.vmem [resolvable:$true] %s145_s25 }
  0x10   : > { %p6374_p12 = scmp.ne.s32.totalorder %s8961_s1, %s6373_s28  ;;  %p6380_p5 = scmp.lt.u32.totalorder %s6373_s28, %s8961_s1 }
  0x11   : > { %p6613_p11 = pnand %p6311_p9, %p8964_p1 }
  0x13   : > { %p6375_p13 = pneg %p6613_p11 }
  0x15   : > { %p6376_p0 = pnand %p6375_p13, %p6374_p12 }
  0x17   : > { %p6377_p3 = pneg %p6376_p0 }
  0x19   : > { %p6382_p7 = pnand %p6380_p5, %p6377_p3 }
  0x1b   : > { %6385 = shalt.err (!%p6382_p7)
}
  0x1c   : > { %s6386_s6 = scalar_lea.vmem %s6606_s22, 18432  ;;  %p6394_p2 = scmp.lt.s32.totalorder %s6606_s22, %s6606_s22 }
  0x1d   : > { %p6387_p9 = scmp.ne.s32.totalorder %s6606_s22, %s6386_s6  ;;  %p6395_p12 = scmp.lt.s32.totalorder %s6386_s6, %s6386_s6 }
  0x1f   : > { %p6389_p10 = pnand %p6387_p9, %p6375_p13  ;;  %p6396_p0 = por %p6395_p12, %p6394_p2 }
  0x21   : > { %p6390_p1 = pneg %p6389_p10 }
  0x23   : > { %p6397_p6 = pnand %p6396_p0, %p6390_p1 }
  0x25   : > { %6400 = shalt.err (!%p6397_p6)
}
  0x26   : > { %s6533_s7 = smov 1152   ;;  %s6534_s8 = smov 72  }
  0x27   : > { %6314 = dma.hbm_to_vmem [thread:$0]  (!%p6613_p11), %s8961_s1, 18432, %s6606_s22, [#allocation6], %s6533_s7, %s6533_s7, %s6534_s8  }
  0x28   : > { %s6401_s21 = scalar_lea.hbm %s8962_s2, 144 }
  0x29   : > { %p6402_p2 = scmp.ne.s32.totalorder %s8962_s2, %s6401_s21  ;;  %p6408_p10 = scmp.lt.u32.totalorder %s6401_s21, %s8962_s2 }
  0x2b   : > { %p6404_p1 = pnand %p6402_p2, %p6375_p13 }
  0x2d   : > { %p6405_p6 = pneg %p6404_p1 }
  0x2f   : > { %p6410_p3 = pnand %p6408_p10, %p6405_p6 }
  0x31   : > { %6413 = shalt.err (!%p6410_p3)
}
  0x32   : > { %s6414_s22 = scalar_lea.vmem %s6617_s25, 144  ;;  %s6421_s29 = scalar_lea.vmem %s6617_s25, 160 }
  0x33   : > { %p6415_p5 = scmp.ne.s32.totalorder %s6617_s25, %s6414_s22  ;;  %p6422_p12 = scmp.lt.s32.totalorder %s6617_s25, %s6617_s25 }
  0x34   : > { %p6423_p0 = scmp.lt.s32.totalorder %s6421_s29, %s6414_s22 }
  0x35   : > { %p6417_p7 = pnand %p6415_p5, %p6375_p13 }
  0x36   : > { %p6424_p2 = por %p6423_p0, %p6422_p12 }
  0x37   : > { %p6418_p9 = pneg %p6417_p7 }
  0x39   : > { %p6425_p1 = pnand %p6424_p2, %p6418_p9 }
  0x3b   : > { %6428 = shalt.err (!%p6425_p1)
}
  0x3c   : > { %6317 = dma.hbm_to_vmem [thread:$0]  (!%p6613_p11), %s8962_s2, 144, %s6617_s25, [#allocation6]  }
  0x3d   : > { %s6673_s5 = sadd.s32 1, %s6529_s15   ;;  %s27_s23 = sadd.s32 1, %s6525_s14 }
  0x3e   : > { %s24_s6 = ssub.s32 %s6529_s15, %s6673_s5  ;;  %p34_p13 = scmp.ne.s32.totalorder %s6525_s14, %s6521_s13 }
  0x3f   : > { %p25_p6 = scmp.eq.s32.totalorder %s24_s6, 0  ;;  %p35_p10 = scmp.eq.s32.totalorder %s6529_s15, 0 }
  0x40   : > { %p9307_p3 = scmp.eq.s32.totalorder %s6583_s16, 1  ;;  %p6328_p7 = scmp.lt.s32.totalorder %s6529_s15, 2 }
  0x41   : > { %s6689_s8 = scalar_select %p25_p6, %s6525_s14, %s27_s23  }
  0x42   : > { %p6683_p5 = por %p9307_p3, %p34_p13  ;;  %p36_p9 = por %p35_p10, %p34_p13 }
  0x43   : > { %s156_s9 = sand.u32 1, %s6525_s14   ;;  %s4928_s25 = sshll.u32 %s6529_s15, 8 }
  0x44   : > { %s9308_s7 = scalar_select %p6683_p5, 1, 0 }
  0x45   : > { %s4915_s10 = sshll.u32 %s156_s9, 4  ;;  %s6696_s21 = scalar_lea.hbm %s8960_s0, %s4928_s25 }
  0x46   : > { %s160_s24 = scalar_lea.vmem [#allocation2], %s4915_s10  ;;  %p6700_p11 = pnand %p6328_p7, %p36_p9 }
  0x47   : > { %s167_s26 = sshll.u32 %s160_s24, 4  ;;  %s6704_s28 = scalar_lea.sflag [#allocation3], %s156_s9  ;;  %s6698_s26 = int_to_ptr.vmem [resolvable:$true] %s167_s26 }
  0x48   : > { %s6429_s22 = scalar_lea.hbm %s6696_s21, 256  ;;  %p6431_p0 = pneg %p6700_p11 }
  0x49   : > { %p6430_p12 = scmp.ne.s32.totalorder %s6696_s21, %s6429_s22  ;;  %s6434_s4 = scalar_lea.hbm %s8960_s0, 512 }
  0x4a   : > { %p6435_p13 = scmp.lt.u32.totalorder %s6696_s21, %s8960_s0  ;;  %p6436_p6 = scmp.lt.u32.totalorder %s6434_s4, %s6429_s22 }
  0x4b   : > { %p6432_p2 = pnand %p6431_p0, %p6430_p12  ;;  %p6438_p3 = scmp.lt.u32.totalorder %s6429_s22, %s6696_s21 }
  0x4c   : > { %p6437_p10 = por %p6436_p6, %p6435_p13 }
  0x4d   : > { %p6433_p1 = pneg %p6432_p2 }
  0x4e   : > { %p6439_p7 = por %p6438_p3, %p6437_p10 }
  0x50   : > { %p6440_p9 = pnand %p6439_p7, %p6433_p1 }
  0x52   : > { %6443 = shalt.err (!%p6440_p9)
}
  0x53   : > { %s6444_s9 = scalar_lea.vmem %s6698_s26, 256  ;;  %s6535_s10 = smov [#allocation2]  }
  0x54   : > { %p6445_p12 = scmp.ne.s32.totalorder %s6698_s26, %s6444_s9  ;;  %s6449_s25 = sshll.u32 %s6535_s10, 4  ;;  %s6450_s25 = int_to_ptr.vmem [resolvable:$false] %s6449_s25 }
  0x55   : > { %s6451_s11 = scalar_lea.vmem %s6450_s25, 512  ;;  %p6452_p4 = scmp.lt.s32.totalorder %s6698_s26, %s6450_s25 }
  0x56   : > { %p6447_p2 = pnand %p6445_p12, %p6431_p0  ;;  %p6453_p13 = scmp.lt.s32.totalorder %s6451_s11, %s6444_s9 }
  0x58   : > { %p6448_p5 = pneg %p6447_p2  ;;  %p6454_p6 = por %p6453_p13, %p6452_p4 }
  0x5a   : > { %p6455_p10 = pnand %p6454_p6, %p6448_p5 }
  0x5c   : > { %6458 = shalt.err (!%p6455_p10)
}
  0x5d   : > { %s6536_s17 = smov 128   ;;  %s6537_s24 = smov 8  }
  0x5e   : > { %6321 = dma.hbm_to_vmem [thread:$0]  (!%p6700_p11), %s6696_s21, 256, %s6698_s26, %s6704_s28, %s6536_s17, %s6536_s17, %s6537_s24  }
  0x5f   : > { %179 = sbr.rel (%p6602_p8) target bundleno = 840 (0x348), region = 32 }
  0x66   : > { %s6735_s22 = sand.u32 1, %s6521_s13   ;;  %p9310_p4 = scmp.ne.s32.totalorder %s9303_s18, 0 }
  0x67   : > { %s4919_s29 = sshll.u32 %s6735_s22, 4  ;;  %s182_s30 = scalar_lea.sflag [#allocation3], %s6735_s22 }
  0x68   : > { %s6739_s4 = scalar_lea.vmem [#allocation2], %s4919_s29 }
  0x69   : > { %6504 = dma.done.wait (%p9310_p4), %s182_s30, 256  }
  0x6a   : > { %6506 = vsyncadd (%p9310_p4), %s182_s30, 4294967040  ;;  %p9311_p5 = scmp.eq.s32.totalorder %s6583_s16, 0 }
  0x6c   : > { %6508 = dma.done.wait (%p9311_p5), [#allocation6], 18576   ;;  %p9312_p8 = pmov %p9311_p5 }
  0x6d   : > { %v8967_v0 = vmov 0.0   ;;  %v221_v1 = vld [vmem:[#allocation5 + $0x8] sm:$0xff]  ;;  %v230_v2 = vld [vmem:[#allocation5 + $0x50] sm:$0xff]  ;;  %v220_v3 = vld [vmem:[#allocation5] sm:$0xff]  ;;  %s6297_s18 = smul.u32 144, %s6735_s22  ;;  %s4804_s6 = scalar_lea.sflag [#allocation4], %s6735_s22 }
  0x6e   : > { %6510 = vsyncadd (%p9312_p8), [#allocation6], 4294948720  ;;  %460 = vmatprep.mubr.f32.mxu1 %v8967_v0  ;;  %850 = vmatprep.mubr.f32.mxu0 %v8967_v0  ;;  %v364_v4 = vand.u32 4294901760, %v221_v1  ;;  %v368_v5 = vand.u32 4294901760, %v230_v2  ;;  %v229_v6 = vld [vmem:[#allocation5 + $0x48] sm:$0xff]  ;;  %v366_v7 = vand.u32 4294901760, %v220_v3 }
  0x6f   : > { %v239_v8 = vld [vmem:[#allocation5 + $0x98] sm:$0xff]  ;;  %v248_v9 = vld [vmem:[#allocation5 + $0xe0] sm:$0xff]  ;;  %v370_v10 = vand.u32 4294901760, %v229_v6  ;;  %v238_v13 = vld [vmem:[#allocation5 + $0x90] sm:$0xff]  ;;  %s8662_s20 = scalar_lea.vmem [#allocation8], %s6297_s18  ;;  %s6298_s21 = smul.u32 2304, %s6583_s16 }
  0x70   : > { %v372_v11 = vand.u32 4294901760, %v239_v8  ;;  %v376_v12 = vand.u32 4294901760, %v248_v9  ;;  %v6751_v14 = vpack.c.bf16 %v368_v5, %v364_v4  ;;  %v6753_v15 = vsub.f32 %v221_v1, %v364_v4  ;;  %v247_v18 = vld [vmem:[#allocation5 + $0xd8] sm:$0xff]  ;;  %v257_v19 = vld [vmem:[#allocation5 + $0x128] sm:$0xff]  ;;  %v266_v24 = vld [vmem:[#allocation5 + $0x170] sm:$0xff]  ;;  %s4818_s26 = sshll.u32 %s8662_s20, 4  ;;  %s8914_s26 = int_to_ptr.vmem [resolvable:$true] %s4818_s26 }
  0x71   : > { %v6755_v16 = vsub.f32 %v230_v2, %v368_v5  ;;  %v6757_v17 = vsub.f32 %v220_v3, %v366_v7  ;;  %v6759_v20 = vpack.c.bf16 %v370_v10, %v366_v7  ;;  %v6761_v21 = vsub.f32 %v229_v6, %v370_v10  ;;  %v256_v25 = vld [vmem:[#allocation5 + $0x120] sm:$0xff]  ;;  %v265_v30 = vld [vmem:[#allocation5 + $0x168] sm:$0xff]  ;;  %v275_v35 = vld [vmem:[#allocation5 + $0x1b8] sm:$0xff]  ;;  %s8912_s23 = scalar_lea.hbm %s8963_s3, %s6298_s21  ;;  %s6459_s16 = scalar_lea.vmem %s8914_s26, 2304 }
  0x72   : > { %9313 = vst [vmem:[#allocation12_spill] sm:$0xff] %v6751_v14  ;;  %9314 = vst [vmem:[#allocation13_spill] sm:$0xff] %v6753_v15  ;;  %v6763_v22 = vpack.c.bf16 %v376_v12, %v372_v11  ;;  %v6765_v23 = vsub.f32 %v239_v8, %v372_v11  ;;  %5248 = vmatprep.subr.bf16.mxu1 %v6751_v14  ;;  %v6771_v28 = vsub.f32 %v248_v9, %v376_v12  ;;  %v284_v40 = vld [vmem:[#allocation5 + $0x200] sm:$0xff]  ;;  %v274_v45 = vld [vmem:[#allocation5 + $0x1b0] sm:$0xff]  ;;  %p6460_p11 = scmp.ne.s32.totalorder %s8914_s26, %s6459_s16  ;;  %p9926_p0 = scmp.ne.s32.totalorder %s9308_s7, 0 }
  0x73   : > { %9315 = vst [vmem:[#allocation14_spill] sm:$0xff] %v6755_v16  ;;  %9316 = vst [vmem:[#allocation15_spill] sm:$0xff] %v6757_v17  ;;  %v5311_v26 = vpack.c.bf16 %v6755_v16, %v6753_v15  ;;  %v8971_v27 = vand.u32 4294901760, %v6757_v17  ;;  %v374_v29 = vand.u32 4294901760, %v238_v13  ;;  %5250 = vmatpush1.bf16.msra.mxu1 %v6759_v20  ;;  %v5313_v32 = vpack.c.bf16 %v6761_v21, %v6757_v17  ;;  %v283_v46 = vld [vmem:[#allocation5 + $0x1f8] sm:$0xff]  ;;  %v293_v51 = vld [vmem:[#allocation5 + $0x248] sm:$0xff] }
  0x74   : > { %9317 = vst [vmem:[#allocation16_spill] sm:$0xff] %v6759_v20  ;;  %9318 = vst [vmem:[#allocation17_spill] sm:$0xff] %v6763_v22  ;;  %v378_v33 = vand.u32 4294901760, %v247_v18  ;;  %v380_v34 = vand.u32 4294901760, %v257_v19  ;;  %5252 = vmatprep.subr.bf16.mxu1 %v6763_v22  ;;  %v5315_v37 = vpack.c.bf16 %v6771_v28, %v6765_v23  ;;  %v384_v38 = vand.u32 4294901760, %v266_v24  ;;  %v302_v56 = vld [vmem:[#allocation5 + $0x290] sm:$0xff]  ;;  %p6461_p1 = pnand %p6460_p11, %p9926_p0 }
  0x75   : > { %9319 = vst [vmem:[#allocation18_spill] sm:$0xff] %v6765_v23  ;;  %9320 = vst [vmem:[#allocation19_spill] sm:$0xff] %v6771_v28  ;;  %5312 = vmatprep.subr.bf16.mxu0 %v5311_v26  ;;  %v6778_v36 = vsub.f32 %v238_v13, %v374_v29  ;;  %v382_v39 = vand.u32 4294901760, %v256_v25  ;;  %v386_v44 = vand.u32 4294901760, %v265_v30  ;;  %v388_v50 = vand.u32 4294901760, %v275_v35  ;;  %v292_v61 = vld [vmem:[#allocation5 + $0x240] sm:$0xff] }
  0x76   : > { %5314 = vmatpush1.bf16.msra.mxu0 %v5313_v32  ;;  %v6782_v41 = vpack.c.bf16 %v378_v33, %v374_v29  ;;  %v6784_v42 = vsub.f32 %v247_v18, %v378_v33  ;;  %v6786_v43 = vsub.f32 %v257_v19, %v380_v34  ;;  %v6788_v47 = vpack.c.bf16 %v384_v38, %v380_v34  ;;  %v301_v62 = vld [vmem:[#allocation5 + $0x288] sm:$0xff]  ;;  %v311_v4 = vld [vmem:[#allocation5 + $0x2d8] sm:$0xff]  ;;  %v320_v9 = vld [vmem:[#allocation5 + $0x320] sm:$0xff]  ;;  %p6462_p3 = pneg %p6461_p1  ;;  %s6539_s9 = smov [#allocation8]  }
  0x77   : > { %5316 = vmatprep.subr.bf16.mxu0 %v5315_v37  ;;  %v6790_v48 = vsub.f32 %v266_v24, %v384_v38  ;;  %v6792_v49 = vsub.f32 %v256_v25, %v382_v39  ;;  %v6797_v53 = vpack.c.bf16 %v386_v44, %v382_v39  ;;  %v6799_v54 = vsub.f32 %v265_v30, %v386_v44  ;;  %v310_v18 = vld [vmem:[#allocation5 + $0x2d0] sm:$0xff]  ;;  %v319_v19 = vld [vmem:[#allocation5 + $0x318] sm:$0xff]  ;;  %v329_v30 = vld [vmem:[#allocation5 + $0x368] sm:$0xff]  ;;  %s6463_s10 = sshll.u32 %s6539_s9, 4  ;;  %s6464_s10 = int_to_ptr.vmem [resolvable:$false] %s6463_s10 }
  0x78   : > { %9321 = vst [vmem:[#allocation20_spill] sm:$0xff] %v6782_v41  ;;  %9322 = vst [vmem:[#allocation21_spill] sm:$0xff] %v6788_v47  ;;  %5254 = vmatpush1.bf16.msra.mxu1 %v6782_v41  ;;  %v5317_v52 = vpack.c.bf16 %v6784_v42, %v6778_v36  ;;  %v392_v55 = vand.u32 4294901760, %v284_v40  ;;  %v6804_v58 = vsub.f32 %v275_v35, %v388_v50  ;;  %v390_v59 = vand.u32 4294901760, %v274_v45  ;;  %v338_v37 = vld [vmem:[#allocation5 + $0x3b0] sm:$0xff]  ;;  %s6465_s25 = scalar_lea.vmem %s6464_s10, 4608  ;;  %p6466_p7 = scmp.lt.s32.totalorder %s8914_s26, %s6464_s10 }
  0x79   : > { %9323 = vst [vmem:[#allocation22_spill] sm:$0xff] %v6797_v53  ;;  %5256 = vmatprep.subr.bf16.mxu1 %v6788_v47  ;;  %v5319_v57 = vpack.c.bf16 %v6790_v48, %v6786_v43  ;;  %v394_v60 = vand.u32 4294901760, %v283_v46  ;;  %v5321_v63 = vpack.c.bf16 %v6799_v54, %v6792_v49  ;;  %v396_v3 = vand.u32 4294901760, %v293_v51  ;;  %p6467_p9 = scmp.lt.s32.totalorder %s6465_s25, %s6459_s16 }
  0x7a   : > { %5318 = vmatpush1.bf16.msra.mxu0 %v5317_v52  ;;  %v6808_v1 = vpack.c.bf16 %v392_v55, %v388_v50  ;;  %v6810_v2 = vsub.f32 %v284_v40, %v392_v55  ;;  %v6814_v6 = vsub.f32 %v274_v45, %v390_v59  ;;  %v400_v8 = vand.u32 4294901760, %v302_v56  ;;  %v328_v45 = vld [vmem:[#allocation5 + $0x360] sm:$0xff] }
  0x7b   : > { %5320 = vmatprep.subr.bf16.mxu0 %v5319_v57  ;;  %v6812_v5 = vpack.c.bf16 %v394_v60, %v390_v59  ;;  %v6816_v7 = vsub.f32 %v283_v46, %v394_v60  ;;  %v6821_v11 = vsub.f32 %v293_v51, %v396_v3  ;;  %v398_v12 = vand.u32 4294901760, %v292_v61  ;;  %v337_v46 = vld [vmem:[#allocation5 + $0x3a8] sm:$0xff]  ;;  %p6468_p12 = por %p6467_p9, %p6466_p7 }
  0x7c   : > { %9324 = vst [vmem:[#allocation23_spill] sm:$0xff] %v6808_v1  ;;  %5258 = vmatpush1.bf16.msra.mxu1 %v6797_v53  ;;  %v5323_v10 = vpack.c.bf16 %v6810_v2, %v6804_v58  ;;  %v402_v13 = vand.u32 4294901760, %v301_v62  ;;  %v6826_v25 = vpack.c.bf16 %v400_v8, %v396_v3  ;;  %v6828_v26 = vsub.f32 %v302_v56, %v400_v8  ;;  %v347_v56 = vld [vmem:[#allocation5 + $0x3f8] sm:$0xff] }
  0x7d   : > { %9325 = vst [vmem:[#allocation24_spill] sm:$0xff] %v6812_v5  ;;  %5260 = vmatprep.subr.bf16.mxu1 %v6808_v1  ;;  %v5325_v24 = vpack.c.bf16 %v6816_v7, %v6814_v6  ;;  %v404_v29 = vand.u32 4294901760, %v311_v4  ;;  %v6832_v33 = vsub.f32 %v292_v61, %v398_v12  ;;  %v408_v35 = vand.u32 4294901760, %v320_v9  ;;  %p6469_p2 = pnand %p6468_p12, %p6462_p3 }
  0x7e   : > { %9326 = vst [vmem:[#allocation25_spill] sm:$0xff] %v6826_v25  ;;  %5322 = vmatpush1.bf16.msra.mxu0 %v5321_v63  ;;  %v6830_v32 = vpack.c.bf16 %v402_v13, %v398_v12  ;;  %v6834_v34 = vsub.f32 %v301_v62, %v402_v13  ;;  %v5327_v38 = vpack.c.bf16 %v6828_v26, %v6821_v11  ;;  %v406_v40 = vand.u32 4294901760, %v310_v18  ;;  %v356_v62 = vld [vmem:[#allocation5 + $0x440] sm:$0xff] }
  0x7f   : > { %5324 = vmatprep.subr.bf16.mxu0 %v5323_v10  ;;  %v6838_v39 = vsub.f32 %v311_v4, %v404_v29  ;;  %v410_v44 = vand.u32 4294901760, %v319_v19  ;;  %v6843_v51 = vpack.c.bf16 %v408_v35, %v404_v29  ;;  %v6845_v52 = vsub.f32 %v320_v9, %v408_v35  ;;  %v346_v9 = vld [vmem:[#allocation5 + $0x3f0] sm:$0xff]  ;;  %v355_v10 = vld [vmem:[#allocation5 + $0x438] sm:$0xff] }
  0x80   : > { %9327 = vst [vmem:[#allocation26_spill] sm:$0xff] %v6830_v32  ;;  %5262 = vmatpush1.bf16.msra.mxu1 %v6812_v5  ;;  %v5329_v50 = vpack.c.bf16 %v6834_v34, %v6832_v33  ;;  %v412_v55 = vand.u32 4294901760, %v329_v30  ;;  %v6850_v59 = vsub.f32 %v310_v18, %v406_v40  ;;  %v416_v61 = vand.u32 4294901760, %v338_v37 }
  0x81   : > { %9328 = vst [vmem:[#allocation27_spill] sm:$0xff] %v6843_v51  ;;  %5264 = vmatprep.subr.bf16.mxu1 %v6826_v25  ;;  %v6848_v57 = vpack.c.bf16 %v410_v44, %v406_v40  ;;  %v6852_v60 = vsub.f32 %v319_v19, %v410_v44  ;;  %v5331_v63 = vpack.c.bf16 %v6845_v52, %v6838_v39  ;;  %v414_v4 = vand.u32 4294901760, %v328_v45 }
  0x82   : > { %5326 = vmatpush1.bf16.msra.mxu0 %v5325_v24  ;;  %v6856_v3 = vsub.f32 %v329_v30, %v412_v55  ;;  %v418_v8 = vand.u32 4294901760, %v337_v46  ;;  %v6860_v13 = vpack.c.bf16 %v416_v61, %v412_v55  ;;  %v6862_v18 = vsub.f32 %v338_v37, %v416_v61  ;;  %v218_v55 = vld [vmem:[%s6739_s4] sm:$0xff] }
  0x83   : > { %9329 = vst [vmem:[#allocation28_spill] sm:$0xff] %v6848_v57  ;;  %5328 = vmatprep.subr.bf16.mxu0 %v5327_v38  ;;  %v5333_v12 = vpack.c.bf16 %v6852_v60, %v6850_v59  ;;  %v420_v19 = vand.u32 4294901760, %v347_v56  ;;  %v6867_v29 = vsub.f32 %v328_v45, %v414_v4  ;;  %v424_v35 = vand.u32 4294901760, %v356_v62 }
  0x84   : > { %9330 = vst [vmem:[#allocation29_spill] sm:$0xff] %v6860_v13  ;;  %5266 = vmatpush1.bf16.msra.mxu1 %v6830_v32  ;;  %v6865_v24 = vpack.c.bf16 %v418_v8, %v414_v4  ;;  %v6869_v30 = vsub.f32 %v337_v46, %v418_v8  ;;  %v5335_v38 = vpack.c.bf16 %v6862_v18, %v6856_v3  ;;  %v422_v44 = vand.u32 4294901760, %v346_v9 }
  0x85   : > { %9332 = vst [vmem:[#allocation31_spill] sm:$0xff] %v6867_v29  ;;  %5268 = vmatprep.subr.bf16.mxu1 %v6843_v51  ;;  %v6874_v40 = vsub.f32 %v347_v56, %v420_v19  ;;  %v426_v37 = vand.u32 4294901760, %v355_v10  ;;  %v6879_v0 = vpack.c.bf16 %v424_v35, %v420_v19  ;;  %v6881_v45 = vsub.f32 %v356_v62, %v424_v35 }
  0x86   : > { %9331 = vst [vmem:[#allocation30_spill] sm:$0xff] %v6865_v24  ;;  %9333 = vst [vmem:[#allocation32_spill] sm:$0xff] %v6869_v30  ;;  %5330 = vmatpush1.bf16.msra.mxu0 %v5329_v50  ;;  %v5337_v61 = vpack.c.bf16 %v6869_v30, %v6867_v29  ;;  %v8969_v46 = vand.u32 4294901760, %v6753_v15  ;;  %v6886_v8 = vsub.f32 %v346_v9, %v422_v44  ;;  %v8977_v31 = vand.u32 4294901760, %v6755_v16 }
  0x87   : > { %9334 = vst [vmem:[#allocation33_spill] sm:$0xff] %v6874_v40  ;;  %9335 = vst [vmem:[#allocation34_spill] sm:$0xff] %v6879_v0  ;;  %5332 = vmatprep.subr.bf16.mxu0 %v5331_v63  ;;  %v6884_v4 = vpack.c.bf16 %v426_v37, %v422_v44  ;;  %v6888_v56 = vsub.f32 %v355_v10, %v426_v37  ;;  %v5339_v50 = vpack.c.bf16 %v6881_v45, %v6874_v40 }
  0x88   : > { %9336 = vst [vmem:[#allocation35_spill] sm:$0xff] %v6881_v45  ;;  %9338 = vst [vmem:[#allocation37_spill] sm:$0xff] %v6886_v8  ;;  %5270 = vmatpush1.bf16.msra.mxu1 %v6848_v57  ;;  %v486_v62 = vsub.f32 %v6753_v15, %v8969_v46  ;;  %v6897_v19 = vand.u32 4294901760, %v218_v55  ;;  %v492_v63 = vsub.f32 %v6757_v17, %v8971_v27  ;;  %v9341_v35 = vand.u32 4294901760, %v6761_v21 }
  0x89   : > { %9337 = vst [vmem:[#allocation36_spill] sm:$0xff] %v6884_v4  ;;  %9339 = vst [vmem:[#allocation38_spill] sm:$0xff] %v6888_v56  ;;  %5272 = vmatprep.subr.bf16.mxu1 %v6860_v13  ;;  %v5341_v9 = vpack.c.bf16 %v6888_v56, %v6886_v8  ;;  %v498_v10 = vsub.f32 %v6755_v16, %v8977_v31  ;;  %v8979_v37 = vand.u32 4294901760, %v6765_v23  ;;  %v8981_v17 = vand.u32 4294901760, %v6771_v28 }
  0x8a   : > { %9340 = vst [vmem:[#allocation39_spill] sm:$0xff] %v6897_v19  ;;  %v504_v44 = vsub.f32 %v6761_v21, %v9341_v35  ;;  %5334 = vmatpush1.bf16.msra.mxu0 %v5333_v12  ;;  %v487_v46 = vand.u32 4294901760, %v486_v62  ;;  %v6913_v15 = vsub.f32 %v218_v55, %v6897_v19  ;;  %v493_v27 = vand.u32 4294901760, %v492_v63 }
  0x8b   : > { %5336 = vmatprep.subr.bf16.mxu0 %v5335_v38  ;;  %v499_v13 = vand.u32 4294901760, %v498_v10  ;;  %v510_v31 = vsub.f32 %v6765_v23, %v8979_v37  ;;  %v8983_v16 = vand.u32 4294901760, %v6778_v36  ;;  %v522_v55 = vsub.f32 %v6771_v28, %v8981_v17 }
  0x8c   : > { %9342 = vst [vmem:[#allocation40_spill] sm:$0xff] %v6913_v15  ;;  %v505_v57 = vand.u32 4294901760, %v504_v44  ;;  %5274 = vmatpush1.bf16.msra.mxu1 %v6865_v24  ;;  %v6922_v12 = vand.u32 4294901760, %v6913_v15  ;;  %v8985_v62 = vand.u32 4294901760, %v6784_v42  ;;  %v8984_v38 = vand.u32 4294901760, %v6786_v43 }
  0x8d   : > { %5276 = vmatprep.subr.bf16.mxu1 %v6879_v0  ;;  %v5279_v63 = vpack.c.bf16 %v499_v13, %v487_v46  ;;  %v511_v35 = vand.u32 4294901760, %v510_v31  ;;  %v516_v44 = vsub.f32 %v6778_v36, %v8983_v16  ;;  %v523_v23 = vand.u32 4294901760, %v522_v55 }
  0x8e   : > { %9343 = vst [vmem:[#allocation41_spill] sm:$0xff] %v6922_v12  ;;  %v5281_v10 = vpack.c.bf16 %v505_v57, %v493_v27  ;;  %5338 = vmatpush1.bf16.msra.mxu0 %v5337_v61  ;;  %v464_v37 = vsub.f32 %v6913_v15, %v6922_v12  ;;  %v528_v17 = vsub.f32 %v6784_v42, %v8985_v62  ;;  %v8990_v31 = vand.u32 4294901760, %v6790_v48 }
  0x8f   : > { %v534_v28 = vsub.f32 %v6786_v43, %v8984_v38  ;;  %5340 = vmatprep.subr.bf16.mxu0 %v5339_v50  ;;  %v517_v27 = vand.u32 4294901760, %v516_v44  ;;  %v8986_v57 = vand.u32 4294901760, %v6792_v49  ;;  %v8987_v13 = vand.u32 4294901760, %v6799_v54 }
  0x90   : > { %5278 = vmatpush1.bf16.msra.mxu1 %v6884_v4  ;;  %v6945_v61 = vand.u32 4294901760, %v464_v37  ;;  %v5283_v46 = vpack.c.bf16 %v523_v23, %v511_v35  ;;  %v529_v55 = vand.u32 4294901760, %v528_v17  ;;  %v546_v38 = vsub.f32 %v6790_v48, %v8990_v31 }
  0x91   : > { %v535_v16 = vand.u32 4294901760, %v534_v28  ;;  %5280 = vmatprep.subr.bf16.mxu1 %v5279_v63  ;;  %v540_v50 = vsub.f32 %v6792_v49, %v8986_v57  ;;  %v552_v44 = vsub.f32 %v6799_v54, %v8987_v13  ;;  %v8988_v62 = vand.u32 4294901760, %v6804_v58 }
  0x92   : > { %9344 = vst [vmem:[#allocation42_spill] sm:$0xff] %v6945_v61  ;;  %5342 = vmatpush1.bf16.msra.mxu0 %v5341_v9  ;;  %v5285_v37 = vpack.c.bf16 %v529_v55, %v517_v27  ;;  %v8989_v17 = vand.u32 4294901760, %v6810_v2  ;;  %v8991_v23 = vand.u32 4294901760, %v6814_v6  ;;  %v8992_v28 = vand.u32 4294901760, %v6816_v7 }
  0x93   : > { %466 = vmatmul.mubr.f32.vlgmr.msra.gmra.mrb[0].mxu1 %v6945_v61  ;;  %5344 = vmatprep.subr.bf16.mxu0 %v6751_v14  ;;  %v547_v63 = vand.u32 4294901760, %v546_v38  ;;  %v541_v35 = vand.u32 4294901760, %v540_v50  ;;  %v553_v57 = vand.u32 4294901760, %v552_v44  ;;  %v558_v13 = vsub.f32 %v6804_v58, %v8988_v62  ;;  %v258_v61 = vld [vmem:[#allocation5 + $0x130] sm:$0xff] }
  0x94   : > { %5282 = vmatpush1.bf16.msra.mxu1 %v5281_v10  ;;  %v570_v9 = vsub.f32 %v6810_v2, %v8989_v17  ;;  %v564_v27 = vsub.f32 %v6814_v6, %v8991_v23  ;;  %v576_v55 = vsub.f32 %v6816_v7, %v8992_v28  ;;  %v8993_v38 = vand.u32 4294901760, %v6821_v11 }
  0x95   : > { %v9345_v50 = vmov 0.0   ;;  %853 = vmatmul.mubr.f32.vlgmr.msra.gmra.mrb[0].mxu0 %v6913_v15  ;;  %5284 = vmatprep.subr.bf16.mxu1 %v5283_v46  ;;  %v5287_v10 = vpack.c.bf16 %v547_v63, %v535_v16  ;;  %v559_v44 = vand.u32 4294901760, %v558_v13  ;;  %v8997_v62 = vand.u32 4294901760, %v6828_v26 }
  0x96   : > { %471 = vmatprep.mubr.f32.mxu1 %v9345_v50  ;;  %5346 = vmatpush1.bf16.msra.mxu0 %v6759_v20  ;;  %v571_v17 = vand.u32 4294901760, %v570_v9  ;;  %v565_v31 = vand.u32 4294901760, %v564_v27  ;;  %v577_v23 = vand.u32 4294901760, %v576_v55  ;;  %v582_v28 = vsub.f32 %v6821_v11, %v8993_v38 }
  0x97   : > { %858 = vmatprep.mubr.f32.mxu0 %v9345_v50  ;;  %5348 = vmatprep.subr.bf16.mxu0 %v6763_v22  ;;  %v594_v16 = vsub.f32 %v6828_v26, %v8997_v62  ;;  %v9001_v13 = vand.u32 4294901760, %v6832_v33  ;;  %v9000_v46 = vand.u32 4294901760, %v6834_v34  ;;  %v8999_v63 = vand.u32 4294901760, %v6838_v39 }
  0x98   : > { %5286 = vmatpush1.bf16.msra.mxu1 %v5285_v37  ;;  %v5289_v9 = vpack.c.bf16 %v553_v57, %v541_v35  ;;  %v5291_v27 = vpack.c.bf16 %v571_v17, %v559_v44  ;;  %v583_v55 = vand.u32 4294901760, %v582_v28  ;;  %v9002_v38 = vand.u32 4294901760, %v6845_v52 }
  0x99   : > { %5288 = vmatprep.subr.bf16.mxu1 %v5287_v10  ;;  %v595_v15 = vand.u32 4294901760, %v594_v16  ;;  %v588_v22 = vsub.f32 %v6832_v33, %v9001_v13  ;;  %v600_v62 = vsub.f32 %v6834_v34, %v9000_v46  ;;  %v606_v20 = vsub.f32 %v6838_v39, %v8999_v63 }
  0x9a   : > { %5350 = vmatpush1.bf16.msra.mxu0 %v6782_v41  ;;  %v618_v57 = vsub.f32 %v6845_v52, %v9002_v38  ;;  %v9007_v37 = vand.u32 4294901760, %v6850_v59  ;;  %v9006_v17 = vand.u32 4294901760, %v6852_v60  ;;  %v9004_v28 = vand.u32 4294901760, %v6856_v3  ;;  %v219_v41 = vld [vmem:[%s6739_s4 + $0x8] sm:$0xff] }
  0x9b   : > { %5352 = vmatprep.subr.bf16.mxu0 %v6788_v47  ;;  %v5293_v35 = vpack.c.bf16 %v577_v23, %v565_v31  ;;  %v5295_v10 = vpack.c.bf16 %v595_v15, %v583_v55  ;;  %v589_v44 = vand.u32 4294901760, %v588_v22  ;;  %v601_v16 = vand.u32 4294901760, %v600_v62 }
  0x9c   : > { %5290 = vmatpush1.bf16.msra.mxu1 %v5289_v9  ;;  %v607_v63 = vand.u32 4294901760, %v606_v20  ;;  %v619_v46 = vand.u32 4294901760, %v618_v57  ;;  %v612_v13 = vsub.f32 %v6850_v59, %v9007_v37  ;;  %v624_v38 = vsub.f32 %v6852_v60, %v9006_v17 }
  0x9d   : > { %5292 = vmatprep.subr.bf16.mxu1 %v5291_v27  ;;  %v630_v31 = vsub.f32 %v6856_v3, %v9004_v28  ;;  %v9005_v15 = vand.u32 4294901760, %v6862_v18  ;;  %v9009_v22 = vand.u32 4294901760, %v6867_v29  ;;  %v9008_v20 = vand.u32 4294901760, %v6869_v30 }
  0x9e   : > { %5354 = vmatpush1.bf16.msra.mxu0 %v6797_v53  ;;  %v5297_v62 = vpack.c.bf16 %v601_v16, %v589_v44  ;;  %v613_v23 = vand.u32 4294901760, %v612_v13  ;;  %v625_v9 = vand.u32 4294901760, %v624_v38  ;;  %v7029_v57 = vand.u32 4294901760, %v219_v41 }
  0x9f   : > { %5356 = vmatprep.subr.bf16.mxu0 %v6808_v1  ;;  %v642_v27 = vsub.f32 %v6862_v18, %v9005_v15  ;;  %v636_v55 = vsub.f32 %v6867_v29, %v9009_v22  ;;  %v648_v28 = vsub.f32 %v6869_v30, %v9008_v20  ;;  %v9011_v13 = vand.u32 4294901760, %v6874_v40  ;;  %v9353_v1 = vld [vmem:[#allocation13_spill] sm:$0xff]  ;;  %v9367_v29 = vld [vmem:[#allocation19_spill] sm:$0xff] }
  0xa0   : > { %9346 = vst [vmem:[#allocation43_spill] sm:$0xff] %v7029_v57  ;;  %5294 = vmatpush1.bf16.msra.mxu1 %v5293_v35  ;;  %v9010_v44 = vand.u32 4294901760, %v6881_v45  ;;  %v9012_v38 = vand.u32 4294901760, %v6886_v8  ;;  %v5299_v16 = vpack.c.bf16 %v619_v46, %v607_v63  ;;  %v631_v15 = vand.u32 4294901760, %v630_v31 }
  0xa1   : > { %5296 = vmatprep.subr.bf16.mxu1 %v5295_v10  ;;  %v643_v17 = vand.u32 4294901760, %v642_v27  ;;  %v7038_v37 = vsub.f32 %v219_v41, %v7029_v57  ;;  %v654_v35 = vsub.f32 %v6874_v40, %v9011_v13  ;;  %v9013_v22 = vand.u32 4294901760, %v6888_v56  ;;  %v9365_v40 = vld [vmem:[#allocation18_spill] sm:$0xff] }
  0xa2   : > { %5358 = vmatpush1.bf16.msra.mxu0 %v6812_v5  ;;  %v666_v20 = vsub.f32 %v6881_v45, %v9010_v44  ;;  %v5301_v46 = vpack.c.bf16 %v625_v9, %v613_v23  ;;  %v637_v41 = vand.u32 4294901760, %v636_v55  ;;  %v649_v10 = vand.u32 4294901760, %v648_v28  ;;  %v223_v28 = vld [vmem:[#allocation5 + $0x18] sm:$0xff]  ;;  %v268_v5 = vld [vmem:[#allocation5 + $0x180] sm:$0xff] }
  0xa3   : > { %9347 = vst [vmem:[#allocation44_spill] sm:$0xff] %v7038_v37  ;;  %5360 = vmatprep.subr.bf16.mxu0 %v6826_v25  ;;  %v7050_v63 = vand.u32 4294901760, %v7038_v37  ;;  %861 = vmatmul.mubr.f32.gmra.mrb[2].mxu0 %v7038_v37  ;;  %v660_v31 = vsub.f32 %v6886_v8, %v9012_v38  ;;  %v672_v27 = vsub.f32 %v6888_v56, %v9013_v22  ;;  %v655_v44 = vand.u32 4294901760, %v654_v35  ;;  %v222_v35 = vld [vmem:[#allocation5 + $0x10] sm:$0xff]  ;;  %v267_v56 = vld [vmem:[#allocation5 + $0x178] sm:$0xff] }
  0xa4   : > { %5298 = vmatpush1.bf16.msra.mxu1 %v5297_v62  ;;  %963 = vmatprep.mubr.f32.mxu0 %v9345_v50  ;;  %v5303_v23 = vpack.c.bf16 %v643_v17, %v631_v15  ;;  %v667_v13 = vand.u32 4294901760, %v666_v20  ;;  %v232_v62 = vld [vmem:[#allocation5 + $0x60] sm:$0xff]  ;;  %v5305_v38 = vpack.c.bf16 %v649_v10, %v637_v41  ;;  %v1268_v15 = vand.u32 4294901760, %v223_v28  ;;  %v231_v20 = vld [vmem:[#allocation5 + $0x58] sm:$0xff]  ;;  %v286_v8 = vld [vmem:[#allocation5 + $0x210] sm:$0xff] }
  0xa5   : > { %9348 = vst [vmem:[#allocation45_spill] sm:$0xff] %v7050_v63  ;;  %5300 = vmatprep.subr.bf16.mxu1 %v5299_v16  ;;  %v475_v9 = vsub.f32 %v7038_v37, %v7050_v63  ;;  %v661_v22 = vand.u32 4294901760, %v660_v31  ;;  %v673_v25 = vand.u32 4294901760, %v672_v27  ;;  %v1272_v16 = vand.u32 4294901760, %v232_v62  ;;  %v9350_v37 = vld [vmem:[#allocation28_spill] sm:$0xff]  ;;  %v240_v27 = vld [vmem:[#allocation5 + $0xa0] sm:$0xff] }
  0xa6   : > { %5362 = vmatpush1.bf16.msra.mxu0 %v6830_v32  ;;  %v5307_v17 = vpack.c.bf16 %v667_v13, %v655_v44  ;;  %v241_v32 = vld [vmem:[#allocation5 + $0xa8] sm:$0xff]  ;;  %v1270_v41 = vand.u32 4294901760, %v222_v35  ;;  %v1274_v10 = vand.u32 4294901760, %v231_v20  ;;  %v9354_v53 = vand.u32 4294901760, %v9353_v1 }
  0xa7   : > { %5364 = vmatprep.subr.bf16.mxu0 %v6843_v51  ;;  %v7064_v55 = vand.u32 4294901760, %v475_v9  ;;  %v250_v51 = vld [vmem:[#allocation5 + $0xf0] sm:$0xff]  ;;  %v7070_v31 = vpack.c.bf16 %v1272_v16, %v1268_v15  ;;  %v1276_v13 = vand.u32 4294901760, %v241_v32  ;;  %v9360_v1 = vld [vmem:[#allocation15_spill] sm:$0xff]  ;;  %v9366_v30 = vand.u32 4294901760, %v9365_v40 }
  0xa8   : > { %5302 = vmatpush1.bf16.msra.mxu1 %v5301_v46  ;;  %v9351_v9 = vld [vmem:[#allocation29_spill] sm:$0xff]  ;;  %v5309_v46 = vpack.c.bf16 %v673_v25, %v661_v22  ;;  %v1280_v44 = vand.u32 4294901760, %v250_v51  ;;  %v7078_v22 = vpack.c.bf16 %v1274_v10, %v1270_v41  ;;  %v7093_v45 = vsub.f32 %v222_v35, %v1270_v41  ;;  %v276_v35 = vld [vmem:[#allocation5 + $0x1c0] sm:$0xff] }
  0xa9   : > { %9349 = vst [vmem:[#allocation46_spill] sm:$0xff] %v7064_v55  ;;  %5304 = vmatprep.subr.bf16.mxu1 %v5303_v23  ;;  %477 = vmatmul.mubr.f32.gmra.mrb[2].mxu1 %v7064_v55  ;;  %9352 = vst [vmem:[#allocation47_spill] sm:$0xff] %v7070_v31  ;;  %v249_v23 = vld [vmem:[#allocation5 + $0xe8] sm:$0xff]  ;;  %v9372_v40 = vand.u32 4294901760, %v6784_v42  ;;  %v7113_v41 = vsub.f32 %v241_v32, %v1276_v13  ;;  %v9381_v32 = vand.u32 4294901760, %v6790_v48 }
  0xaa   : > { %5366 = vmatpush1.bf16.msra.mxu0 %v9350_v37  ;;  %707 = vmatprep.mubr.f32.mxu1 %v9345_v50  ;;  %v259_v37 = vld [vmem:[#allocation5 + $0x138] sm:$0xff]  ;;  %9357 = vst [vmem:[#allocation13_spill] sm:$0xff] %v7078_v22  ;;  %v1282_v47 = vand.u32 4294901760, %v249_v23  ;;  %v7081_v55 = vpack.c.bf16 %v1280_v44, %v1276_v13  ;;  %9364 = vst [vmem:[#allocation49_spill] sm:$0xff] %v7093_v45 }
  0xab   : > { %5368 = vmatprep.subr.bf16.mxu0 %v9351_v9  ;;  %v9355_v9 = vld [vmem:[#allocation14_spill] sm:$0xff]  ;;  %v1284_v14 = vand.u32 4294901760, %v259_v37  ;;  %9374 = vst [vmem:[#allocation51_spill] sm:$0xff] %v7113_v41 }
  0xac   : > { %5306 = vmatpush1.bf16.msra.mxu1 %v5305_v38  ;;  %v9356_v38 = vand.u32 4294901760, %v9355_v9  ;;  %9358 = vst [vmem:[#allocation14_spill] sm:$0xff] %v7081_v55  ;;  %v9361_v9 = vand.u32 4294901760, %v9360_v1  ;;  %v1286_v1 = vand.u32 4294901760, %v258_v61 }
  0xad   : > { %5308 = vmatprep.subr.bf16.mxu1 %v5307_v17  ;;  %v1278_v17 = vand.u32 4294901760, %v240_v27  ;;  %v7122_v42 = vsub.f32 %v259_v37, %v1284_v14  ;;  %v303_v37 = vld [vmem:[#allocation5 + $0x298] sm:$0xff] }
  0xae   : > { %5370 = vmatpush1.bf16.msra.mxu0 %v6865_v24  ;;  %v5375_v25 = vpack.c.bf16 %v9356_v38, %v9354_v53  ;;  %v1288_v24 = vand.u32 4294901760, %v268_v5  ;;  %v9362_v53 = vand.u32 4294901760, %v6761_v21  ;;  %v277_v38 = vld [vmem:[#allocation5 + $0x1c8] sm:$0xff] }
  0xaf   : > { %5372 = vmatprep.subr.bf16.mxu0 %v6879_v0  ;;  %v7084_v0 = vsub.f32 %v223_v28, %v1268_v15  ;;  %v7100_v15 = vsub.f32 %v231_v20, %v1274_v10  ;;  %v7103_v21 = vpack.c.bf16 %v1282_v47, %v1278_v17  ;;  %v285_v20 = vld [vmem:[#allocation5 + $0x208] sm:$0xff]  ;;  %v7115_v10 = vsub.f32 %v250_v51, %v1280_v44  ;;  %v294_v51 = vld [vmem:[#allocation5 + $0x250] sm:$0xff] }
  0xb0   : > { %5310 = vmatpush1.bf16.msra.mxu1 %v5309_v46  ;;  %v5377_v46 = vpack.c.bf16 %v9362_v53, %v9361_v9  ;;  %v1290_v9 = vand.u32 4294901760, %v267_v56  ;;  %v7119_v53 = vsub.f32 %v249_v23, %v1282_v47  ;;  %9378 = vst [vmem:[#allocation55_spill] sm:$0xff] %v7122_v42  ;;  %v9383_v47 = vand.u32 4294901760, %v6792_v49 }
  0xb1   : > { %5440 = vmatprep.subr.bf16.mxu1 %v7070_v31  ;;  %9359 = vst [vmem:[#allocation48_spill] sm:$0xff] %v7084_v0  ;;  %v7091_v31 = vsub.f32 %v232_v62, %v1272_v16  ;;  %9369 = vst [vmem:[#allocation18_spill] sm:$0xff] %v7100_v15  ;;  %v9371_v62 = vand.u32 4294901760, %v6778_v36  ;;  %v1296_v16 = vand.u32 4294901760, %v286_v8  ;;  %v304_v36 = vld [vmem:[#allocation5 + $0x2a0] sm:$0xff] }
  0xb2   : > { %5374 = vmatpush1.bf16.msra.mxu0 %v6884_v4  ;;  %v9368_v4 = vand.u32 4294901760, %v9367_v29  ;;  %9370 = vst [vmem:[#allocation19_spill] sm:$0xff] %v7103_v21  ;;  %9375 = vst [vmem:[#allocation52_spill] sm:$0xff] %v7115_v10  ;;  %v7131_v44 = vpack.c.bf16 %v1290_v9, %v1286_v1  ;;  %v7144_v49 = vsub.f32 %v267_v56, %v1290_v9 }
  0xb3   : > { %709 = vmatmul.mubr.f32.vlgmr.msra.gmra.mrb[0].mxu1 %v6897_v19  ;;  %9363 = vst [vmem:[#allocation15_spill] sm:$0xff] %v7091_v31  ;;  %5376 = vmatprep.subr.bf16.mxu0 %v5375_v25  ;;  %v5381_v29 = vpack.c.bf16 %v9372_v40, %v9371_v62  ;;  %v7117_v25 = vsub.f32 %v240_v27, %v1278_v17  ;;  %9377 = vst [vmem:[#allocation54_spill] sm:$0xff] %v7119_v53  ;;  %v9380_v40 = vand.u32 4294901760, %v6786_v43 }
  0xb4   : > { %v5379_v28 = vpack.c.bf16 %v9368_v4, %v9366_v30  ;;  %5442 = vmatpush1.bf16.msra.mxu1 %v7078_v22  ;;  %714 = vmatprep.mubr.f32.mxu1 %v9345_v50  ;;  %v7111_v30 = vpack.c.bf16 %v1288_v24, %v1284_v14  ;;  %v1292_v4 = vand.u32 4294901760, %v277_v38  ;;  %v7124_v62 = vsub.f32 %v268_v5, %v1288_v24  ;;  %v313_v5 = vld [vmem:[#allocation5 + $0x2e8] sm:$0xff]  ;;  %v322_v24 = vld [vmem:[#allocation5 + $0x330] sm:$0xff] }
  0xb5   : > { %967 = vmatmul.mubr.f32.vlgmr.msra.gmra.mrb[0].mxu0 %v6922_v12  ;;  %5444 = vmatprep.subr.bf16.mxu1 %v7081_v55  ;;  %9376 = vst [vmem:[#allocation53_spill] sm:$0xff] %v7117_v25  ;;  %v295_v12 = vld [vmem:[#allocation5 + $0x258] sm:$0xff]  ;;  %v5383_v13 = vpack.c.bf16 %v9381_v32, %v9380_v40  ;;  %9382 = vst [vmem:[#allocation57_spill] sm:$0xff] %v7131_v44  ;;  %v9384_v27 = vand.u32 4294901760, %v6799_v54  ;;  %v1294_v17 = vand.u32 4294901760, %v276_v35  ;;  %v1298_v14 = vand.u32 4294901760, %v285_v20 }
  0xb6   : > { %9373 = vst [vmem:[#allocation50_spill] sm:$0xff] %v7111_v30  ;;  %5378 = vmatpush1.bf16.msra.mxu0 %v5377_v46  ;;  %9379 = vst [vmem:[#allocation56_spill] sm:$0xff] %v7124_v62  ;;  %972 = vmatprep.mubr.f32.mxu0 %v9345_v50  ;;  %v7139_v43 = vsub.f32 %v258_v61, %v1286_v1  ;;  %v7141_v48 = vpack.c.bf16 %v1296_v16, %v1292_v4  ;;  %v1300_v46 = vand.u32 4294901760, %v295_v12  ;;  %v312_v61 = vld [vmem:[#allocation5 + $0x2e0] sm:$0xff]  ;;  %v321_v1 = vld [vmem:[#allocation5 + $0x328] sm:$0xff] }
  0xb7   : > { %716 = vmatmul.mubr.f32.gmra.mrb[2].mxu1 %v7029_v57  ;;  %5380 = vmatprep.subr.bf16.mxu0 %v5379_v28  ;;  %v5385_v23 = vpack.c.bf16 %v9384_v27, %v9383_v47  ;;  %v1304_v28 = vand.u32 4294901760, %v304_v36  ;;  %9387 = vst [vmem:[#allocation60_spill] sm:$0xff] %v7144_v49  ;;  %v7146_v54 = vsub.f32 %v277_v38, %v1292_v4  ;;  %v9390_v32 = vand.u32 4294901760, %v6804_v58 }
  0xb8   : > { %5446 = vmatpush1.bf16.msra.mxu1 %v7103_v21  ;;  %9385 = vst [vmem:[#allocation58_spill] sm:$0xff] %v7139_v43  ;;  %9386 = vst [vmem:[#allocation59_spill] sm:$0xff] %v7141_v48  ;;  %v7148_v40 = vsub.f32 %v286_v8, %v1296_v16  ;;  %v9391_v47 = vand.u32 4294901760, %v6810_v2  ;;  %v1306_v21 = vand.u32 4294901760, %v303_v37  ;;  %v1308_v55 = vand.u32 4294901760, %v313_v5  ;;  %1364 = vmatprep.mubr.f32.mxu1 %v9345_v50 }
  0xb9   : > { %5448 = vmatprep.subr.bf16.mxu1 %v7111_v30  ;;  %976 = vmatmul.mubr.f32.gmra.mrb[2].mxu0 %v7050_v63  ;;  %9388 = vst [vmem:[#allocation61_spill] sm:$0xff] %v7146_v54  ;;  %v1302_v30 = vand.u32 4294901760, %v294_v51  ;;  %v1312_v22 = vand.u32 4294901760, %v322_v24  ;;  %v7156_v56 = vpack.c.bf16 %v1298_v14, %v1294_v17  ;;  %v7158_v8 = vsub.f32 %v276_v35, %v1294_v17  ;;  %v9424_v63 = vld [vmem:[#allocation32_spill] sm:$0xff] }
  0xba   : > { %5382 = vmatpush1.bf16.msra.mxu0 %v5381_v29  ;;  %9389 = vst [vmem:[#allocation62_spill] sm:$0xff] %v7148_v40  ;;  %v5387_v27 = vpack.c.bf16 %v9391_v47, %v9390_v32  ;;  %v7160_v38 = vsub.f32 %v285_v20, %v1298_v14  ;;  %1142 = vmatprep.mubr.f32.mxu0 %v9345_v50  ;;  %v9395_v58 = vand.u32 4294901760, %v6814_v6  ;;  %v9396_v2 = vand.u32 4294901760, %v6816_v7  ;;  %v331_v47 = vld [vmem:[#allocation5 + $0x378] sm:$0xff] }
  0xbb   : > { %5384 = vmatprep.subr.bf16.mxu0 %v5383_v13  ;;  %9392 = vst [vmem:[#allocation63_spill] sm:$0xff] %v7156_v56  ;;  %9393 = vst [vmem:[#allocation64_spill] sm:$0xff] %v7158_v8  ;;  %v7168_v29 = vpack.c.bf16 %v1304_v28, %v1300_v46  ;;  %v1310_v4 = vand.u32 4294901760, %v312_v61  ;;  %v1314_v16 = vand.u32 4294901760, %v321_v1  ;;  %v7170_v13 = vsub.f32 %v295_v12, %v1300_v46  ;;  %v7190_v46 = vld [vmem:[#allocation5 + $0x3b8] sm:$0xff] }
  0xbc   : > { %5450 = vmatpush1.bf16.msra.mxu1 %v7131_v44  ;;  %9394 = vst [vmem:[#allocation65_spill] sm:$0xff] %v7160_v38  ;;  %v5389_v9 = vpack.c.bf16 %v9396_v2, %v9395_v58  ;;  %v7172_v35 = vsub.f32 %v304_v36, %v1304_v28  ;;  %v9400_v20 = vand.u32 4294901760, %v6821_v11  ;;  %v9401_v17 = vand.u32 4294901760, %v6828_v26  ;;  %v340_v58 = vld [vmem:[#allocation5 + $0x3c0] sm:$0xff]  ;;  %v330_v11 = vld [vmem:[#allocation5 + $0x370] sm:$0xff] }
  0xbd   : > { %5452 = vmatprep.subr.bf16.mxu1 %v7141_v48  ;;  %9397 = vst [vmem:[#allocation66_spill] sm:$0xff] %v7168_v29  ;;  %9398 = vst [vmem:[#allocation67_spill] sm:$0xff] %v7170_v13  ;;  %v9402_v32 = vand.u32 4294901760, %v6832_v33  ;;  %v9403_v6 = vand.u32 4294901760, %v6834_v34  ;;  %v7182_v2 = vpack.c.bf16 %v1306_v21, %v1302_v30  ;;  %v7186_v12 = vsub.f32 %v303_v37, %v1306_v21  ;;  %v333_v48 = vld [vmem:[#allocation5 + $0x388] sm:$0xff] }
  0xbe   : > { %5386 = vmatpush1.bf16.msra.mxu0 %v5385_v23  ;;  %9399 = vst [vmem:[#allocation68_spill] sm:$0xff] %v7172_v35  ;;  %v5391_v14 = vpack.c.bf16 %v9401_v17, %v9400_v20  ;;  %v7184_v23 = vsub.f32 %v294_v51, %v1302_v30  ;;  %v7188_v36 = vpack.c.bf16 %v1312_v22, %v1308_v55  ;;  %v9049_v34 = vand.u32 4294901760, %v7084_v0  ;;  %v7211_v17 = vld [vmem:[#allocation5 + $0x408] sm:$0xff] }
  0xbf   : > { %v5393_v7 = vpack.c.bf16 %v9403_v6, %v9402_v32  ;;  %5388 = vmatprep.subr.bf16.mxu0 %v5387_v27  ;;  %9404 = vst [vmem:[#allocation69_spill] sm:$0xff] %v7182_v2  ;;  %9406 = vst [vmem:[#allocation71_spill] sm:$0xff] %v7186_v12  ;;  %v7193_v26 = vsub.f32 %v313_v5, %v1308_v55  ;;  %v7195_v33 = vsub.f32 %v322_v24, %v1312_v22  ;;  %v7213_v32 = vld [vmem:[#allocation5 + $0x450] sm:$0xff] }
  0xc0   : > { %9405 = vst [vmem:[#allocation70_spill] sm:$0xff] %v7184_v23  ;;  %9407 = vst [vmem:[#allocation72_spill] sm:$0xff] %v7188_v36  ;;  %5454 = vmatpush1.bf16.msra.mxu1 %v7156_v56  ;;  %v9050_v28 = vand.u32 4294901760, %v7091_v31  ;;  %v7200_v30 = vpack.c.bf16 %v1314_v16, %v1310_v4  ;;  %v7202_v21 = vsub.f32 %v312_v61, %v1310_v4  ;;  %v1316_v51 = vand.u32 4294901760, %v331_v47 }
  0xc1   : > { %9408 = vst [vmem:[#allocation73_spill] sm:$0xff] %v7193_v26  ;;  %9409 = vst [vmem:[#allocation74_spill] sm:$0xff] %v7195_v33  ;;  %5456 = vmatprep.subr.bf16.mxu1 %v7168_v29  ;;  %v1320_v37 = vand.u32 4294901760, %v340_v58  ;;  %v7204_v27 = vsub.f32 %v321_v1, %v1314_v16  ;;  %v9413_v55 = vand.u32 4294901760, %v6838_v39  ;;  %v9414_v22 = vand.u32 4294901760, %v6845_v52  ;;  %v7221_v16 = vld [vmem:[#allocation5 + $0x400] sm:$0xff] }
  0xc2   : > { %9410 = vst [vmem:[#allocation75_spill] sm:$0xff] %v7200_v30  ;;  %9411 = vst [vmem:[#allocation76_spill] sm:$0xff] %v7202_v21  ;;  %5390 = vmatpush1.bf16.msra.mxu0 %v5389_v9  ;;  %v1318_v24 = vand.u32 4294901760, %v330_v11  ;;  %v1322_v20 = vand.u32 4294901760, %v7190_v46  ;;  %v9415_v61 = vand.u32 4294901760, %v6850_v59  ;;  %v9416_v4 = vand.u32 4294901760, %v6852_v60 }
  0xc3   : > { %9412 = vst [vmem:[#allocation77_spill] sm:$0xff] %v7204_v27  ;;  %v5395_v5 = vpack.c.bf16 %v9414_v22, %v9413_v55  ;;  %5392 = vmatprep.subr.bf16.mxu0 %v5391_v14  ;;  %v7219_v1 = vsub.f32 %v331_v47, %v1316_v51  ;;  %v7223_v39 = vld [vmem:[#allocation5 + $0x448] sm:$0xff]  ;;  %v1390_v14 = vsub.f32 %v7084_v0, %v9049_v34  ;;  %v9419_v22 = vand.u32 4294901760, %v6856_v3 }
  0xc4   : > { %v5397_v9 = vpack.c.bf16 %v9416_v4, %v9415_v61  ;;  %5458 = vmatpush1.bf16.msra.mxu1 %v7182_v2  ;;  %v1402_v59 = vsub.f32 %v7091_v31, %v9050_v28  ;;  %v7237_v55 = vpack.c.bf16 %v1320_v37, %v1316_v51  ;;  %v9420_v61 = vand.u32 4294901760, %v6862_v18  ;;  %v9422_v28 = vld [vmem:[#allocation31_spill] sm:$0xff] }
  0xc5   : > { %9417 = vst [vmem:[#allocation78_spill] sm:$0xff] %v7219_v1  ;;  %5460 = vmatprep.subr.bf16.mxu1 %v7188_v36  ;;  %v9064_v6 = vand.u32 4294901760, %v7211_v17  ;;  %v9063_v34 = vand.u32 4294901760, %v7213_v32  ;;  %v7245_v52 = vpack.c.bf16 %v1322_v20, %v1318_v24  ;;  %v9423_v60 = vand.u32 4294901760, %v9422_v28  ;;  %v9432_v28 = vld [vmem:[#allocation33_spill] sm:$0xff] }
  0xc6   : > { %9418 = vst [vmem:[#allocation79_spill] sm:$0xff] %v7237_v55  ;;  %v5399_v4 = vpack.c.bf16 %v9420_v61, %v9419_v22  ;;  %5394 = vmatpush1.bf16.msra.mxu0 %v5393_v7  ;;  %v9425_v47 = vand.u32 4294901760, %v9424_v63  ;;  %v9426_v3 = vand.u32 4294901760, %v7093_v45  ;;  %v9427_v22 = vand.u32 4294901760, %v7100_v15 }
  0xc7   : > { %9421 = vst [vmem:[#allocation80_spill] sm:$0xff] %v7245_v52  ;;  %5396 = vmatprep.subr.bf16.mxu0 %v5395_v5  ;;  %v1391_v63 = vand.u32 4294901760, %v1390_v14  ;;  %v9429_v36 = vand.u32 4294901760, %v7115_v10  ;;  %v7269_v51 = vsub.f32 %v340_v58, %v1320_v37  ;;  %v9433_v61 = vand.u32 4294901760, %v9432_v28 }
  0xc8   : > { %v5401_v2 = vpack.c.bf16 %v9425_v47, %v9423_v60  ;;  %v1396_v18 = vsub.f32 %v7093_v45, %v9426_v3  ;;  %v1408_v7 = vsub.f32 %v7100_v15, %v9427_v22  ;;  %5462 = vmatpush1.bf16.msra.mxu1 %v7200_v30  ;;  %v1403_v60 = vand.u32 4294901760, %v1402_v59 }
  0xc9   : > { %v9428_v47 = vand.u32 4294901760, %v7113_v41  ;;  %v1426_v3 = vsub.f32 %v7115_v10, %v9429_v36  ;;  %5464 = vmatprep.subr.bf16.mxu1 %v7237_v55  ;;  %9430 = vst [vmem:[#allocation31_spill] sm:$0xff] %v7269_v51  ;;  %v7275_v22 = vpack.c.bf16 %v9063_v34, %v9064_v6  ;;  %v9067_v59 = vand.u32 4294901760, %v7124_v62  ;;  %v9434_v36 = vld [vmem:[#allocation35_spill] sm:$0xff] }
  0xca   : > { %5398 = vmatpush1.bf16.msra.mxu0 %v5397_v9  ;;  %v9435_v30 = vand.u32 4294901760, %v9434_v36  ;;  %v9070_v58 = vand.u32 4294901760, %v7139_v43  ;;  %v1397_v29 = vand.u32 4294901760, %v1396_v18  ;;  %v1409_v34 = vand.u32 4294901760, %v1408_v7 }
  0xcb   : > { %v1414_v5 = vsub.f32 %v7113_v41, %v9428_v47  ;;  %9431 = vst [vmem:[#allocation32_spill] sm:$0xff] %v7275_v22  ;;  %v7279_v47 = vsub.f32 %v330_v11, %v1318_v24  ;;  %5400 = vmatprep.subr.bf16.mxu0 %v5399_v4  ;;  %v9436_v6 = vand.u32 4294901760, %v7117_v25  ;;  %v9437_v9 = vand.u32 4294901760, %v7119_v53 }
  0xcc   : > { %v5403_v55 = vpack.c.bf16 %v9435_v30, %v9433_v61  ;;  %5466 = vmatpush1.bf16.msra.mxu1 %v7245_v52  ;;  %v9438_v24 = vand.u32 4294901760, %v7221_v16  ;;  %v9439_v30 = vand.u32 4294901760, %v7223_v39  ;;  %v5471_v28 = vpack.c.bf16 %v1403_v60, %v1391_v63  ;;  %v9442_v63 = vld [vmem:[#allocation37_spill] sm:$0xff] }
  0xcd   : > { %v1420_v14 = vsub.f32 %v7117_v25, %v9436_v6  ;;  %v1432_v11 = vsub.f32 %v7119_v53, %v9437_v9  ;;  %v1415_v4 = vand.u32 4294901760, %v1414_v5  ;;  %v1427_v18 = vand.u32 4294901760, %v1426_v3  ;;  %5468 = vmatprep.subr.bf16.mxu1 %v7275_v22  ;;  %v9444_v5 = vld [vmem:[#allocation38_spill] sm:$0xff] }
  0xce   : > { %v7298_v61 = vpack.c.bf16 %v9439_v30, %v9438_v24  ;;  %v9441_v7 = vand.u32 4294901760, %v7122_v42  ;;  %v1450_v36 = vsub.f32 %v7124_v62, %v9067_v59  ;;  %v7310_v24 = vsub.f32 %v7190_v46, %v1322_v20  ;;  %5402 = vmatpush1.bf16.msra.mxu0 %v5401_v2 }
  0xcf   : > { %v9443_v60 = vand.u32 4294901760, %v9442_v63  ;;  %v9445_v3 = vand.u32 4294901760, %v9444_v5  ;;  %v9446_v22 = vand.u32 4294901760, %v7144_v49  ;;  %5404 = vmatprep.subr.bf16.mxu0 %v5403_v55  ;;  %v5473_v9 = vpack.c.bf16 %v1409_v34, %v1397_v29 }
  0xd0   : > { %9440 = vst [vmem:[#allocation33_spill] sm:$0xff] %v7298_v61  ;;  %v1438_v6 = vsub.f32 %v7122_v42, %v9441_v7  ;;  %v1444_v7 = vsub.f32 %v7139_v43, %v9070_v58  ;;  %v1421_v37 = vand.u32 4294901760, %v1420_v14  ;;  %v1433_v52 = vand.u32 4294901760, %v1432_v11  ;;  %5470 = vmatpush1.bf16.msra.mxu1 %v7298_v61  ;;  %v9449_v58 = vld [vmem:[#allocation42_spill] sm:$0xff]  ;;  %v9471_v61 = vld [vmem:[#allocation29_spill] sm:$0xff] }
  0xd1   : > { %v5405_v30 = vpack.c.bf16 %v9445_v3, %v9443_v60  ;;  %v1456_v59 = vsub.f32 %v7144_v49, %v9446_v22  ;;  %v9072_v46 = vand.u32 4294901760, %v7158_v8  ;;  %v5475_v2 = vpack.c.bf16 %v1427_v18, %v1415_v4  ;;  %5472 = vmatprep.subr.bf16.mxu1 %v5471_v28  ;;  %v9450_v28 = vld [vmem:[#allocation12_spill] sm:$0xff] }
  0xd2   : > { %v9071_v20 = vand.u32 4294901760, %v7160_v38  ;;  %v9073_v63 = vand.u32 4294901760, %v7170_v13  ;;  %v9074_v60 = vand.u32 4294901760, %v7172_v35  ;;  %v1439_v5 = vand.u32 4294901760, %v1438_v6 }
  0xd3   : > { %v1451_v3 = vand.u32 4294901760, %v1450_v36  ;;  %v9447_v22 = vand.u32 4294901760, %v7146_v54  ;;  %v9448_v34 = vand.u32 4294901760, %v7148_v40  ;;  %5406 = vmatpush1.bf16.msra.mxu0 %v5405_v30  ;;  %v1445_v14 = vand.u32 4294901760, %v1444_v7  ;;  %1370 = vmatmul.mubr.f32.vlgmr.msra.gmra.mrb[4].mxu1 %v9449_v58 }
  0xd4   : > { %v1457_v11 = vand.u32 4294901760, %v1456_v59  ;;  %v9077_v4 = vand.u32 4294901760, %v7184_v23  ;;  %v9075_v18 = vand.u32 4294901760, %v7186_v12  ;;  %5408 = vmatprep.subr.bf16.mxu0 %v9450_v28  ;;  %v5477_v6 = vpack.c.bf16 %v1433_v52, %v1421_v37  ;;  %5474 = vmatpush1.bf16.msra.mxu1 %v5473_v9 }
  0xd5   : > { %v1462_v29 = vsub.f32 %v7146_v54, %v9447_v22  ;;  %v1474_v55 = vsub.f32 %v7148_v40, %v9448_v34  ;;  %v1468_v36 = vsub.f32 %v7158_v8, %v9072_v46  ;;  %v9076_v22 = vand.u32 4294901760, %v7193_v26  ;;  %1375 = vmatprep.mubr.f32.mxu1 %v9345_v50  ;;  %5476 = vmatprep.subr.bf16.mxu1 %v5475_v2  ;;  %v9452_v46 = vld [vmem:[#allocation16_spill] sm:$0xff] }
  0xd6   : > { %v1480_v59 = vsub.f32 %v7160_v38, %v9071_v20  ;;  %v1486_v30 = vsub.f32 %v7170_v13, %v9073_v63  ;;  %v1498_v52 = vsub.f32 %v7172_v35, %v9074_v60  ;;  %v9451_v37 = vand.u32 4294901760, %v7211_v17  ;;  %1144 = vmatmul.mubr.f32.vlgmr.msra.gmra.mrb[0].mxu0 %v6897_v19 }
  0xd7   : > { %v5479_v9 = vpack.c.bf16 %v1451_v3, %v1439_v5  ;;  %v1463_v28 = vand.u32 4294901760, %v1462_v29  ;;  %v1475_v20 = vand.u32 4294901760, %v1474_v55  ;;  %5410 = vmatpush1.bf16.msra.mxu0 %v9452_v46  ;;  %v5481_v63 = vpack.c.bf16 %v1457_v11, %v1445_v14  ;;  %1149 = vmatprep.mubr.f32.mxu0 %v9345_v50  ;;  %v9455_v55 = vld [vmem:[#allocation46_spill] sm:$0xff] }
  0xd8   : > { %v7355_v7 = vsub.f32 %v7211_v17, %v9451_v37  ;;  %v1492_v60 = vsub.f32 %v7184_v23, %v9077_v4  ;;  %v1504_v34 = vsub.f32 %v7186_v12, %v9075_v18  ;;  %v9453_v17 = vld [vmem:[#allocation17_spill] sm:$0xff]  ;;  %v1510_v2 = vsub.f32 %v7193_v26, %v9076_v22  ;;  %1381 = vmatmul.mubr.f32.gmra.mrb[6].mxu1 %v9455_v55 }
  0xd9   : > { %5412 = vmatprep.subr.bf16.mxu0 %v9453_v17  ;;  %v9454_v5 = vand.u32 4294901760, %v7195_v33  ;;  %v9079_v3 = vand.u32 4294901760, %v7202_v21  ;;  %5478 = vmatpush1.bf16.msra.mxu1 %v5477_v6  ;;  %v1469_v14 = vand.u32 4294901760, %v1468_v36  ;;  %v1481_v11 = vand.u32 4294901760, %v1480_v59 }
  0xda   : > { %v1487_v37 = vand.u32 4294901760, %v1486_v30  ;;  %v1499_v18 = vand.u32 4294901760, %v1498_v52  ;;  %1611 = vmatprep.mubr.f32.mxu1 %v9345_v50  ;;  %v9456_v17 = vand.u32 4294901760, %v7213_v32  ;;  %5480 = vmatprep.subr.bf16.mxu1 %v5479_v9  ;;  %v9078_v4 = vand.u32 4294901760, %v7219_v1  ;;  %v9460_v9 = vld [vmem:[#allocation21_spill] sm:$0xff] }
  0xdb   : > { %v1522_v46 = vsub.f32 %v7195_v33, %v9454_v5  ;;  %v5483_v5 = vpack.c.bf16 %v1475_v20, %v1463_v28  ;;  %1151 = vmatmul.mubr.f32.gmra.mrb[2].mxu0 %v7029_v57  ;;  %v9457_v6 = vand.u32 4294901760, %v7221_v16  ;;  %v9458_v59 = vand.u32 4294901760, %v7223_v39 }
  0xdc   : > { %v7380_v22 = vsub.f32 %v7213_v32, %v9456_v17  ;;  %v9459_v32 = vld [vmem:[#allocation20_spill] sm:$0xff]  ;;  %v1493_v52 = vand.u32 4294901760, %v1492_v60  ;;  %v1505_v20 = vand.u32 4294901760, %v1504_v34  ;;  %1253 = vmatprep.mubr.f32.mxu0 %v9345_v50  ;;  %v1511_v28 = vand.u32 4294901760, %v1510_v2 }
  0xdd   : > { %v7388_v36 = vsub.f32 %v7221_v16, %v9457_v6  ;;  %v7393_v30 = vsub.f32 %v7223_v39, %v9458_v59  ;;  %5414 = vmatpush1.bf16.msra.mxu0 %v9459_v32  ;;  %v1523_v17 = vand.u32 4294901760, %v1522_v46  ;;  %v1516_v16 = vsub.f32 %v7202_v21, %v9079_v3  ;;  %5482 = vmatpush1.bf16.msra.mxu1 %v5481_v63  ;;  %v9463_v63 = vld [vmem:[#allocation22_spill] sm:$0xff] }
  0xde   : > { %5416 = vmatprep.subr.bf16.mxu0 %v9460_v9  ;;  %v9461_v6 = vand.u32 4294901760, %v7204_v27  ;;  %v5485_v39 = vpack.c.bf16 %v1481_v11, %v1469_v14  ;;  %v5487_v59 = vpack.c.bf16 %v1499_v18, %v1487_v37  ;;  %v9082_v60 = vand.u32 4294901760, %v7279_v47  ;;  %5484 = vmatprep.subr.bf16.mxu1 %v5483_v5  ;;  %v9464_v18 = vld [vmem:[#allocation23_spill] sm:$0xff] }
  0xdf   : > { %v9080_v34 = vand.u32 4294901760, %v7310_v24  ;;  %v1534_v2 = vsub.f32 %v7219_v1, %v9078_v4  ;;  %v9462_v46 = vand.u32 4294901760, %v7269_v51  ;;  %v9081_v9 = vand.u32 4294901760, %v7355_v7 }
  0xe0   : > { %v1528_v29 = vsub.f32 %v7204_v27, %v9461_v6  ;;  %v5489_v14 = vpack.c.bf16 %v1505_v20, %v1493_v52  ;;  %v5491_v11 = vpack.c.bf16 %v1523_v17, %v1511_v28  ;;  %v1517_v37 = vand.u32 4294901760, %v1516_v16  ;;  %v9466_v28 = vld [vmem:[#allocation24_spill] sm:$0xff]  ;;  %v9467_v17 = vld [vmem:[#allocation25_spill] sm:$0xff] }
  0xe1   : > { %v1546_v32 = vsub.f32 %v7269_v51, %v9462_v46  ;;  %5418 = vmatpush1.bf16.msra.mxu0 %v9463_v63  ;;  %5486 = vmatpush1.bf16.msra.mxu1 %v5485_v39  ;;  %v1540_v4 = vsub.f32 %v7279_v47, %v9082_v60  ;;  %v1552_v46 = vsub.f32 %v7310_v24, %v9080_v34  ;;  %v9083_v3 = vand.u32 4294901760, %v7388_v36  ;;  %v9468_v60 = vld [vmem:[#allocation26_spill] sm:$0xff] }
  0xe2   : > { %5420 = vmatprep.subr.bf16.mxu0 %v9464_v18  ;;  %v1529_v5 = vand.u32 4294901760, %v1528_v29  ;;  %v9086_v6 = vand.u32 4294901760, %v7393_v30  ;;  %5488 = vmatprep.subr.bf16.mxu1 %v5487_v59  ;;  %v1535_v63 = vand.u32 4294901760, %v1534_v2  ;;  %v1558_v29 = vsub.f32 %v7355_v7, %v9081_v9 }
  0xe3   : > { %v1547_v18 = vand.u32 4294901760, %v1546_v32  ;;  %v9465_v52 = vand.u32 4294901760, %v7380_v22  ;;  %v1541_v39 = vand.u32 4294901760, %v1540_v4  ;;  %v1553_v34 = vand.u32 4294901760, %v1552_v46  ;;  %v234_v46 = vld [vmem:[#allocation5 + $0x70] sm:$0xff] }
  0xe4   : > { %v5493_v16 = vpack.c.bf16 %v1529_v5, %v1517_v37  ;;  %v1564_v59 = vsub.f32 %v7388_v36, %v9083_v3  ;;  %v1576_v2 = vsub.f32 %v7393_v30, %v9086_v6  ;;  %v1559_v9 = vand.u32 4294901760, %v1558_v29  ;;  %v225_v5 = vld [vmem:[#allocation5 + $0x28] sm:$0xff] }
  0xe5   : > { %v1570_v20 = vsub.f32 %v7380_v22, %v9465_v52  ;;  %5422 = vmatpush1.bf16.msra.mxu0 %v9466_v28  ;;  %5490 = vmatpush1.bf16.msra.mxu1 %v5489_v14  ;;  %v5495_v32 = vpack.c.bf16 %v1547_v18, %v1535_v63  ;;  %v9469_v28 = vld [vmem:[#allocation27_spill] sm:$0xff]  ;;  %v5497_v14 = vpack.c.bf16 %v1553_v34, %v1541_v39  ;;  %v9470_v3 = vld [vmem:[#allocation28_spill] sm:$0xff]  ;;  %v2176_v63 = vand.u32 4294901760, %v234_v46 }
  0xe6   : > { %5424 = vmatprep.subr.bf16.mxu0 %v9467_v17  ;;  %5492 = vmatprep.subr.bf16.mxu1 %v5491_v11  ;;  %v1565_v4 = vand.u32 4294901760, %v1564_v59  ;;  %v1577_v37 = vand.u32 4294901760, %v1576_v2  ;;  %v2172_v11 = vand.u32 4294901760, %v225_v5  ;;  %v224_v18 = vld [vmem:[#allocation5 + $0x20] sm:$0xff]  ;;  %v233_v29 = vld [vmem:[#allocation5 + $0x68] sm:$0xff]  ;;  %v5503_v34 = vpack.c.bf16 %v7091_v31, %v7084_v0 }
  0xe7   : > { %v1571_v52 = vand.u32 4294901760, %v1570_v20  ;;  %v243_v20 = vld [vmem:[#allocation5 + $0xb8] sm:$0xff]  ;;  %v2174_v39 = vand.u32 4294901760, %v224_v18  ;;  %v9476_v6 = vld [vmem:[#allocation36_spill] sm:$0xff]  ;;  %v7457_v31 = vsub.f32 %v234_v46, %v2176_v63  ;;  %v5511_v46 = vpack.c.bf16 %v7124_v62, %v7122_v42 }
  0xe8   : > { %v9473_v59 = vld [vmem:[#allocation34_spill] sm:$0xff]  ;;  %v306_v42 = vld [vmem:[#allocation5 + $0x2b0] sm:$0xff] }
  0xe9   : > { %5426 = vmatpush1.bf16.msra.mxu0 %v9468_v60  ;;  %5494 = vmatpush1.bf16.msra.mxu1 %v5493_v16  ;;  %v5499_v17 = vpack.c.bf16 %v1571_v52, %v1559_v9  ;;  %v5501_v60 = vpack.c.bf16 %v1577_v37, %v1565_v4  ;;  %v9472_v16 = vld [vmem:[#allocation30_spill] sm:$0xff]  ;;  %v2178_v9 = vand.u32 4294901760, %v233_v29  ;;  %v261_v4 = vld [vmem:[#allocation5 + $0x148] sm:$0xff]  ;;  %v270_v37 = vld [vmem:[#allocation5 + $0x190] sm:$0xff]  ;;  %9477 = vst [vmem:[#allocation38_spill] sm:$0xff] %v7457_v31 }
  0xea   : > { %5428 = vmatprep.subr.bf16.mxu0 %v9469_v28  ;;  %5496 = vmatprep.subr.bf16.mxu1 %v5495_v32  ;;  %v252_v28 = vld [vmem:[#allocation5 + $0x100] sm:$0xff]  ;;  %v242_v32 = vld [vmem:[#allocation5 + $0xb0] sm:$0xff]  ;;  %v251_v52 = vld [vmem:[#allocation5 + $0xf8] sm:$0xff] }
  0xeb   : > { %v2184_v2 = vand.u32 4294901760, %v252_v28  ;;  %v7459_v0 = vpack.c.bf16 %v2178_v9, %v2174_v39  ;;  %v2186_v56 = vand.u32 4294901760, %v251_v52 }
  0xed   : > { %5430 = vmatpush1.bf16.msra.mxu0 %v9470_v3  ;;  %5498 = vmatpush1.bf16.msra.mxu1 %v5497_v14  ;;  %v7446_v3 = vpack.c.bf16 %v2176_v63, %v2172_v11  ;;  %v5505_v14 = vpack.c.bf16 %v7100_v15, %v7093_v45  ;;  %9478 = vst [vmem:[#allocation12_spill] sm:$0xff] %v7459_v0  ;;  %v260_v15 = vld [vmem:[#allocation5 + $0x140] sm:$0xff]  ;;  %v269_v45 = vld [vmem:[#allocation5 + $0x188] sm:$0xff] }
  0xee   : > { %5432 = vmatprep.subr.bf16.mxu0 %v9471_v61  ;;  %5500 = vmatprep.subr.bf16.mxu1 %v5499_v17  ;;  %v2180_v61 = vand.u32 4294901760, %v243_v20  ;;  %v7450_v17 = vsub.f32 %v225_v5, %v2172_v11  ;;  %v7463_v5 = vsub.f32 %v224_v18, %v2174_v39  ;;  %v5513_v63 = vpack.c.bf16 %v7144_v49, %v7139_v43 }
  0xef   : > { %9474 = vst [vmem:[#allocation35_spill] sm:$0xff] %v7446_v3  ;;  %v7477_v39 = vsub.f32 %v252_v28, %v2184_v2  ;;  %v7485_v62 = vsub.f32 %v251_v52, %v2186_v56 }
  0xf0   : > { %9475 = vst [vmem:[#allocation37_spill] sm:$0xff] %v7450_v17  ;;  %v7465_v11 = vpack.c.bf16 %v2184_v2, %v2180_v61  ;;  %v7475_v18 = vsub.f32 %v243_v20, %v2180_v61 }
  0xf1   : > { %5434 = vmatpush1.bf16.msra.mxu0 %v9472_v16  ;;  %5502 = vmatpush1.bf16.msra.mxu1 %v5501_v60  ;;  %v5507_v16 = vpack.c.bf16 %v7115_v10, %v7113_v41  ;;  %v2182_v60 = vand.u32 4294901760, %v242_v32  ;;  %v288_v10 = vld [vmem:[#allocation5 + $0x220] sm:$0xff] }
  0xf2   : > { %5436 = vmatprep.subr.bf16.mxu0 %v9473_v59  ;;  %5504 = vmatprep.subr.bf16.mxu1 %v5503_v34  ;;  %v5509_v59 = vpack.c.bf16 %v7119_v53, %v7117_v25  ;;  %9479 = vst [vmem:[#allocation16_spill] sm:$0xff] %v7465_v11  ;;  %v2188_v34 = vand.u32 4294901760, %v261_v4  ;;  %v2192_v53 = vand.u32 4294901760, %v270_v37  ;;  %v279_v25 = vld [vmem:[#allocation5 + $0x1d8] sm:$0xff]  ;;  %v2200_v2 = vand.u32 4294901760, %v288_v10  ;;  %v324_v41 = vld [vmem:[#allocation5 + $0x340] sm:$0xff] }
  0xf3   : > { %v7481_v49 = vpack.c.bf16 %v2186_v56, %v2182_v60  ;;  %v7483_v43 = vsub.f32 %v242_v32, %v2182_v60  ;;  %v2196_v61 = vand.u32 4294901760, %v279_v25  ;;  %v5515_v32 = vpack.c.bf16 %v7148_v40, %v7146_v54  ;;  %v296_v60 = vld [vmem:[#allocation5 + $0x260] sm:$0xff] }
  0xf4   : > { %1613 = vmatmul.mubr.f32.vlgmr.msra.gmra.mrb[4].mxu1 %v6897_v19  ;;  %v7488_v20 = vpack.c.bf16 %v2192_v53, %v2188_v34  ;;  %v7490_v28 = vsub.f32 %v261_v4, %v2188_v34  ;;  %v2208_v54 = vand.u32 4294901760, %v306_v42 }
  0xf5   : > { %5438 = vmatpush1.bf16.msra.mxu0 %v9476_v6  ;;  %5506 = vmatpush1.bf16.msra.mxu1 %v5505_v14  ;;  %v7467_v6 = vsub.f32 %v233_v29, %v2178_v9  ;;  %v2190_v14 = vand.u32 4294901760, %v260_v15  ;;  %v2194_v29 = vand.u32 4294901760, %v269_v45  ;;  %v278_v9 = vld [vmem:[#allocation5 + $0x1d0] sm:$0xff]  ;;  %9480 = vst [vmem:[#allocation17_spill] sm:$0xff] %v7481_v49 }
  0xf6   : > { %5632 = vmatprep.subr.bf16.mxu0 %v7446_v3  ;;  %1618 = vmatprep.mubr.f32.mxu1 %v9345_v50  ;;  %v287_v3 = vld [vmem:[#allocation5 + $0x218] sm:$0xff]  ;;  %9481 = vst [vmem:[#allocation20_spill] sm:$0xff] %v7488_v20  ;;  %v2198_v56 = vand.u32 4294901760, %v278_v9 }
  0xf7   : > { %5508 = vmatprep.subr.bf16.mxu1 %v5507_v16  ;;  %v297_v16 = vld [vmem:[#allocation5 + $0x268] sm:$0xff]  ;;  %v2202_v52 = vand.u32 4294901760, %v287_v3  ;;  %v7499_v4 = vpack.c.bf16 %v2194_v29, %v2190_v14  ;;  %v7501_v34 = vsub.f32 %v260_v15, %v2190_v14  ;;  %v5519_v15 = vpack.c.bf16 %v7172_v35, %v7170_v13 }
  0xf8   : > { %1255 = vmatmul.mubr.f32.vlgmr.msra.gmra.mrb[0].mxu0 %v6897_v19  ;;  %1620 = vmatmul.mubr.f32.gmra.mrb[6].mxu1 %v7029_v57  ;;  %v2204_v40 = vand.u32 4294901760, %v297_v16  ;;  %v315_v19 = vld [vmem:[#allocation5 + $0x2f8] sm:$0xff]  ;;  %v2206_v14 = vand.u32 4294901760, %v296_v60  ;;  %v2216_v13 = vand.u32 4294901760, %v324_v41 }
  0xf9   : > { %5634 = vmatpush1.bf16.msra.mxu0 %v7459_v0  ;;  %1260 = vmatprep.mubr.f32.mxu0 %v9345_v50  ;;  %v7493_v0 = vsub.f32 %v270_v37, %v2192_v53  ;;  %9482 = vst [vmem:[#allocation21_spill] sm:$0xff] %v7499_v4  ;;  %v5517_v53 = vpack.c.bf16 %v7160_v38, %v7158_v8  ;;  %v314_v8 = vld [vmem:[#allocation5 + $0x2f0] sm:$0xff]  ;;  %v2212_v35 = vand.u32 4294901760, %v315_v19 }
  0xfa   : > { %5636 = vmatprep.subr.bf16.mxu0 %v7465_v11  ;;  %5510 = vmatpush1.bf16.msra.mxu1 %v5509_v59  ;;  %v305_v11 = vld [vmem:[#allocation5 + $0x2a8] sm:$0xff]  ;;  %v7506_v37 = vsub.f32 %v269_v45, %v2194_v29  ;;  %v7508_v59 = vsub.f32 %v279_v25, %v2196_v61  ;;  %v7516_v45 = vsub.f32 %v288_v10, %v2200_v2 }
  0xfb   : > { %1754 = vmatprep.mubr.f32.mxu1 %v9345_v50  ;;  %5512 = vmatprep.subr.bf16.mxu1 %v5511_v46  ;;  %v7512_v46 = vpack.c.bf16 %v2200_v2, %v2196_v61  ;;  %v2210_v38 = vand.u32 4294901760, %v305_v11  ;;  %v7518_v25 = vpack.c.bf16 %v2202_v52, %v2198_v56  ;;  %v7520_v29 = vsub.f32 %v278_v9, %v2198_v56  ;;  %v341_v56 = vld [vmem:[#allocation5 + $0x3c8] sm:$0xff] }
  0xfc   : > { %1262 = vmatmul.mubr.f32.gmra.mrb[2].mxu0 %v7029_v57  ;;  %v323_v57 = vld [vmem:[#allocation5 + $0x338] sm:$0xff]  ;;  %v7524_v61 = vsub.f32 %v287_v3, %v2202_v52  ;;  %v7529_v10 = vpack.c.bf16 %v2208_v54, %v2204_v40  ;;  %v7531_v9 = vsub.f32 %v306_v42, %v2208_v54  ;;  %v5523_v2 = vpack.c.bf16 %v7195_v33, %v7193_v26  ;;  %v332_v3 = vld [vmem:[#allocation5 + $0x380] sm:$0xff] }
  0xfd   : > { %5638 = vmatpush1.bf16.msra.mxu0 %v7481_v49  ;;  %2268 = vmatprep.mubr.f32.mxu0 %v9345_v50  ;;  %9483 = vst [vmem:[#allocation22_spill] sm:$0xff] %v7512_v46  ;;  %9484 = vst [vmem:[#allocation23_spill] sm:$0xff] %v7518_v25  ;;  %v5521_v49 = vpack.c.bf16 %v7186_v12, %v7184_v23  ;;  %v7540_v52 = vsub.f32 %v296_v60, %v2206_v14  ;;  %v2214_v12 = vand.u32 4294901760, %v314_v8 }
  0xfe   : > { %5640 = vmatprep.subr.bf16.mxu0 %v7488_v20  ;;  %5514 = vmatpush1.bf16.msra.mxu1 %v5513_v63  ;;  %v7526_v20 = vsub.f32 %v297_v16, %v2204_v40  ;;  %v342_v63 = vld [vmem:[#allocation5 + $0x3d0] sm:$0xff]  ;;  %9485 = vst [vmem:[#allocation24_spill] sm:$0xff] %v7529_v10  ;;  %v7538_v16 = vpack.c.bf16 %v2210_v38, %v2206_v14  ;;  %v2220_v54 = vand.u32 4294901760, %v333_v48 }
  0xff   : > { %5516 = vmatprep.subr.bf16.mxu1 %v5515_v32  ;;  %v5525_v32 = vpack.c.bf16 %v7204_v27, %v7202_v21  ;;  %v7542_v40 = vsub.f32 %v305_v11, %v2210_v38  ;;  %v7544_v42 = vsub.f32 %v315_v19, %v2212_v35  ;;  %v2224_v33 = vand.u32 4294901760, %v342_v63  ;;  %v351_v11 = vld [vmem:[#allocation5 + $0x418] sm:$0xff] }
 0x100   : > { %9486 = vst [vmem:[#allocation25_spill] sm:$0xff] %v7538_v16  ;;  %v7546_v26 = vpack.c.bf16 %v2216_v13, %v2212_v35  ;;  %v5527_v27 = vpack.c.bf16 %v7269_v51, %v7219_v1  ;;  %v2226_v21 = vand.u32 4294901760, %v341_v56  ;;  %v7551_v60 = vsub.f32 %v324_v41, %v2216_v13 }
 0x101   : > { %5642 = vmatpush1.bf16.msra.mxu0 %v7499_v4  ;;  %v2218_v4 = vand.u32 4294901760, %v323_v57  ;;  %v5529_v38 = vpack.c.bf16 %v7310_v24, %v7279_v47  ;;  %v7564_v51 = vsub.f32 %v333_v48, %v2220_v54  ;;  %v7566_v41 = vpack.c.bf16 %v2224_v33, %v2220_v54 }
 0x102   : > { %5644 = vmatprep.subr.bf16.mxu0 %v7512_v46  ;;  %5518 = vmatpush1.bf16.msra.mxu1 %v5517_v53  ;;  %9487 = vst [vmem:[#allocation26_spill] sm:$0xff] %v7546_v26  ;;  %v2222_v46 = vand.u32 4294901760, %v332_v3  ;;  %v7568_v13 = vsub.f32 %v342_v63, %v2224_v33  ;;  %v5531_v19 = vpack.c.bf16 %v7380_v22, %v7355_v7  ;;  %v350_v53 = vld [vmem:[#allocation5 + $0x410] sm:$0xff]  ;;  %v2228_v48 = vand.u32 4294901760, %v351_v11 }
 0x103   : > { %5520 = vmatprep.subr.bf16.mxu1 %v5519_v15  ;;  %v7558_v35 = vpack.c.bf16 %v2218_v4, %v2214_v12  ;;  %v7560_v15 = vsub.f32 %v314_v8, %v2214_v12  ;;  %v7562_v14 = vsub.f32 %v323_v57, %v2218_v4  ;;  %9489 = vst [vmem:[#allocation28_spill] sm:$0xff] %v7566_v41  ;;  %v359_v8 = vld [vmem:[#allocation5 + $0x458] sm:$0xff]  ;;  %v9491_v12 = vand.u32 4294901760, %v7450_v17 }
 0x104   : > { %v7573_v1 = vpack.c.bf16 %v2226_v21, %v2222_v46  ;;  %v5533_v57 = vpack.c.bf16 %v7393_v30, %v7388_v36  ;;  %v9492_v4 = vand.u32 4294901760, %v7457_v31  ;;  %v2230_v23 = vand.u32 4294901760, %v350_v53 }
 0x105   : > { %5646 = vmatpush1.bf16.msra.mxu0 %v7518_v25  ;;  %9488 = vst [vmem:[#allocation27_spill] sm:$0xff] %v7558_v35  ;;  %v360_v25 = vld [vmem:[#allocation5 + $0x460] sm:$0xff]  ;;  %v2294_v33 = vsub.f32 %v7450_v17, %v9491_v12  ;;  %v2234_v44 = vand.u32 4294901760, %v359_v8  ;;  %v9493_v12 = vand.u32 4294901760, %v7463_v5  ;;  %v7595_v54 = vsub.f32 %v332_v3, %v2222_v46 }
 0x106   : > { %5648 = vmatprep.subr.bf16.mxu0 %v7529_v10  ;;  %5522 = vmatpush1.bf16.msra.mxu1 %v5521_v49  ;;  %9490 = vst [vmem:[#allocation29_spill] sm:$0xff] %v7573_v1  ;;  %v2306_v63 = vsub.f32 %v7457_v31, %v9492_v4  ;;  %v2232_v10 = vand.u32 4294901760, %v360_v25  ;;  %v7599_v31 = vsub.f32 %v351_v11, %v2228_v48  ;;  %v9495_v49 = vand.u32 4294901760, %v7467_v6 }
 0x107   : > { %5524 = vmatprep.subr.bf16.mxu1 %v5523_v2  ;;  %v2300_v17 = vsub.f32 %v7463_v5, %v9493_v12  ;;  %v9496_v12 = vand.u32 4294901760, %v7475_v18 }
 0x108   : > { %9494 = vst [vmem:[#allocation30_spill] sm:$0xff] %v7599_v31  ;;  %v2307_v55 = vand.u32 4294901760, %v2306_v63  ;;  %v7614_v3 = vsub.f32 %v360_v25, %v2232_v10  ;;  %v7622_v63 = vpack.c.bf16 %v2234_v44, %v2230_v23 }
 0x109   : > { %5650 = vmatpush1.bf16.msra.mxu0 %v7538_v16  ;;  %v2295_v16 = vand.u32 4294901760, %v2294_v33  ;;  %v2318_v4 = vsub.f32 %v7475_v18, %v9496_v12  ;;  %v2301_v12 = vand.u32 4294901760, %v2300_v17 }
 0x10a   : > { %5652 = vmatprep.subr.bf16.mxu0 %v7546_v26  ;;  %5526 = vmatpush1.bf16.msra.mxu1 %v5525_v32  ;;  %v7597_v26 = vsub.f32 %v341_v56, %v2226_v21  ;;  %v2312_v32 = vsub.f32 %v7467_v6, %v9495_v49  ;;  %v7612_v21 = vpack.c.bf16 %v2232_v10, %v2228_v48  ;;  %v9500_v56 = vand.u32 4294901760, %v7483_v43 }
 0x10b   : > { %5528 = vmatprep.subr.bf16.mxu1 %v5527_v27  ;;  %v9497_v27 = vand.u32 4294901760, %v7477_v39  ;;  %9499 = vst [vmem:[#allocation36_spill] sm:$0xff] %v7614_v3  ;;  %v9501_v49 = vand.u32 4294901760, %v7485_v62  ;;  %9502 = vst [vmem:[#allocation81_spill] sm:$0xff] %v7622_v63  ;;  %v9504_v48 = vand.u32 4294901760, %v7493_v0  ;;  %v2319_v17 = vand.u32 4294901760, %v2318_v4 }
 0x10c   : > { %9498 = vst [vmem:[#allocation34_spill] sm:$0xff] %v7612_v21  ;;  %v2324_v11 = vsub.f32 %v7483_v43, %v9500_v56  ;;  %v2313_v10 = vand.u32 4294901760, %v2312_v32  ;;  %v9156_v3 = vand.u32 4294901760, %v7516_v45  ;;  %v9506_v4 = vand.u32 4294901760, %v7501_v34 }
 0x10d   : > { %5654 = vmatpush1.bf16.msra.mxu0 %v7558_v35  ;;  %v2330_v46 = vsub.f32 %v7477_v39, %v9497_v27  ;;  %v2336_v33 = vsub.f32 %v7485_v62, %v9501_v49  ;;  %v9503_v27 = vand.u32 4294901760, %v7490_v28  ;;  %v2354_v25 = vsub.f32 %v7493_v0, %v9504_v48 }
 0x10e   : > { %5656 = vmatprep.subr.bf16.mxu0 %v7566_v41  ;;  %5530 = vmatpush1.bf16.msra.mxu1 %v5529_v38  ;;  %v5663_v38 = vpack.c.bf16 %v2307_v55, %v2295_v16  ;;  %v7638_v48 = vsub.f32 %v350_v53, %v2230_v23  ;;  %v7640_v41 = vsub.f32 %v359_v8, %v2234_v44  ;;  %v9505_v55 = vld [vmem:[#allocation47_spill] sm:$0xff]  ;;  %v9508_v32 = vand.u32 4294901760, %v7508_v59 }
 0x10f   : > { %v2342_v2 = vsub.f32 %v7490_v28, %v9503_v27  ;;  %5532 = vmatprep.subr.bf16.mxu1 %v5531_v19  ;;  %v2331_v35 = vand.u32 4294901760, %v2330_v46  ;;  %v2325_v27 = vand.u32 4294901760, %v2324_v11  ;;  %v2337_v31 = vand.u32 4294901760, %v2336_v33 }
 0x110   : > { %v9155_v19 = vand.u32 4294901760, %v7520_v29  ;;  %v2355_v56 = vand.u32 4294901760, %v2354_v25  ;;  %v5665_v16 = vpack.c.bf16 %v2313_v10, %v2301_v12  ;;  %v2348_v46 = vsub.f32 %v7501_v34, %v9506_v4 }
 0x111   : > { %5658 = vmatpush1.bf16.msra.mxu0 %v7573_v1  ;;  %v2343_v49 = vand.u32 4294901760, %v2342_v2  ;;  %v9507_v11 = vand.u32 4294901760, %v7506_v37  ;;  %v2366_v23 = vsub.f32 %v7508_v59, %v9508_v32  ;;  %v5667_v44 = vpack.c.bf16 %v2331_v35, %v2319_v17  ;;  %v9509_v2 = vld [vmem:[#allocation40_spill] sm:$0xff]  ;;  %v9511_v17 = vld [vmem:[#allocation13_spill] sm:$0xff] }
 0x112   : > { %5660 = vmatprep.subr.bf16.mxu0 %v7612_v21  ;;  %5534 = vmatpush1.bf16.msra.mxu1 %v5533_v57  ;;  %v2378_v53 = vsub.f32 %v7516_v45, %v9156_v3  ;;  %v9157_v57 = vand.u32 4294901760, %v7526_v20  ;;  %v5669_v12 = vpack.c.bf16 %v2337_v31, %v2325_v27  ;;  %v2372_v25 = vsub.f32 %v7520_v29, %v9155_v19  ;;  %v9514_v19 = vld [vmem:[#allocation14_spill] sm:$0xff] }
 0x113   : > { %5536 = vmatprep.subr.bf16.mxu1 %v9505_v55  ;;  %v2360_v33 = vsub.f32 %v7506_v37, %v9507_v11  ;;  %v9510_v10 = vand.u32 4294901760, %v7524_v61  ;;  %v5671_v32 = vpack.c.bf16 %v2355_v56, %v2343_v49  ;;  %v9513_v31 = vand.u32 4294901760, %v7310_v24 }
 0x114   : > { %v2367_v8 = vand.u32 4294901760, %v2366_v23  ;;  %v9515_v56 = vand.u32 4294901760, %v7355_v7  ;;  %v9516_v49 = vand.u32 4294901760, %v7380_v22  ;;  %v2379_v4 = vand.u32 4294901760, %v2378_v53  ;;  %v9528_v53 = vld [vmem:[#allocation37_spill] sm:$0xff]  ;;  %v9530_v23 = vld [vmem:[#allocation38_spill] sm:$0xff] }
 0x115   : > { %5662 = vmatpush1.bf16.msra.mxu0 %v7622_v63  ;;  %1757 = vmatmul.mubr.f32.vlgmr.msra.gmra.mrb[4].mxu1 %v9509_v2  ;;  %v2384_v35 = vsub.f32 %v7524_v61, %v9510_v10  ;;  %v2349_v10 = vand.u32 4294901760, %v2348_v46  ;;  %v2361_v3 = vand.u32 4294901760, %v2360_v33  ;;  %v9518_v24 = vand.u32 4294901760, %v7531_v9 }
 0x116   : > { %5664 = vmatprep.subr.bf16.mxu0 %v5663_v38  ;;  %5538 = vmatpush1.bf16.msra.mxu1 %v9511_v17  ;;  %v9512_v38 = vand.u32 4294901760, %v7279_v47  ;;  %v7681_v11 = vpack.c.bf16 %v9516_v49, %v9515_v56  ;;  %v2390_v47 = vsub.f32 %v7526_v20, %v9157_v57  ;;  %v9519_v46 = vand.u32 4294901760, %v7388_v36  ;;  %v9523_v56 = vld [vmem:[#allocation19_spill] sm:$0xff]  ;;  %v9527_v57 = vld [vmem:[#allocation46_spill] sm:$0xff] }
 0x117   : > { %1762 = vmatprep.mubr.f32.mxu1 %v9345_v50  ;;  %5540 = vmatprep.subr.bf16.mxu1 %v9514_v19  ;;  %v9520_v7 = vand.u32 4294901760, %v7393_v30  ;;  %v2373_v22 = vand.u32 4294901760, %v2372_v25  ;;  %v9524_v49 = vand.u32 4294901760, %v7540_v52  ;;  %v9525_v36 = vand.u32 4294901760, %v7542_v40  ;;  %v9557_v19 = vld [vmem:[#allocation36_spill] sm:$0xff] }
 0x118   : > { %v7673_v27 = vpack.c.bf16 %v9513_v31, %v9512_v38  ;;  %2274 = vmatmul.mubr.f32.vlgmr.msra.gmra.mrb[4].mxu0 %v9449_v58  ;;  %9517 = vst [vmem:[#allocation82_spill] sm:$0xff] %v7681_v11  ;;  %v2402_v38 = vsub.f32 %v7531_v9, %v9518_v24  ;;  %v9522_v31 = vld [vmem:[#allocation44_spill] sm:$0xff]  ;;  %v9531_v58 = vand.u32 4294901760, %v9530_v23  ;;  %v9534_v25 = vand.u32 4294901760, %v7467_v6 }
 0x119   : > { %5666 = vmatpush1.bf16.msra.mxu0 %v5665_v16  ;;  %2279 = vmatprep.mubr.f32.mxu0 %v9345_v50  ;;  %v7694_v33 = vpack.c.bf16 %v9520_v7, %v9519_v46  ;;  %v2385_v16 = vand.u32 4294901760, %v2384_v35  ;;  %v2396_v24 = vsub.f32 %v7540_v52, %v9524_v49  ;;  %v2408_v30 = vsub.f32 %v7542_v40, %v9525_v36  ;;  %v9526_v35 = vld [vmem:[#allocation50_spill] sm:$0xff] }
 0x11a   : > { %5668 = vmatprep.subr.bf16.mxu0 %v5667_v44  ;;  %1765 = vmatmul.mubr.f32.gmra.mrb[6].mxu1 %v9522_v31  ;;  %v9529_v49 = vand.u32 4294901760, %v9528_v53  ;;  %v9533_v36 = vand.u32 4294901760, %v7463_v5  ;;  %v5673_v21 = vpack.c.bf16 %v2361_v3, %v2349_v10  ;;  %v2391_v1 = vand.u32 4294901760, %v2390_v47 }
 0x11b   : > { %9521 = vst [vmem:[#allocation83_spill] sm:$0xff] %v7694_v33  ;;  %5542 = vmatpush1.bf16.msra.mxu1 %v9523_v56  ;;  %1867 = vmatprep.mubr.f32.mxu1 %v9345_v50  ;;  %v2403_v46 = vand.u32 4294901760, %v2402_v38  ;;  %v9536_v7 = vand.u32 4294901760, %v7475_v18  ;;  %v9542_v10 = vand.u32 4294901760, %v7485_v62  ;;  %v9544_v38 = vld [vmem:[#allocation57_spill] sm:$0xff]  ;;  %v9562_v2 = vand.u32 4294901760, %v7520_v29 }
 0x11c   : > { %5544 = vmatprep.subr.bf16.mxu1 %v9526_v35  ;;  %2285 = vmatmul.mubr.f32.gmra.mrb[6].mxu0 %v9527_v57  ;;  %v7717_v63 = vpack.c.bf16 %v9531_v58, %v9529_v49  ;;  %v7723_v44 = vpack.c.bf16 %v9534_v25, %v9533_v36  ;;  %v9537_v57 = vand.u32 4294901760, %v7477_v39  ;;  %v5675_v58 = vpack.c.bf16 %v2379_v4, %v2367_v8  ;;  %v9546_v36 = vld [vmem:[#allocation59_spill] sm:$0xff]  ;;  %v9556_v35 = vld [vmem:[#allocation30_spill] sm:$0xff] }
 0x11d   : > { %5670 = vmatpush1.bf16.msra.mxu0 %v5669_v12  ;;  %2515 = vmatprep.mubr.f32.mxu0 %v9345_v50  ;;  %v9539_v49 = vand.u32 4294901760, %v7544_v42  ;;  %v9540_v25 = vand.u32 4294901760, %v7551_v60  ;;  %v9541_v12 = vand.u32 4294901760, %v7483_v43  ;;  %v9545_v8 = vand.u32 4294901760, %v7560_v15 }
 0x11e   : > { %9532 = vst [vmem:[#allocation37_spill] sm:$0xff] %v7717_v63  ;;  %9535 = vst [vmem:[#allocation38_spill] sm:$0xff] %v7723_v44  ;;  %v7730_v31 = vpack.c.bf16 %v9537_v57, %v9536_v7  ;;  %5672 = vmatprep.subr.bf16.mxu0 %v5671_v32  ;;  %v5677_v57 = vpack.c.bf16 %v2385_v16, %v2373_v22  ;;  %v2397_v7 = vand.u32 4294901760, %v2396_v24  ;;  %v2409_v32 = vand.u32 4294901760, %v2408_v30 }
 0x11f   : > { %v2414_v63 = vsub.f32 %v7544_v42, %v9539_v49  ;;  %v2426_v3 = vsub.f32 %v7551_v60, %v9540_v25  ;;  %v7742_v47 = vpack.c.bf16 %v9542_v10, %v9541_v12  ;;  %5546 = vmatpush1.bf16.msra.mxu1 %v9544_v38  ;;  %v2420_v4 = vsub.f32 %v7560_v15, %v9545_v8 }
 0x120   : > { %9538 = vst [vmem:[#allocation84_spill] sm:$0xff] %v7730_v31  ;;  %5548 = vmatprep.subr.bf16.mxu1 %v9546_v36  ;;  %v9547_v49 = vand.u32 4294901760, %v7562_v14  ;;  %v9548_v31 = vand.u32 4294901760, %v7564_v51  ;;  %v9549_v10 = vand.u32 4294901760, %v7568_v13  ;;  %v9550_v16 = vand.u32 4294901760, %v7490_v28 }
 0x121   : > { %9543 = vst [vmem:[#allocation85_spill] sm:$0xff] %v7742_v47  ;;  %v9551_v24 = vand.u32 4294901760, %v7493_v0  ;;  %5674 = vmatpush1.bf16.msra.mxu0 %v5673_v21  ;;  %v5679_v8 = vpack.c.bf16 %v2403_v46, %v2391_v1  ;;  %v2443_v47 = vand.u32 4294901760, %v7595_v54  ;;  %v9553_v44 = vand.u32 4294901760, %v7501_v34 }
 0x122   : > { %v2432_v25 = vsub.f32 %v7562_v14, %v9547_v49  ;;  %v2438_v12 = vsub.f32 %v7564_v51, %v9548_v31  ;;  %v2450_v22 = vsub.f32 %v7568_v13, %v9549_v10  ;;  %v2455_v49 = vand.u32 4294901760, %v7597_v26  ;;  %5676 = vmatprep.subr.bf16.mxu0 %v5675_v58 }
 0x123   : > { %v7762_v30 = vpack.c.bf16 %v9551_v24, %v9550_v16  ;;  %v9554_v31 = vand.u32 4294901760, %v7506_v37  ;;  %v2415_v10 = vand.u32 4294901760, %v2414_v63  ;;  %v2427_v38 = vand.u32 4294901760, %v2426_v3  ;;  %v9558_v24 = vld [vmem:[#allocation63_spill] sm:$0xff]  ;;  %v9565_v63 = vld [vmem:[#allocation66_spill] sm:$0xff] }
 0x124   : > { %v2461_v56 = vand.u32 4294901760, %v9556_v35  ;;  %v2473_v16 = vand.u32 4294901760, %v9557_v19  ;;  %5550 = vmatpush1.bf16.msra.mxu1 %v9558_v24  ;;  %v5681_v1 = vpack.c.bf16 %v2409_v32, %v2397_v7  ;;  %v9559_v21 = vand.u32 4294901760, %v7508_v59 }
 0x125   : > { %9552 = vst [vmem:[#allocation86_spill] sm:$0xff] %v7762_v30  ;;  %v7770_v36 = vpack.c.bf16 %v9554_v31, %v9553_v44  ;;  %v9560_v46 = vand.u32 4294901760, %v7516_v45  ;;  %v9563_v44 = vand.u32 4294901760, %v7524_v61  ;;  %5552 = vmatprep.subr.bf16.mxu1 %v9565_v63  ;;  %v2421_v3 = vand.u32 4294901760, %v2420_v4  ;;  %5678 = vmatpush1.bf16.msra.mxu0 %v5677_v57  ;;  %v9569_v57 = vld [vmem:[#allocation69_spill] sm:$0xff] }
 0x126   : > { %v2433_v31 = vand.u32 4294901760, %v2432_v25  ;;  %v2451_v17 = vand.u32 4294901760, %v2450_v22  ;;  %v2444_v7 = vsub.f32 %v7595_v54, %v2443_v47  ;;  %v2456_v32 = vsub.f32 %v7597_v26, %v2455_v49  ;;  %5680 = vmatprep.subr.bf16.mxu0 %v5679_v8  ;;  %v9573_v8 = vld [vmem:[#allocation72_spill] sm:$0xff] }
 0x127   : > { %9555 = vst [vmem:[#allocation87_spill] sm:$0xff] %v7770_v36  ;;  %v7779_v30 = vpack.c.bf16 %v9560_v46, %v9559_v21  ;;  %v7785_v58 = vpack.c.bf16 %v9563_v44, %v9562_v2  ;;  %v2439_v36 = vand.u32 4294901760, %v2438_v12  ;;  %v2467_v21 = vand.u32 4294901760, %v7638_v48 }
 0x128   : > { %v2479_v46 = vand.u32 4294901760, %v7640_v41  ;;  %v2462_v2 = vsub.f32 %v9556_v35, %v2461_v56  ;;  %v2474_v44 = vsub.f32 %v9557_v19, %v2473_v16  ;;  %v9566_v4 = vand.u32 4294901760, %v7526_v20  ;;  %5554 = vmatpush1.bf16.msra.mxu1 %v9569_v57 }
 0x129   : > { %9561 = vst [vmem:[#allocation30_spill] sm:$0xff] %v7779_v30  ;;  %9564 = vst [vmem:[#allocation36_spill] sm:$0xff] %v7785_v58  ;;  %v5683_v30 = vpack.c.bf16 %v2427_v38, %v2415_v10  ;;  %v9567_v25 = vand.u32 4294901760, %v7531_v9  ;;  %v9570_v22 = vand.u32 4294901760, %v7540_v52  ;;  %v9571_v58 = vand.u32 4294901760, %v7542_v40  ;;  %5556 = vmatprep.subr.bf16.mxu1 %v9573_v8  ;;  %5682 = vmatpush1.bf16.msra.mxu0 %v5681_v1  ;;  %v9580_v1 = vld [vmem:[#allocation75_spill] sm:$0xff] }
 0x12a   : > { %v5685_v38 = vpack.c.bf16 %v2433_v31, %v2421_v3  ;;  %v5687_v10 = vpack.c.bf16 %v2451_v17, %v2439_v36  ;;  %v2445_v24 = vand.u32 4294901760, %v2444_v7  ;;  %v2457_v55 = vand.u32 4294901760, %v2456_v32  ;;  %v9581_v3 = vld [vmem:[#allocation79_spill] sm:$0xff] }
 0x12b   : > { %v7798_v12 = vpack.c.bf16 %v9567_v25, %v9566_v4  ;;  %v7805_v63 = vpack.c.bf16 %v9571_v58, %v9570_v22  ;;  %v2468_v33 = vsub.f32 %v7638_v48, %v2467_v21  ;;  %v2480_v4 = vsub.f32 %v7640_v41, %v2479_v46  ;;  %5684 = vmatprep.subr.bf16.mxu0 %v5683_v30 }
 0x12c   : > { %v2463_v25 = vand.u32 4294901760, %v2462_v2  ;;  %v9574_v57 = vand.u32 4294901760, %v7544_v42  ;;  %v9575_v11 = vand.u32 4294901760, %v7551_v60  ;;  %v9577_v22 = vand.u32 4294901760, %v7560_v15  ;;  %5558 = vmatpush1.bf16.msra.mxu1 %v9580_v1 }
 0x12d   : > { %9568 = vst [vmem:[#allocation88_spill] sm:$0xff] %v7798_v12  ;;  %9572 = vst [vmem:[#allocation89_spill] sm:$0xff] %v7805_v63  ;;  %v2475_v12 = vand.u32 4294901760, %v2474_v44  ;;  %v9578_v17 = vand.u32 4294901760, %v7562_v14  ;;  %5560 = vmatprep.subr.bf16.mxu1 %v9581_v3  ;;  %v9582_v30 = vand.u32 4294901760, %v7564_v51  ;;  %v9583_v31 = vand.u32 4294901760, %v7568_v13  ;;  %5686 = vmatpush1.bf16.msra.mxu0 %v5685_v38 }
 0x12e   : > { %v7814_v58 = vpack.c.bf16 %v9575_v11, %v9574_v57  ;;  %v7830_v32 = vpack.c.bf16 %v2455_v49, %v2443_v47  ;;  %v5689_v11 = vpack.c.bf16 %v2457_v55, %v2445_v24  ;;  %v2469_v2 = vand.u32 4294901760, %v2468_v33  ;;  %5688 = vmatprep.subr.bf16.mxu0 %v5687_v10  ;;  %v9588_v3 = vld [vmem:[#allocation15_spill] sm:$0xff]  ;;  %v9590_v33 = vld [vmem:[#allocation33_spill] sm:$0xff] }
 0x12f   : > { %v7820_v36 = vpack.c.bf16 %v9578_v17, %v9577_v22  ;;  %v7828_v7 = vpack.c.bf16 %v9583_v31, %v9582_v30  ;;  %v2481_v44 = vand.u32 4294901760, %v2480_v4  ;;  %v5691_v57 = vpack.c.bf16 %v2475_v12, %v2463_v25  ;;  %v9584_v22 = vld [vmem:[#allocation80_spill] sm:$0xff]  ;;  %v9591_v49 = vld [vmem:[#allocation49_spill] sm:$0xff]  ;;  %v9595_v38 = vld [vmem:[#allocation51_spill] sm:$0xff] }
 0x130   : > { %9576 = vst [vmem:[#allocation72_spill] sm:$0xff] %v7814_v58  ;;  %5562 = vmatpush1.bf16.msra.mxu1 %v9584_v22  ;;  %v7833_v17 = vpack.c.bf16 %v2473_v16, %v2461_v56  ;;  %v9586_v58 = vld [vmem:[#allocation48_spill] sm:$0xff]  ;;  %v9589_v1 = vand.u32 4294901760, %v9588_v3  ;;  %v7840_v31 = vpack.c.bf16 %v2479_v46, %v2467_v21  ;;  %v5695_v55 = vpack.c.bf16 %v9530_v23, %v9528_v53  ;;  %v9593_v16 = vld [vmem:[#allocation18_spill] sm:$0xff]  ;;  %v9599_v25 = vld [vmem:[#allocation41_spill] sm:$0xff] }
 0x131   : > { %9579 = vst [vmem:[#allocation90_spill] sm:$0xff] %v7820_v36  ;;  %v9585_v36 = vld [vmem:[#allocation32_spill] sm:$0xff]  ;;  %v9587_v63 = vand.u32 4294901760, %v9586_v58  ;;  %5690 = vmatpush1.bf16.msra.mxu0 %v5689_v11  ;;  %v5693_v47 = vpack.c.bf16 %v2481_v44, %v2469_v2  ;;  %v9592_v56 = vand.u32 4294901760, %v9591_v49  ;;  %v9594_v24 = vand.u32 4294901760, %v9593_v16  ;;  %v9600_v53 = vld [vmem:[#allocation53_spill] sm:$0xff] }
 0x132   : > { %5564 = vmatprep.subr.bf16.mxu1 %v9585_v36  ;;  %5692 = vmatprep.subr.bf16.mxu0 %v5691_v57  ;;  %v9596_v10 = vand.u32 4294901760, %v9595_v38  ;;  %v9597_v4 = vld [vmem:[#allocation52_spill] sm:$0xff]  ;;  %v5697_v46 = vpack.c.bf16 %v7467_v6, %v7463_v5  ;;  %v5699_v23 = vpack.c.bf16 %v7477_v39, %v7475_v18  ;;  %v9601_v58 = vand.u32 4294901760, %v9600_v53  ;;  %v9604_v2 = vld [vmem:[#allocation39_spill] sm:$0xff] }
 0x133   : > { %v5567_v30 = vpack.c.bf16 %v9589_v1, %v9587_v63  ;;  %v5569_v12 = vpack.c.bf16 %v9594_v24, %v9592_v56  ;;  %v9598_v63 = vand.u32 4294901760, %v9597_v4  ;;  %v9602_v1 = vld [vmem:[#allocation54_spill] sm:$0xff]  ;;  %v9605_v44 = vld [vmem:[#allocation55_spill] sm:$0xff]  ;;  %v9607_v5 = vld [vmem:[#allocation56_spill] sm:$0xff]  ;;  %v5701_v18 = vpack.c.bf16 %v7485_v62, %v7483_v43 }
 0x134   : > { %5566 = vmatpush1.bf16.msra.mxu1 %v9590_v33  ;;  %v9603_v3 = vand.u32 4294901760, %v9602_v1  ;;  %v9606_v57 = vand.u32 4294901760, %v9605_v44  ;;  %v9608_v6 = vand.u32 4294901760, %v9607_v5  ;;  %v5703_v39 = vpack.c.bf16 %v7493_v0, %v7490_v28  ;;  %v9612_v56 = vld [vmem:[#allocation60_spill] sm:$0xff]  ;;  %v9616_v62 = vld [vmem:[#allocation62_spill] sm:$0xff]  ;;  %v9618_v4 = vld [vmem:[#allocation43_spill] sm:$0xff] }
 0x135   : > { %5568 = vmatprep.subr.bf16.mxu1 %v5567_v30  ;;  %v5571_v21 = vpack.c.bf16 %v9598_v63, %v9596_v10  ;;  %5694 = vmatpush1.bf16.msra.mxu0 %v5693_v47  ;;  %v9609_v47 = vld [vmem:[#allocation45_spill] sm:$0xff]  ;;  %v9613_v16 = vand.u32 4294901760, %v9612_v56  ;;  %v9617_v43 = vand.u32 4294901760, %v9616_v62  ;;  %v5705_v0 = vpack.c.bf16 %v7506_v37, %v7501_v34  ;;  %v9619_v63 = vld [vmem:[#allocation64_spill] sm:$0xff]  ;;  %v9641_v62 = vld [vmem:[#allocation31_spill] sm:$0xff] }
 0x136   : > { %5696 = vmatprep.subr.bf16.mxu0 %v5695_v55  ;;  %v5573_v11 = vpack.c.bf16 %v9603_v3, %v9601_v58  ;;  %v5575_v30 = vpack.c.bf16 %v9608_v6, %v9606_v57  ;;  %v9610_v55 = vld [vmem:[#allocation58_spill] sm:$0xff]  ;;  %v5707_v28 = vpack.c.bf16 %v7516_v45, %v7508_v59  ;;  %v9623_v58 = vld [vmem:[#allocation67_spill] sm:$0xff]  ;;  %v9625_v3 = vld [vmem:[#allocation68_spill] sm:$0xff]  ;;  %v5709_v34 = vpack.c.bf16 %v7524_v61, %v7520_v29 }
 0x137   : > { %1871 = vmatmul.mubr.f32.vlgmr.msra.gmra.mrb[4].mxu1 %v9599_v25  ;;  %v9611_v49 = vand.u32 4294901760, %v9610_v55  ;;  %v9624_v1 = vand.u32 4294901760, %v9623_v58  ;;  %v5711_v37 = vpack.c.bf16 %v7531_v9, %v7526_v20  ;;  %v9627_v59 = vld [vmem:[#allocation70_spill] sm:$0xff]  ;;  %v9629_v57 = vld [vmem:[#allocation71_spill] sm:$0xff]  ;;  %v5713_v29 = vpack.c.bf16 %v7542_v40, %v7540_v52  ;;  %v9635_v61 = vld [vmem:[#allocation76_spill] sm:$0xff] }
 0x138   : > { %5570 = vmatpush1.bf16.msra.mxu1 %v5569_v12  ;;  %1876 = vmatprep.mubr.f32.mxu1 %v9345_v50  ;;  %v9614_v12 = vld [vmem:[#allocation61_spill] sm:$0xff]  ;;  %v9628_v45 = vand.u32 4294901760, %v9627_v59  ;;  %v9630_v5 = vand.u32 4294901760, %v9629_v57  ;;  %v5715_v20 = vpack.c.bf16 %v7551_v60, %v7544_v42  ;;  %v9636_v9 = vand.u32 4294901760, %v9635_v61  ;;  %v7923_v40 = vld [vmem:[#allocation5 + $0x40] sm:$0xff]  ;;  %v9659_v57 = vld [vmem:[#allocation40_spill] sm:$0xff] }
 0x139   : > { %2517 = vmatmul.mubr.f32.vlgmr.msra.gmra.mrb[4].mxu0 %v9604_v2  ;;  %5572 = vmatprep.subr.bf16.mxu1 %v5571_v21  ;;  %v5577_v24 = vpack.c.bf16 %v9613_v16, %v9611_v49  ;;  %v9615_v38 = vand.u32 4294901760, %v9614_v12  ;;  %v9620_v21 = vand.u32 4294901760, %v9619_v63  ;;  %v9637_v56 = vld [vmem:[#allocation77_spill] sm:$0xff]  ;;  %v9639_v12 = vld [vmem:[#allocation78_spill] sm:$0xff]  ;;  %v5717_v52 = vpack.c.bf16 %v7562_v14, %v7560_v15  ;;  %v9650_v58 = vld [vmem:[#allocation83_spill] sm:$0xff] }
 0x13a   : > { %5698 = vmatpush1.bf16.msra.mxu0 %v5697_v46  ;;  %2522 = vmatprep.mubr.f32.mxu0 %v9345_v50  ;;  %v9621_v46 = vld [vmem:[#allocation65_spill] sm:$0xff]  ;;  %v5585_v6 = vpack.c.bf16 %v9630_v5, %v9628_v45  ;;  %v9638_v16 = vand.u32 4294901760, %v9637_v56  ;;  %v5719_v42 = vpack.c.bf16 %v7568_v13, %v7564_v51  ;;  %v9180_v60 = vand.u32 4294901760, %v7923_v40  ;;  %v7945_v13 = vld [vmem:[#allocation5 + $0x160] sm:$0xff]  ;;  %v7983_v45 = vld [vmem:[#allocation5 + $0x2c8] sm:$0xff] }
 0x13b   : > { %5700 = vmatprep.subr.bf16.mxu0 %v5699_v23  ;;  %1880 = vmatmul.mubr.f32.gmra.mrb[6].mxu1 %v9609_v47  ;;  %v5579_v10 = vpack.c.bf16 %v9617_v43, %v9615_v38  ;;  %v9622_v23 = vand.u32 4294901760, %v9621_v46  ;;  %v9640_v38 = vand.u32 4294901760, %v9639_v12  ;;  %v9642_v43 = vand.u32 4294901760, %v9641_v62  ;;  %v7931_v63 = vld [vmem:[#allocation5 + $0xd0] sm:$0xff]  ;;  %9646 = vst [vmem:[#allocation15_spill] sm:$0xff] %v7945_v13  ;;  %v7947_v46 = vld [vmem:[#allocation5 + $0x1a8] sm:$0xff] }
 0x13c   : > { %5574 = vmatpush1.bf16.msra.mxu1 %v5573_v11  ;;  %2046 = vmatprep.mubr.f32.mxu1 %v9345_v50  ;;  %v9626_v11 = vand.u32 4294901760, %v9625_v3  ;;  %9643 = vst [vmem:[#allocation80_spill] sm:$0xff] %v7931_v63  ;;  %v5721_v15 = vpack.c.bf16 %v7597_v26, %v7595_v54  ;;  %v5723_v14 = vpack.c.bf16 %v9557_v19, %v9556_v35  ;;  %9647 = vst [vmem:[#allocation33_spill] sm:$0xff] %v7947_v46  ;;  %v9648_v54 = vld [vmem:[#allocation82_spill] sm:$0xff]  ;;  %v9654_v3 = vld [vmem:[#allocation47_spill] sm:$0xff] }
 0x13d   : > { %5576 = vmatprep.subr.bf16.mxu1 %v5575_v30  ;;  %2524 = vmatmul.mubr.f32.gmra.mrb[6].mxu0 %v9618_v4  ;;  %v5581_v53 = vpack.c.bf16 %v9622_v23, %v9620_v21  ;;  %v9631_v30 = vld [vmem:[#allocation73_spill] sm:$0xff]  ;;  %v9178_v23 = vand.u32 4294901760, %v7931_v63  ;;  %v5725_v19 = vpack.c.bf16 %v7640_v41, %v7638_v48  ;;  %v7981_v59 = vld [vmem:[#allocation5 + $0x280] sm:$0xff]  ;;  %9658 = vst [vmem:[#allocation54_spill] sm:$0xff] %v7983_v45 }
 0x13e   : > { %5702 = vmatpush1.bf16.msra.mxu0 %v5701_v18  ;;  %2658 = vmatprep.mubr.f32.mxu0 %v9345_v50  ;;  %v5583_v44 = vpack.c.bf16 %v9626_v11, %v9624_v1  ;;  %v9632_v18 = vand.u32 4294901760, %v9631_v30  ;;  %v7933_v21 = vld [vmem:[#allocation5 + $0x118] sm:$0xff]  ;;  %v7970_v41 = vld [vmem:[#allocation5 + $0x1f0] sm:$0xff]  ;;  %v9655_v11 = vld [vmem:[#allocation35_spill] sm:$0xff]  ;;  %9657 = vst [vmem:[#allocation53_spill] sm:$0xff] %v7981_v59 }
 0x13f   : > { %5704 = vmatprep.subr.bf16.mxu0 %v5703_v39  ;;  %v9633_v39 = vld [vmem:[#allocation74_spill] sm:$0xff]  ;;  %9644 = vst [vmem:[#allocation32_spill] sm:$0xff] %v7933_v21  ;;  %v9177_v26 = vand.u32 4294901760, %v7933_v21  ;;  %9652 = vst [vmem:[#allocation51_spill] sm:$0xff] %v7970_v41  ;;  %v9662_v30 = vld [vmem:[#allocation12_spill] sm:$0xff] }
 0x140   : > { %5578 = vmatpush1.bf16.msra.mxu1 %v5577_v24  ;;  %v9634_v55 = vand.u32 4294901760, %v9633_v39  ;;  %v5589_v24 = vpack.c.bf16 %v9638_v16, %v9636_v9  ;;  %v7972_v48 = vld [vmem:[#allocation5 + $0x238] sm:$0xff]  ;;  %v9170_v39 = vand.u32 4294901760, %v7981_v59  ;;  %v9668_v9 = vld [vmem:[#allocation44_spill] sm:$0xff]  ;;  %v280_v59 = vld [vmem:[#allocation5 + $0x1e0] sm:$0xff] }
 0x141   : > { %5580 = vmatprep.subr.bf16.mxu1 %v5579_v10  ;;  %v5591_v10 = vpack.c.bf16 %v9642_v43, %v9640_v38  ;;  %v7959_v35 = vpack.c.bf16 %v9177_v26, %v9178_v23  ;;  %9653 = vst [vmem:[#allocation52_spill] sm:$0xff] %v7972_v48  ;;  %v9660_v5 = vld [vmem:[#allocation14_spill] sm:$0xff]  ;;  %v9670_v16 = vld [vmem:[#allocation17_spill] sm:$0xff]  ;;  %v9671_v38 = vld [vmem:[#allocation20_spill] sm:$0xff] }
 0x142   : > { %5706 = vmatpush1.bf16.msra.mxu0 %v5705_v0  ;;  %v5587_v49 = vpack.c.bf16 %v9634_v55, %v9632_v18  ;;  %v7925_v0 = vld [vmem:[#allocation5 + $0x88] sm:$0xff]  ;;  %v9169_v55 = vand.u32 4294901760, %v7983_v45  ;;  %v9667_v61 = vld [vmem:[#allocation50_spill] sm:$0xff]  ;;  %v9672_v62 = vld [vmem:[#allocation57_spill] sm:$0xff] }
 0x143   : > { %5708 = vmatprep.subr.bf16.mxu0 %v5707_v28  ;;  %v9179_v28 = vand.u32 4294901760, %v7925_v0  ;;  %9649 = vst [vmem:[#allocation49_spill] sm:$0xff] %v7959_v35  ;;  %v9663_v18 = vld [vmem:[#allocation16_spill] sm:$0xff] }
 0x144   : > { %5582 = vmatpush1.bf16.msra.mxu1 %v5581_v53  ;;  %v9176_v53 = vand.u32 4294901760, %v7945_v13  ;;  %v8011_v56 = vpack.c.bf16 %v9169_v55, %v9170_v39  ;;  %v9689_v55 = vld [vmem:[#allocation26_spill] sm:$0xff]  ;;  %v9690_v39 = vld [vmem:[#allocation75_spill] sm:$0xff]  ;;  %v9693_v26 = vld [vmem:[#allocation28_spill] sm:$0xff] }
 0x145   : > { %5584 = vmatprep.subr.bf16.mxu1 %v5583_v44  ;;  %v7943_v51 = vpack.c.bf16 %v9179_v28, %v9180_v60  ;;  %v9172_v44 = vand.u32 4294901760, %v7970_v41  ;;  %v8137_v63 = vld [vmem:[#allocation5 + $0x350] sm:$0xff] }
 0x146   : > { %5710 = vmatpush1.bf16.msra.mxu0 %v5709_v34  ;;  %v9171_v34 = vand.u32 4294901760, %v7972_v48  ;;  %9669 = vst [vmem:[#allocation60_spill] sm:$0xff] %v8011_v56  ;;  %v263_v56 = vld [vmem:[#allocation5 + $0x158] sm:$0xff] }
 0x147   : > { %5712 = vmatprep.subr.bf16.mxu0 %v5711_v37  ;;  %9645 = vst [vmem:[#allocation48_spill] sm:$0xff] %v7943_v51  ;;  %v9656_v37 = vld [vmem:[#allocation13_spill] sm:$0xff]  ;;  %v3092_v51 = vand.u32 4294901760, %v263_v56 }
 0x148   : > { %5586 = vmatpush1.bf16.msra.mxu1 %v5585_v6  ;;  %v7991_v6 = vpack.c.bf16 %v9171_v34, %v9172_v44  ;;  %v9691_v34 = vld [vmem:[#allocation79_spill] sm:$0xff] }
 0x149   : > { %5588 = vmatprep.subr.bf16.mxu1 %v5587_v49  ;;  %v7999_v49 = vld [vmem:[#allocation5 + $0x310] sm:$0xff] }
 0x14a   : > { %5714 = vmatpush1.bf16.msra.mxu0 %v5713_v29  ;;  %9661 = vst [vmem:[#allocation55_spill] sm:$0xff] %v7991_v6  ;;  %9664 = vst [vmem:[#allocation56_spill] sm:$0xff] %v7999_v49  ;;  %v8001_v29 = vld [vmem:[#allocation5 + $0x358] sm:$0xff] }
 0x14b   : > { %5716 = vmatprep.subr.bf16.mxu0 %v5715_v20  ;;  %9665 = vst [vmem:[#allocation58_spill] sm:$0xff] %v8001_v29  ;;  %v9666_v20 = vld [vmem:[#allocation19_spill] sm:$0xff]  ;;  %v9165_v12 = vand.u32 4294901760, %v8001_v29  ;;  %v9696_v6 = vld [vmem:[#allocation34_spill] sm:$0xff] }
 0x14c   : > { %5590 = vmatpush1.bf16.msra.mxu1 %v5589_v24  ;;  %v9166_v24 = vand.u32 4294901760, %v7999_v49 }
 0x14d   : > { %5592 = vmatprep.subr.bf16.mxu1 %v5591_v10  ;;  %v8025_v10 = vld [vmem:[#allocation5 + $0x3a0] sm:$0xff] }
 0x14e   : > { %5718 = vmatpush1.bf16.msra.mxu0 %v5717_v52  ;;  %v8023_v43 = vpack.c.bf16 %v9165_v12, %v9166_v24  ;;  %9674 = vst [vmem:[#allocation62_spill] sm:$0xff] %v8025_v10  ;;  %v8027_v52 = vld [vmem:[#allocation5 + $0x3e8] sm:$0xff]  ;;  %v9686_v24 = vld [vmem:[#allocation69_spill] sm:$0xff] }
 0x14f   : > { %5720 = vmatprep.subr.bf16.mxu0 %v5719_v42  ;;  %9675 = vst [vmem:[#allocation43_spill] sm:$0xff] %v8027_v52  ;;  %v9676_v42 = vld [vmem:[#allocation59_spill] sm:$0xff]  ;;  %v9685_v12 = vld [vmem:[#allocation24_spill] sm:$0xff] }
 0x150   : > { %5594 = vmatpush1.bf16.msra.mxu1 %v7673_v27  ;;  %v9175_v27 = vand.u32 4294901760, %v7947_v46  ;;  %9673 = vst [vmem:[#allocation61_spill] sm:$0xff] %v8023_v43  ;;  %v9695_v43 = vld [vmem:[#allocation29_spill] sm:$0xff] }
 0x151   : > { %5596 = vmatprep.subr.bf16.mxu1 %v9648_v54  ;;  %v9168_v54 = vand.u32 4294901760, %v8025_v10  ;;  %v290_v10 = vld [vmem:[#allocation5 + $0x230] sm:$0xff] }
 0x152   : > { %5722 = vmatpush1.bf16.msra.mxu0 %v5721_v15  ;;  %v7968_v1 = vpack.c.bf16 %v9175_v27, %v9176_v53  ;;  %v9677_v15 = vld [vmem:[#allocation21_spill] sm:$0xff]  ;;  %v8073_v27 = vld [vmem:[#allocation5 + $0xc8] sm:$0xff]  ;;  %v3104_v45 = vand.u32 4294901760, %v290_v10 }
 0x153   : > { %5724 = vmatprep.subr.bf16.mxu0 %v5723_v14  ;;  %v9678_v14 = vld [vmem:[#allocation22_spill] sm:$0xff]  ;;  %v8075_v53 = vld [vmem:[#allocation5 + $0x110] sm:$0xff]  ;;  %v3084_v28 = vand.u32 4294901760, %v8073_v27 }
 0x154   : > { %5598 = vmatpush1.bf16.msra.mxu1 %v9650_v58  ;;  %9651 = vst [vmem:[#allocation18_spill] sm:$0xff] %v7968_v1  ;;  %v8034_v58 = vld [vmem:[#allocation5 + $0x430] sm:$0xff]  ;;  %v3088_v60 = vand.u32 4294901760, %v8075_v53 }
 0x155   : > { %5600 = vmatprep.subr.bf16.mxu1 %v9654_v3  ;;  %9679 = vst [vmem:[#allocation64_spill] sm:$0xff] %v8034_v58  ;;  %v8036_v3 = vld [vmem:[#allocation5 + $0x478] sm:$0xff] }
 0x156   : > { %5726 = vmatpush1.bf16.msra.mxu0 %v5725_v19  ;;  %v9167_v19 = vand.u32 4294901760, %v8027_v52  ;;  %9680 = vst [vmem:[#allocation65_spill] sm:$0xff] %v8036_v3  ;;  %v8096_v35 = vpack.c.bf16 %v3088_v60, %v3084_v28  ;;  %v281_v52 = vld [vmem:[#allocation5 + $0x1e8] sm:$0xff] }
 0x157   : > { %2048 = vmatmul.mubr.f32.vlgmr.msra.gmra.mrb[4].mxu1 %v9604_v2  ;;  %5728 = vmatprep.subr.bf16.mxu0 %v9655_v11 }
 0x158   : > { %5602 = vmatpush1.bf16.msra.mxu1 %v9656_v37  ;;  %2053 = vmatprep.mubr.f32.mxu1 %v9345_v50  ;;  %v9681_v37 = vld [vmem:[#allocation63_spill] sm:$0xff]  ;;  %9698 = vst [vmem:[#allocation73_spill] sm:$0xff] %v8096_v35 }
 0x159   : > { %2661 = vmatmul.mubr.f32.vlgmr.msra.gmra.mrb[4].mxu0 %v9659_v57  ;;  %5604 = vmatprep.subr.bf16.mxu1 %v9660_v5  ;;  %v9682_v5 = vld [vmem:[#allocation66_spill] sm:$0xff]  ;;  %v262_v57 = vld [vmem:[#allocation5 + $0x150] sm:$0xff] }
 0x15a   : > { %5730 = vmatpush1.bf16.msra.mxu0 %v9662_v30  ;;  %2666 = vmatprep.mubr.f32.mxu0 %v9345_v50  ;;  %v3094_v29 = vand.u32 4294901760, %v262_v57 }
 0x15b   : > { %5732 = vmatprep.subr.bf16.mxu0 %v9663_v18  ;;  %2055 = vmatmul.mubr.f32.gmra.mrb[6].mxu1 %v9618_v4 }
 0x15c   : > { %5606 = vmatpush1.bf16.msra.mxu1 %v9666_v20  ;;  %2157 = vmatprep.mubr.f32.mxu1 %v9345_v50  ;;  %v8044_v20 = vpack.c.bf16 %v9167_v19, %v9168_v54  ;;  %v8059_v19 = vld [vmem:[#allocation5 + $0x38] sm:$0xff]  ;;  %v8061_v54 = vld [vmem:[#allocation5 + $0x80] sm:$0xff] }
 0x15d   : > { %5608 = vmatprep.subr.bf16.mxu1 %v9667_v61  ;;  %2669 = vmatmul.mubr.f32.gmra.mrb[6].mxu0 %v9668_v9  ;;  %v9684_v61 = vld [vmem:[#allocation23_spill] sm:$0xff]  ;;  %v9187_v44 = vand.u32 4294901760, %v8061_v54 }
 0x15e   : > { %5734 = vmatpush1.bf16.msra.mxu0 %v9670_v16  ;;  %2771 = vmatprep.mubr.f32.mxu0 %v9345_v50  ;;  %9683 = vst [vmem:[#allocation67_spill] sm:$0xff] %v8044_v20  ;;  %v253_v20 = vld [vmem:[#allocation5 + $0x108] sm:$0xff] }
 0x15f   : > { %5736 = vmatprep.subr.bf16.mxu0 %v9671_v38 }
 0x160   : > { %5610 = vmatpush1.bf16.msra.mxu1 %v9672_v62  ;;  %v9174_v62 = vand.u32 4294901760, %v8034_v58  ;;  %v9699_v58 = vld [vmem:[#allocation81_spill] sm:$0xff] }
 0x161   : > { %5612 = vmatprep.subr.bf16.mxu1 %v9676_v42  ;;  %v9173_v42 = vand.u32 4294901760, %v8036_v3  ;;  %v271_v3 = vld [vmem:[#allocation5 + $0x198] sm:$0xff] }
 0x162   : > { %5738 = vmatpush1.bf16.msra.mxu0 %v9677_v15  ;;  %v3098_v49 = vand.u32 4294901760, %v271_v3 }
 0x163   : > { %5740 = vmatprep.subr.bf16.mxu0 %v9678_v14  ;;  %v8218_v14 = vld [vmem:[#allocation5 + $0x420] sm:$0xff] }
 0x164   : > { %5614 = vmatpush1.bf16.msra.mxu1 %v9681_v37  ;;  %v8055_v37 = vpack.c.bf16 %v9173_v42, %v9174_v62  ;;  %v8068_v42 = vld [vmem:[#allocation5 + $0x30] sm:$0xff]  ;;  %v8070_v62 = vld [vmem:[#allocation5 + $0x78] sm:$0xff] }
 0x165   : > { %5616 = vmatprep.subr.bf16.mxu1 %v9682_v5  ;;  %v9688_v5 = vld [vmem:[#allocation25_spill] sm:$0xff] }
 0x166   : > { %5742 = vmatpush1.bf16.msra.mxu0 %v9684_v61  ;;  %9687 = vst [vmem:[#allocation68_spill] sm:$0xff] %v8055_v37  ;;  %v244_v37 = vld [vmem:[#allocation5 + $0xc0] sm:$0xff] }
 0x167   : > { %5744 = vmatprep.subr.bf16.mxu0 %v9685_v12  ;;  %v3086_v1 = vand.u32 4294901760, %v244_v37  ;;  %v8144_v12 = vsub.f32 %v8075_v53, %v3088_v60  ;;  %v316_v61 = vld [vmem:[#allocation5 + $0x300] sm:$0xff] }
 0x168   : > { %5618 = vmatpush1.bf16.msra.mxu1 %v9686_v24  ;;  %v3076_v24 = vand.u32 4294901760, %v8059_v19 }
 0x169   : > { %5620 = vmatprep.subr.bf16.mxu1 %v9573_v8  ;;  %v9692_v8 = vld [vmem:[#allocation27_spill] sm:$0xff]  ;;  %9712 = vst [vmem:[#allocation47_spill] sm:$0xff] %v8144_v12 }
 0x16a   : > { %5746 = vmatpush1.bf16.msra.mxu0 %v9688_v5  ;;  %v8084_v23 = vpack.c.bf16 %v9187_v44, %v3076_v24  ;;  %v3090_v44 = vand.u32 4294901760, %v253_v20  ;;  %v8119_v41 = vsub.f32 %v8059_v19, %v3076_v24  ;;  %v307_v5 = vld [vmem:[#allocation5 + $0x2b8] sm:$0xff] }
 0x16b   : > { %5748 = vmatprep.subr.bf16.mxu0 %v9689_v55  ;;  %v298_v55 = vld [vmem:[#allocation5 + $0x270] sm:$0xff] }
 0x16c   : > { %5622 = vmatpush1.bf16.msra.mxu1 %v9690_v39  ;;  %v3082_v39 = vand.u32 4294901760, %v8070_v62  ;;  %9694 = vst [vmem:[#allocation70_spill] sm:$0xff] %v8084_v23  ;;  %9706 = vst [vmem:[#allocation78_spill] sm:$0xff] %v8119_v41  ;;  %v9711_v24 = vld [vmem:[#allocation85_spill] sm:$0xff] }
 0x16d   : > { %5624 = vmatprep.subr.bf16.mxu1 %v9691_v34  ;;  %v3078_v34 = vand.u32 4294901760, %v8068_v42 }
 0x16e   : > { %5750 = vmatpush1.bf16.msra.mxu0 %v9692_v8  ;;  %v9704_v8 = vld [vmem:[#allocation84_spill] sm:$0xff]  ;;  %v8134_v19 = vsub.f32 %v8070_v62, %v3082_v39  ;;  %v8151_v62 = vsub.f32 %v263_v56, %v3092_v51  ;;  %v9719_v56 = vld [vmem:[#allocation87_spill] sm:$0xff] }
 0x16f   : > { %5752 = vmatprep.subr.bf16.mxu0 %v9693_v26  ;;  %v9703_v26 = vld [vmem:[#allocation38_spill] sm:$0xff]  ;;  %v8131_v21 = vsub.f32 %v8068_v42, %v3078_v34  ;;  %v8148_v42 = vsub.f32 %v253_v20, %v3090_v44 }
 0x170   : > { %5626 = vmatpush1.bf16.msra.mxu1 %v9584_v22  ;;  %v8089_v22 = vld [vmem:[#allocation5 + $0x1a0] sm:$0xff]  ;;  %9714 = vst [vmem:[#allocation35_spill] sm:$0xff] %v8151_v62 }
 0x171   : > { %5628 = vmatprep.subr.bf16.mxu1 %v9585_v36  ;;  %v8093_v36 = vpack.c.bf16 %v3082_v39, %v3078_v34  ;;  %v3096_v9 = vand.u32 4294901760, %v8089_v22  ;;  %9710 = vst [vmem:[#allocation83_spill] sm:$0xff] %v8131_v21  ;;  %v9713_v34 = vld [vmem:[#allocation86_spill] sm:$0xff] }
 0x172   : > { %5754 = vmatpush1.bf16.msra.mxu0 %v9695_v43  ;;  %v289_v43 = vld [vmem:[#allocation5 + $0x228] sm:$0xff] }
 0x173   : > { %5756 = vmatprep.subr.bf16.mxu0 %v9696_v6  ;;  %9697 = vst [vmem:[#allocation71_spill] sm:$0xff] %v8093_v36  ;;  %v8108_v6 = vpack.c.bf16 %v3096_v9, %v3092_v51  ;;  %v3106_v48 = vand.u32 4294901760, %v289_v43  ;;  %v8159_v60 = vsub.f32 %v8089_v22, %v3096_v9  ;;  %v3120_v51 = vand.u32 4294901760, %v8137_v63  ;;  %v8176_v9 = vld [vmem:[#allocation5 + $0x3e0] sm:$0xff] }
 0x174   : > { %5630 = vmatpush1.bf16.msra.mxu1 %v9590_v33  ;;  %v9700_v33 = vld [vmem:[#allocation37_spill] sm:$0xff] }
 0x175   : > { %5824 = vmatprep.subr.bf16.mxu1 %v8084_v23  ;;  %v8104_v23 = vpack.c.bf16 %v3090_v44, %v3086_v1  ;;  %9702 = vst [vmem:[#allocation76_spill] sm:$0xff] %v8108_v6  ;;  %9716 = vst [vmem:[#allocation14_spill] sm:$0xff] %v8159_v60  ;;  %v8167_v44 = vsub.f32 %v271_v3, %v3098_v49  ;;  %v8186_v3 = vld [vmem:[#allocation5 + $0x3d8] sm:$0xff] }
 0x176   : > { %5758 = vmatpush1.bf16.msra.mxu0 %v9699_v58  ;;  %v3100_v58 = vand.u32 4294901760, %v281_v52 }
 0x177   : > { %2159 = vmatmul.mubr.f32.vlgmr.msra.gmra.mrb[4].mxu1 %v9604_v2  ;;  %5760 = vmatprep.subr.bf16.mxu0 %v9700_v33  ;;  %9701 = vst [vmem:[#allocation74_spill] sm:$0xff] %v8104_v23  ;;  %v299_v33 = vld [vmem:[#allocation5 + $0x278] sm:$0xff] }
 0x178   : > { %5826 = vmatpush1.bf16.msra.mxu1 %v8093_v36  ;;  %2164 = vmatprep.mubr.f32.mxu1 %v9345_v50  ;;  %v308_v36 = vld [vmem:[#allocation5 + $0x2c0] sm:$0xff]  ;;  %v3108_v46 = vand.u32 4294901760, %v299_v33  ;;  %v8170_v20 = vsub.f32 %v281_v52, %v3100_v58  ;;  %v3128_v52 = vand.u32 4294901760, %v8176_v9 }
 0x179   : > { %2775 = vmatmul.mubr.f32.vlgmr.msra.gmra.mrb[4].mxu0 %v9599_v25  ;;  %5828 = vmatprep.subr.bf16.mxu1 %v8096_v35  ;;  %v8115_v25 = vpack.c.bf16 %v3098_v49, %v3094_v29  ;;  %v3102_v35 = vand.u32 4294901760, %v280_v59  ;;  %v3112_v13 = vand.u32 4294901760, %v308_v36 }
 0x17a   : > { %5762 = vmatpush1.bf16.msra.mxu0 %v9703_v26  ;;  %2780 = vmatprep.mubr.f32.mxu0 %v9345_v50  ;;  %v8122_v26 = vpack.c.bf16 %v3104_v45, %v3100_v58  ;;  %9720 = vst [vmem:[#allocation19_spill] sm:$0xff] %v8170_v20  ;;  %v9726_v58 = vld [vmem:[#allocation36_spill] sm:$0xff] }
 0x17b   : > { %2166 = vmatmul.mubr.f32.gmra.mrb[6].mxu1 %v9618_v4  ;;  %5764 = vmatprep.subr.bf16.mxu0 %v9704_v8  ;;  %9705 = vst [vmem:[#allocation77_spill] sm:$0xff] %v8115_v25  ;;  %v9708_v8 = vand.u32 4294901760, %v8061_v54  ;;  %v8154_v39 = vpack.c.bf16 %v3106_v48, %v3102_v35  ;;  %v8162_v53 = vpack.c.bf16 %v3112_v13, %v3108_v46 }
 0x17c   : > { %5830 = vmatpush1.bf16.msra.mxu1 %v8104_v23  ;;  %3172 = vmatprep.mubr.f32.mxu1 %v9345_v50  ;;  %9707 = vst [vmem:[#allocation31_spill] sm:$0xff] %v8122_v26  ;;  %v8178_v22 = vsub.f32 %v280_v59, %v3102_v35  ;;  %v8209_v35 = vld [vmem:[#allocation5 + $0x428] sm:$0xff] }
 0x17d   : > { %5832 = vmatprep.subr.bf16.mxu1 %v8108_v6  ;;  %2784 = vmatmul.mubr.f32.gmra.mrb[6].mxu0 %v9609_v47  ;;  %v8128_v23 = vsub.f32 %v8061_v54, %v9708_v8  ;;  %v317_v6 = vld [vmem:[#allocation5 + $0x308] sm:$0xff]  ;;  %v8141_v47 = vsub.f32 %v8073_v27, %v3084_v28  ;;  %v8146_v54 = vsub.f32 %v244_v37, %v3086_v1  ;;  %v3110_v8 = vand.u32 4294901760, %v298_v55 }
 0x17e   : > { %5766 = vmatpush1.bf16.msra.mxu0 %v9711_v24  ;;  %2950 = vmatprep.mubr.f32.mxu0 %v9345_v50  ;;  %9715 = vst [vmem:[#allocation13_spill] sm:$0xff] %v8154_v39  ;;  %v3114_v24 = vand.u32 4294901760, %v307_v5  ;;  %v8156_v28 = vld [vmem:[#allocation5 + $0x348] sm:$0xff]  ;;  %9717 = vst [vmem:[#allocation12_spill] sm:$0xff] %v8162_v53  ;;  %v3116_v27 = vand.u32 4294901760, %v317_v6  ;;  %v8165_v1 = vsub.f32 %v262_v57, %v3094_v29  ;;  %v3118_v57 = vand.u32 4294901760, %v316_v61 }
 0x17f   : > { %9709 = vst [vmem:[#allocation82_spill] sm:$0xff] %v8128_v23  ;;  %5768 = vmatprep.subr.bf16.mxu0 %v9713_v34  ;;  %v8172_v37 = vsub.f32 %v290_v10, %v3104_v45  ;;  %v8174_v34 = vld [vmem:[#allocation5 + $0x398] sm:$0xff]  ;;  %v3122_v49 = vand.u32 4294901760, %v8156_v28  ;;  %v8184_v29 = vld [vmem:[#allocation5 + $0x390] sm:$0xff]  ;;  %v8189_v45 = vsub.f32 %v299_v33, %v3108_v46  ;;  %v8203_v46 = vsub.f32 %v298_v55, %v3110_v8  ;;  %v8220_v55 = vld [vmem:[#allocation5 + $0x468] sm:$0xff] }
 0x180   : > { %5834 = vmatpush1.bf16.msra.mxu1 %v8115_v25  ;;  %9718 = vst [vmem:[#allocation16_spill] sm:$0xff] %v8165_v1  ;;  %v9723_v25 = vld [vmem:[#allocation30_spill] sm:$0xff]  ;;  %v8191_v10 = vpack.c.bf16 %v3114_v24, %v3110_v8  ;;  %v8198_v59 = vpack.c.bf16 %v3120_v51, %v3116_v27  ;;  %v8205_v33 = vsub.f32 %v307_v5, %v3114_v24  ;;  %v9729_v24 = vand.u32 4294901760, %v8119_v41 }
 0x181   : > { %5836 = vmatprep.subr.bf16.mxu1 %v8122_v26  ;;  %9721 = vst [vmem:[#allocation50_spill] sm:$0xff] %v8172_v37  ;;  %v8180_v26 = vsub.f32 %v289_v43, %v3106_v48  ;;  %v3124_v43 = vand.u32 4294901760, %v8174_v34  ;;  %v8235_v5 = vsub.f32 %v8137_v63, %v3120_v51  ;;  %v9736_v48 = vand.u32 4294901760, %v8186_v3 }
 0x182   : > { %5770 = vmatpush1.bf16.msra.mxu0 %v9719_v56  ;;  %9724 = vst [vmem:[#allocation20_spill] sm:$0xff] %v8191_v10  ;;  %9725 = vst [vmem:[#allocation57_spill] sm:$0xff] %v8198_v59  ;;  %v9739_v56 = vld [vmem:[#allocation72_spill] sm:$0xff]  ;;  %v9742_v63 = vand.u32 4294901760, %v8141_v47 }
 0x183   : > { %9722 = vst [vmem:[#allocation17_spill] sm:$0xff] %v8180_v26  ;;  %5772 = vmatprep.subr.bf16.mxu0 %v9723_v25  ;;  %v8196_v25 = vsub.f32 %v308_v36, %v3112_v13  ;;  %v8211_v13 = vld [vmem:[#allocation5 + $0x470] sm:$0xff]  ;;  %v8237_v8 = vpack.c.bf16 %v3128_v52, %v3124_v43 }
 0x184   : > { %5838 = vmatpush1.bf16.msra.mxu1 %v8154_v39  ;;  %v9727_v36 = vld [vmem:[#allocation88_spill] sm:$0xff]  ;;  %v8216_v39 = vpack.c.bf16 %v3122_v49, %v3118_v57 }
 0x185   : > { %5840 = vmatprep.subr.bf16.mxu1 %v8162_v53  ;;  %v8214_v53 = vsub.f32 %v317_v6, %v3116_v27  ;;  %9731 = vst [vmem:[#allocation21_spill] sm:$0xff] %v8237_v8  ;;  %v9735_v27 = vand.u32 4294901760, %v8184_v29 }
 0x186   : > { %5774 = vmatpush1.bf16.msra.mxu0 %v9726_v58  ;;  %9728 = vst [vmem:[#allocation59_spill] sm:$0xff] %v8216_v39  ;;  %v3198_v58 = vsub.f32 %v8119_v41, %v9729_v24  ;;  %v8241_v24 = vpop.f32.mrb[0].mxu1  ;;  %v9733_v41 = vld [vmem:[#allocation89_spill] sm:$0xff] }
 0x187   : > { %5776 = vmatprep.subr.bf16.mxu0 %v9727_v36  ;;  %v9730_v36 = vand.u32 4294901760, %v8128_v23  ;;  %9732 = vst [vmem:[#allocation63_spill] sm:$0xff] %v8241_v24 }
 0x188   : > { %5842 = vmatpush1.bf16.msra.mxu1 %v8191_v10  ;;  %v9740_v10 = vand.u32 4294901760, %v8131_v21 }
 0x189   : > { %v3210_v6 = vsub.f32 %v8128_v23, %v9730_v36  ;;  %5844 = vmatprep.subr.bf16.mxu1 %v8198_v59  ;;  %v8244_v36 = vsub.f32 %v316_v61, %v3118_v57  ;;  %v8250_v59 = vpack.c.bf16 %v9736_v48, %v9735_v27  ;;  %v8254_v23 = vpop.f32.mrb[1].mxu1  ;;  %v9741_v61 = vand.u32 4294901760, %v8134_v19 }
 0x18a   : > { %5778 = vmatpush1.bf16.msra.mxu0 %v9733_v41  ;;  %9738 = vst [vmem:[#allocation75_spill] sm:$0xff] %v8254_v23  ;;  %v3204_v41 = vsub.f32 %v8131_v21, %v9740_v10  ;;  %v3199_v27 = vand.u32 4294901760, %v3198_v58  ;;  %v9743_v23 = vand.u32 4294901760, %v8144_v12  ;;  %v8273_v21 = vsub.f32 %v8156_v28, %v3122_v49 }
 0x18b   : > { %9734 = vst [vmem:[#allocation66_spill] sm:$0xff] %v8244_v36  ;;  %9737 = vst [vmem:[#allocation69_spill] sm:$0xff] %v8250_v59  ;;  %5780 = vmatprep.subr.bf16.mxu0 %v9739_v56  ;;  %v3216_v57 = vsub.f32 %v8134_v19, %v9741_v61  ;;  %v3211_v51 = vand.u32 4294901760, %v3210_v6  ;;  %v3222_v56 = vsub.f32 %v8141_v47, %v9742_v63  ;;  %v9745_v61 = vand.u32 4294901760, %v8209_v35  ;;  %v8284_v63 = vpop.f32.mrb[2].mxu1 }
 0x18c   : > { %5846 = vmatpush1.bf16.msra.mxu1 %v8216_v39  ;;  %v3234_v10 = vsub.f32 %v8144_v12, %v9743_v23  ;;  %9744 = vst [vmem:[#allocation79_spill] sm:$0xff] %v8273_v21  ;;  %v9746_v48 = vand.u32 4294901760, %v8211_v13  ;;  %9748 = vst [vmem:[#allocation38_spill] sm:$0xff] %v8284_v63  ;;  %v9749_v39 = vld [vmem:[#allocation90_spill] sm:$0xff]  ;;  %v8288_v23 = vsub.f32 %v8174_v34, %v3124_v43  ;;  %v9752_v58 = vand.u32 4294901760, %v8146_v54 }
 0x18d   : > { %5848 = vmatprep.subr.bf16.mxu1 %v8237_v8  ;;  %v8291_v28 = vsub.f32 %v8176_v9, %v3128_v52  ;;  %v3217_v6 = vand.u32 4294901760, %v3216_v57  ;;  %v9753_v34 = vand.u32 4294901760, %v8148_v42  ;;  %v9754_v9 = vand.u32 4294901760, %v8218_v14 }
 0x18e   : > { %v8280_v24 = vpack.c.bf16 %v9746_v48, %v9745_v61  ;;  %5782 = vmatpush1.bf16.msra.mxu0 %v9749_v39  ;;  %v8295_v48 = vpop.f32.mrb[3].mxu1  ;;  %v3205_v61 = vand.u32 4294901760, %v3204_v41  ;;  %v3228_v39 = vsub.f32 %v8146_v54, %v9752_v58  ;;  %v9755_v52 = vand.u32 4294901760, %v8220_v55 }
 0x18f   : > { %9750 = vst [vmem:[#allocation84_spill] sm:$0xff] %v8291_v28  ;;  %9751 = vst [vmem:[#allocation85_spill] sm:$0xff] %v8295_v48  ;;  %5784 = vmatprep.subr.bf16.mxu0 %v7828_v7  ;;  %v3240_v43 = vsub.f32 %v8148_v42, %v9753_v34  ;;  %v5855_v49 = vpack.c.bf16 %v3211_v51, %v3199_v27  ;;  %v3223_v7 = vand.u32 4294901760, %v3222_v56  ;;  %v3235_v41 = vand.u32 4294901760, %v3234_v10 }
 0x190   : > { %9747 = vst [vmem:[#allocation37_spill] sm:$0xff] %v8280_v24  ;;  %5850 = vmatpush1.bf16.msra.mxu1 %v8250_v59  ;;  %v8309_v8 = vpack.c.bf16 %v9755_v52, %v9754_v9  ;;  %v9756_v57 = vand.u32 4294901760, %v8151_v62  ;;  %v9757_v48 = vand.u32 4294901760, %v8159_v60  ;;  %v9758_v9 = vand.u32 4294901760, %v8184_v29 }
 0x191   : > { %5852 = vmatprep.subr.bf16.mxu1 %v8280_v24  ;;  %v9759_v27 = vand.u32 4294901760, %v8186_v3  ;;  %v9760_v10 = vand.u32 4294901760, %v8165_v1  ;;  %v9761_v52 = vand.u32 4294901760, %v8167_v44  ;;  %v5857_v63 = vpack.c.bf16 %v3217_v6, %v3205_v61 }
 0x192   : > { %v3246_v58 = vsub.f32 %v8151_v62, %v9756_v57  ;;  %v3258_v34 = vsub.f32 %v8159_v60, %v9757_v48  ;;  %v8323_v51 = vsub.f32 %v8184_v29, %v9758_v9  ;;  %5786 = vmatpush1.bf16.msra.mxu0 %v7830_v32  ;;  %v3229_v29 = vand.u32 4294901760, %v3228_v39 }
 0x193   : > { %v8328_v56 = vsub.f32 %v8186_v3, %v9759_v27  ;;  %v3252_v48 = vsub.f32 %v8165_v1, %v9760_v10  ;;  %v3264_v57 = vsub.f32 %v8167_v44, %v9761_v52  ;;  %5788 = vmatprep.subr.bf16.mxu0 %v7833_v17  ;;  %v3241_v9 = vand.u32 4294901760, %v3240_v43  ;;  %v9764_v10 = vld [vmem:[#allocation42_spill] sm:$0xff] }
 0x194   : > { %v9260_v59 = vand.u32 4294901760, %v8178_v22  ;;  %5854 = vmatpush1.bf16.msra.mxu1 %v8309_v8  ;;  %v5859_v3 = vpack.c.bf16 %v3235_v41, %v3223_v7  ;;  %v9258_v32 = vand.u32 4294901760, %v8180_v26  ;;  %v9259_v27 = vand.u32 4294901760, %v8189_v45 }
 0x195   : > { %5856 = vmatprep.subr.bf16.mxu1 %v5855_v49  ;;  %v3247_v24 = vand.u32 4294901760, %v3246_v58  ;;  %v3259_v1 = vand.u32 4294901760, %v3258_v34  ;;  %v9762_v52 = vand.u32 4294901760, %v8170_v20  ;;  %v9763_v6 = vand.u32 4294901760, %v8172_v37 }
 0x196   : > { %5790 = vmatpush1.bf16.msra.mxu0 %v7840_v31  ;;  %v3253_v39 = vand.u32 4294901760, %v3252_v48  ;;  %v3265_v43 = vand.u32 4294901760, %v3264_v57  ;;  %v9276_v7 = vand.u32 4294901760, %v8203_v46  ;;  %v9263_v41 = vand.u32 4294901760, %v8205_v33 }
 0x197   : > { %v3270_v17 = vsub.f32 %v8170_v20, %v9762_v52  ;;  %v3282_v61 = vsub.f32 %v8172_v37, %v9763_v6  ;;  %3178 = vmatmul.mubr.f32.vlgmr.msra.gmra.mrb[8].mxu1 %v9764_v10  ;;  %5792 = vmatprep.subr.bf16.mxu0 %v9655_v11  ;;  %v5861_v49 = vpack.c.bf16 %v3241_v9, %v3229_v29  ;;  %v9262_v34 = vand.u32 4294901760, %v8214_v53 }
 0x198   : > { %v3276_v58 = vsub.f32 %v8178_v22, %v9260_v59  ;;  %v9261_v52 = vand.u32 4294901760, %v8235_v5  ;;  %5858 = vmatpush1.bf16.msra.mxu1 %v5857_v63  ;;  %v3288_v31 = vsub.f32 %v8180_v26, %v9258_v32  ;;  %v3294_v48 = vsub.f32 %v8189_v45, %v9259_v27  ;;  %3183 = vmatprep.mubr.f32.mxu1 %v9345_v50 }
 0x199   : > { %v9765_v11 = vand.u32 4294901760, %v8196_v25  ;;  %v9766_v29 = vand.u32 4294901760, %v8209_v35  ;;  %2952 = vmatmul.mubr.f32.vlgmr.msra.gmra.mrb[4].mxu0 %v9604_v2  ;;  %5860 = vmatprep.subr.bf16.mxu1 %v5859_v3  ;;  %v5863_v63 = vpack.c.bf16 %v3259_v1, %v3247_v24  ;;  %v3271_v6 = vand.u32 4294901760, %v3270_v17  ;;  %v9768_v3 = vld [vmem:[#allocation46_spill] sm:$0xff] }
 0x19a   : > { %v3283_v32 = vand.u32 4294901760, %v3282_v61  ;;  %5794 = vmatpush1.bf16.msra.mxu0 %v9662_v30  ;;  %v5865_v27 = vpack.c.bf16 %v3265_v43, %v3253_v39  ;;  %v3312_v59 = vsub.f32 %v8205_v33, %v9263_v41  ;;  %2957 = vmatprep.mubr.f32.mxu0 %v9345_v50  ;;  %v3318_v1 = vsub.f32 %v8214_v53, %v9262_v34 }
 0x19b   : > { %v3306_v57 = vsub.f32 %v8196_v25, %v9765_v11  ;;  %v8372_v9 = vsub.f32 %v8209_v35, %v9766_v29  ;;  %v3300_v11 = vsub.f32 %v8203_v46, %v9276_v7  ;;  %5796 = vmatprep.subr.bf16.mxu0 %v9663_v18  ;;  %v3330_v30 = vsub.f32 %v8235_v5, %v9261_v52  ;;  %v9790_v7 = vld [vmem:[#allocation52_spill] sm:$0xff] }
 0x19c   : > { %v9275_v35 = vand.u32 4294901760, %v8244_v36  ;;  %v9274_v24 = vand.u32 4294901760, %v8273_v21  ;;  %3189 = vmatmul.mubr.f32.gmra.mrb[10].mxu1 %v9768_v3  ;;  %v3277_v17 = vand.u32 4294901760, %v3276_v58  ;;  %v3289_v61 = vand.u32 4294901760, %v3288_v31  ;;  %v9809_v3 = vld [vmem:[#allocation58_spill] sm:$0xff] }
 0x19d   : > { %9767 = vst [vmem:[#allocation86_spill] sm:$0xff] %v8372_v9  ;;  %5862 = vmatpush1.bf16.msra.mxu1 %v5861_v49  ;;  %v3295_v39 = vand.u32 4294901760, %v3294_v48  ;;  %v3307_v43 = vand.u32 4294901760, %v3306_v57  ;;  %3419 = vmatprep.mubr.f32.mxu1 %v9345_v50  ;;  %v9769_v18 = vand.u32 4294901760, %v8211_v13  ;;  %v5867_v52 = vpack.c.bf16 %v3283_v32, %v3271_v6 }
 0x19e   : > { %5864 = vmatprep.subr.bf16.mxu1 %v5863_v63  ;;  %v9269_v34 = vand.u32 4294901760, %v8288_v23  ;;  %v9264_v41 = vand.u32 4294901760, %v8291_v28  ;;  %2959 = vmatmul.mubr.f32.gmra.mrb[6].mxu0 %v9618_v4  ;;  %v9771_v49 = vand.u32 4294901760, %v8218_v14  ;;  %v9772_v31 = vand.u32 4294901760, %v8220_v55 }
 0x19f   : > { %v8397_v29 = vsub.f32 %v8211_v13, %v9769_v18  ;;  %5798 = vmatpush1.bf16.msra.mxu0 %v9670_v16  ;;  %v3301_v13 = vand.u32 4294901760, %v3300_v11  ;;  %v3313_v32 = vand.u32 4294901760, %v3312_v59  ;;  %3061 = vmatprep.mubr.f32.mxu0 %v9345_v50  ;;  %v3319_v57 = vand.u32 4294901760, %v3318_v1 }
 0x1a0   : > { %v8405_v58 = vsub.f32 %v8218_v14, %v9771_v49  ;;  %v8410_v48 = vsub.f32 %v8220_v55, %v9772_v31  ;;  %5800 = vmatprep.subr.bf16.mxu0 %v9671_v38  ;;  %v3331_v63 = vand.u32 4294901760, %v3330_v30  ;;  %v3324_v14 = vsub.f32 %v8244_v36, %v9275_v35 }
 0x1a1   : > { %9770 = vst [vmem:[#allocation87_spill] sm:$0xff] %v8397_v29  ;;  %v3336_v6 = vsub.f32 %v8273_v21, %v9274_v24  ;;  %5866 = vmatpush1.bf16.msra.mxu1 %v5865_v27  ;;  %v5869_v55 = vpack.c.bf16 %v3289_v61, %v3277_v17  ;;  %v5871_v18 = vpack.c.bf16 %v3307_v43, %v3295_v39  ;;  %v9267_v16 = vand.u32 4294901760, %v8323_v51  ;;  %v9775_v39 = vld [vmem:[#allocation22_spill] sm:$0xff] }
 0x1a2   : > { %v9265_v59 = vand.u32 4294901760, %v8328_v56  ;;  %5868 = vmatprep.subr.bf16.mxu1 %v5867_v52  ;;  %v3342_v38 = vsub.f32 %v8288_v23, %v9269_v34  ;;  %v3354_v11 = vsub.f32 %v8291_v28, %v9264_v41  ;;  %v9266_v1 = vand.u32 4294901760, %v8372_v9 }
 0x1a3   : > { %v9268_v30 = vand.u32 4294901760, %v8397_v29  ;;  %5802 = vmatpush1.bf16.msra.mxu0 %v9677_v15  ;;  %v9773_v27 = vand.u32 4294901760, %v7923_v40  ;;  %v9774_v52 = vand.u32 4294901760, %v7925_v0  ;;  %v5873_v43 = vpack.c.bf16 %v3313_v32, %v3301_v13 }
 0x1a4   : > { %5804 = vmatprep.subr.bf16.mxu0 %v9775_v39  ;;  %v5875_v49 = vpack.c.bf16 %v3331_v63, %v3319_v57  ;;  %v3325_v31 = vand.u32 4294901760, %v3324_v14  ;;  %v3337_v41 = vand.u32 4294901760, %v3336_v6  ;;  %v3348_v15 = vsub.f32 %v8323_v51, %v9267_v16  ;;  %v9776_v57 = vld [vmem:[#allocation23_spill] sm:$0xff]  ;;  %v9777_v6 = vld [vmem:[#allocation24_spill] sm:$0xff] }
 0x1a5   : > { %v8435_v17 = vsub.f32 %v7923_v40, %v9773_v27  ;;  %v8440_v61 = vsub.f32 %v7925_v0, %v9774_v52  ;;  %5870 = vmatpush1.bf16.msra.mxu1 %v5869_v55  ;;  %v3360_v40 = vsub.f32 %v8328_v56, %v9265_v59  ;;  %v9273_v27 = vand.u32 4294901760, %v8405_v58  ;;  %v9780_v59 = vld [vmem:[#allocation32_spill] sm:$0xff] }
 0x1a6   : > { %v9271_v0 = vand.u32 4294901760, %v8410_v48  ;;  %5872 = vmatprep.subr.bf16.mxu1 %v5871_v18  ;;  %v3343_v52 = vand.u32 4294901760, %v3342_v38  ;;  %v3355_v39 = vand.u32 4294901760, %v3354_v11  ;;  %v3366_v13 = vsub.f32 %v8372_v9, %v9266_v1  ;;  %v9778_v18 = vld [vmem:[#allocation80_spill] sm:$0xff] }
 0x1a7   : > { %v3378_v32 = vsub.f32 %v8397_v29, %v9268_v30  ;;  %5806 = vmatpush1.bf16.msra.mxu0 %v9776_v57  ;;  %v9270_v63 = vand.u32 4294901760, %v8435_v17  ;;  %v9272_v14 = vand.u32 4294901760, %v8440_v61  ;;  %v5877_v55 = vpack.c.bf16 %v3337_v41, %v3325_v31 }
 0x1a8   : > { %5808 = vmatprep.subr.bf16.mxu0 %v9777_v6  ;;  %v9779_v38 = vand.u32 4294901760, %v9778_v18  ;;  %v9781_v1 = vand.u32 4294901760, %v9780_v59  ;;  %v3349_v30 = vand.u32 4294901760, %v3348_v15  ;;  %v3361_v57 = vand.u32 4294901760, %v3360_v40 }
 0x1a9   : > { %5874 = vmatpush1.bf16.msra.mxu1 %v5873_v43  ;;  %v3372_v34 = vsub.f32 %v8405_v58, %v9273_v27  ;;  %v3384_v41 = vsub.f32 %v8410_v48, %v9271_v0  ;;  %v5879_v31 = vpack.c.bf16 %v3355_v39, %v3343_v52  ;;  %v3367_v6 = vand.u32 4294901760, %v3366_v13  ;;  %v9783_v43 = vld [vmem:[#allocation26_spill] sm:$0xff]  ;;  %v9786_v13 = vld [vmem:[#allocation33_spill] sm:$0xff]  ;;  %v9788_v27 = vld [vmem:[#allocation51_spill] sm:$0xff] }
 0x1aa   : > { %v8464_v11 = vsub.f32 %v9778_v18, %v9779_v38  ;;  %v8469_v16 = vsub.f32 %v9780_v59, %v9781_v1  ;;  %5876 = vmatprep.subr.bf16.mxu1 %v5875_v49  ;;  %v3379_v18 = vand.u32 4294901760, %v3378_v32  ;;  %v9782_v38 = vld [vmem:[#allocation25_spill] sm:$0xff]  ;;  %v4085_v59 = vsub.f32 %v8435_v17, %v9270_v63  ;;  %v9784_v49 = vld [vmem:[#allocation15_spill] sm:$0xff] }
 0x1ab   : > { %5810 = vmatpush1.bf16.msra.mxu0 %v9782_v38  ;;  %v4092_v1 = vsub.f32 %v8440_v61, %v9272_v14  ;;  %v9785_v52 = vand.u32 4294901760, %v9784_v49  ;;  %v9787_v32 = vand.u32 4294901760, %v9786_v13  ;;  %v5881_v63 = vpack.c.bf16 %v3361_v57, %v3349_v30 }
 0x1ac   : > { %5812 = vmatprep.subr.bf16.mxu0 %v9783_v43  ;;  %v9277_v15 = vand.u32 4294901760, %v8464_v11  ;;  %v3373_v0 = vand.u32 4294901760, %v3372_v34  ;;  %v3385_v14 = vand.u32 4294901760, %v3384_v41  ;;  %v5883_v43 = vpack.c.bf16 %v3379_v18, %v3367_v6  ;;  %v9795_v41 = vld [vmem:[#allocation78_spill] sm:$0xff] }
 0x1ad   : > { %v8490_v39 = vsub.f32 %v9784_v49, %v9785_v52  ;;  %v8495_v38 = vsub.f32 %v9786_v13, %v9787_v32  ;;  %5878 = vmatpush1.bf16.msra.mxu1 %v5877_v55  ;;  %v9789_v24 = vand.u32 4294901760, %v9788_v27  ;;  %v9791_v40 = vand.u32 4294901760, %v9790_v7  ;;  %v9792_v52 = vld [vmem:[#allocation27_spill] sm:$0xff]  ;;  %v9793_v55 = vld [vmem:[#allocation28_spill] sm:$0xff] }
 0x1ae   : > { %5880 = vmatprep.subr.bf16.mxu1 %v5879_v31  ;;  %v4086_v13 = vand.u32 4294901760, %v4085_v59  ;;  %v4093_v32 = vand.u32 4294901760, %v4092_v1  ;;  %v4099_v34 = vsub.f32 %v8464_v11, %v9277_v15  ;;  %v9794_v30 = vand.u32 4294901760, %v8469_v16  ;;  %v9796_v31 = vld [vmem:[#allocation82_spill] sm:$0xff]  ;;  %v9797_v1 = vld [vmem:[#allocation29_spill] sm:$0xff] }
 0x1af   : > { %v8500_v35 = vsub.f32 %v9788_v27, %v9789_v24  ;;  %v8505_v49 = vsub.f32 %v9790_v7, %v9791_v40  ;;  %5814 = vmatpush1.bf16.msra.mxu0 %v9792_v52  ;;  %v9278_v27 = vand.u32 4294901760, %v8490_v39  ;;  %v5885_v7 = vpack.c.bf16 %v3385_v14, %v3373_v0  ;;  %v9798_v52 = vld [vmem:[#allocation53_spill] sm:$0xff]  ;;  %v9800_v15 = vld [vmem:[#allocation54_spill] sm:$0xff] }
 0x1b0   : > { %5816 = vmatprep.subr.bf16.mxu0 %v9793_v55  ;;  %v4106_v24 = vsub.f32 %v8469_v16, %v9794_v30  ;;  %v5887_v6 = vpack.c.bf16 %v9796_v31, %v9795_v41  ;;  %v6047_v40 = vpack.c.bf16 %v4093_v32, %v4086_v13  ;;  %v9799_v55 = vand.u32 4294901760, %v9798_v52 }
 0x1b1   : > { %5882 = vmatpush1.bf16.msra.mxu1 %v5881_v63  ;;  %v9280_v18 = vand.u32 4294901760, %v8500_v35  ;;  %v9801_v57 = vand.u32 4294901760, %v9800_v15  ;;  %v9802_v63 = vld [vmem:[#allocation34_spill] sm:$0xff]  ;;  %v4100_v14 = vand.u32 4294901760, %v4099_v34  ;;  %v4113_v59 = vsub.f32 %v8490_v39, %v9278_v27 }
 0x1b2   : > { %5884 = vmatprep.subr.bf16.mxu1 %v5883_v43  ;;  %v8525_v30 = vsub.f32 %v9798_v52, %v9799_v55  ;;  %v4107_v43 = vand.u32 4294901760, %v4106_v24  ;;  %v9803_v13 = vand.u32 4294901760, %v8495_v38  ;;  %v9805_v24 = vand.u32 4294901760, %v8505_v49  ;;  %v9806_v55 = vld [vmem:[#allocation81_spill] sm:$0xff] }
 0x1b3   : > { %5818 = vmatpush1.bf16.msra.mxu0 %v9797_v1  ;;  %v8530_v0 = vsub.f32 %v9800_v15, %v9801_v57  ;;  %v9804_v1 = vld [vmem:[#allocation83_spill] sm:$0xff]  ;;  %v5891_v15 = vpack.c.bf16 %v8144_v12, %v8141_v47  ;;  %v4127_v34 = vsub.f32 %v8500_v35, %v9280_v18  ;;  %v9810_v10 = vand.u32 4294901760, %v9809_v3 }
 0x1b4   : > { %5820 = vmatprep.subr.bf16.mxu0 %v9802_v63  ;;  %v4120_v32 = vsub.f32 %v8495_v38, %v9803_v13  ;;  %v5889_v52 = vpack.c.bf16 %v8134_v19, %v9804_v1  ;;  %v4134_v57 = vsub.f32 %v8505_v49, %v9805_v24  ;;  %v9283_v63 = vand.u32 4294901760, %v8525_v30  ;;  %v9807_v13 = vld [vmem:[#allocation56_spill] sm:$0xff] }
 0x1b5   : > { %5886 = vmatpush1.bf16.msra.mxu1 %v5885_v7  ;;  %v9808_v27 = vand.u32 4294901760, %v9807_v13  ;;  %v8560_v12 = vsub.f32 %v9809_v3, %v9810_v10  ;;  %v6051_v24 = vpack.c.bf16 %v4107_v43, %v4100_v14  ;;  %v4114_v18 = vand.u32 4294901760, %v4113_v59 }
 0x1b6   : > { %5888 = vmatprep.subr.bf16.mxu1 %v5887_v6  ;;  %v5893_v7 = vpack.c.bf16 %v8148_v42, %v8146_v54  ;;  %v4128_v10 = vand.u32 4294901760, %v4127_v34  ;;  %v4135_v3 = vand.u32 4294901760, %v4134_v57  ;;  %v4141_v59 = vsub.f32 %v8525_v30, %v9283_v63  ;;  %v9814_v57 = vld [vmem:[#allocation43_spill] sm:$0xff] }
 0x1b7   : > { %5822 = vmatpush1.bf16.msra.mxu0 %v9806_v55  ;;  %v8555_v6 = vsub.f32 %v9807_v13, %v9808_v27  ;;  %v4121_v55 = vand.u32 4294901760, %v4120_v32  ;;  %v5895_v27 = vpack.c.bf16 %v8159_v60, %v8151_v62  ;;  %v9811_v14 = vand.u32 4294901760, %v8530_v0  ;;  %v9812_v13 = vld [vmem:[#allocation62_spill] sm:$0xff] }
 0x1b8   : > { %3421 = vmatmul.mubr.f32.vlgmr.msra.gmra.mrb[8].mxu1 %v9604_v2  ;;  %6048 = vmatprep.subr.bf16.mxu0 %v6047_v40  ;;  %v9813_v34 = vand.u32 4294901760, %v9812_v13  ;;  %v9815_v60 = vand.u32 4294901760, %v9814_v57 }
 0x1b9   : > { %5890 = vmatpush1.bf16.msra.mxu1 %v5889_v52  ;;  %3426 = vmatprep.mubr.f32.mxu1 %v9345_v50  ;;  %v4148_v43 = vsub.f32 %v8530_v0, %v9811_v14  ;;  %v9285_v32 = vand.u32 4294901760, %v8555_v6  ;;  %v9286_v52 = vand.u32 4294901760, %v8560_v12  ;;  %v9816_v14 = vld [vmem:[#allocation16_spill] sm:$0xff] }
 0x1ba   : > { %3063 = vmatmul.mubr.f32.vlgmr.msra.gmra.mrb[4].mxu0 %v9604_v2  ;;  %5892 = vmatprep.subr.bf16.mxu1 %v5891_v15  ;;  %v6055_v15 = vpack.c.bf16 %v4121_v55, %v4114_v18  ;;  %v8586_v62 = vsub.f32 %v9814_v57, %v9815_v60  ;;  %v5897_v63 = vpack.c.bf16 %v8167_v44, %v9816_v14 }
 0x1bb   : > { %6050 = vmatpush3.bf16.msra.mxu0 %v6047_v40  ;;  %3068 = vmatprep.mubr.f32.mxu0 %v9345_v50  ;;  %v8581_v40 = vsub.f32 %v9812_v13, %v9813_v34  ;;  %v5899_v18 = vpack.c.bf16 %v8172_v37, %v8170_v20  ;;  %v6059_v55 = vpack.c.bf16 %v4135_v3, %v4128_v10  ;;  %v4668_v13 = vlaneseq  ;;  %v9817_v10 = vld [vmem:[#allocation64_spill] sm:$0xff] }
 0x1bc   : > { %6052 = vmatprep.subr.bf16.mxu0 %v6051_v24  ;;  %3428 = vmatmul.mubr.f32.gmra.mrb[10].mxu1 %v9618_v4  ;;  %v4142_v34 = vand.u32 4294901760, %v4141_v59  ;;  %v4149_v60 = vand.u32 4294901760, %v4148_v43  ;;  %v4162_v57 = vsub.f32 %v8560_v12, %v9286_v52  ;;  %v9818_v3 = vand.u32 4294901760, %v9817_v10  ;;  %v9820_v59 = vld [vmem:[#allocation65_spill] sm:$0xff] }
 0x1bd   : > { %5894 = vmatpush1.bf16.msra.mxu1 %v5893_v7  ;;  %3562 = vmatprep.mubr.f32.mxu1 %v9345_v50  ;;  %v4155_v7 = vsub.f32 %v8555_v6, %v9285_v32  ;;  %v9821_v43 = vand.u32 4294901760, %v9820_v59  ;;  %v5901_v52 = vpack.c.bf16 %v8180_v26, %v8178_v22 }
 0x1be   : > { %3070 = vmatmul.mubr.f32.gmra.mrb[6].mxu0 %v9618_v4  ;;  %5896 = vmatprep.subr.bf16.mxu1 %v5895_v27  ;;  %v5903_v27 = vpack.c.bf16 %v8196_v25, %v8189_v45  ;;  %v6063_v37 = vpack.c.bf16 %v4149_v60, %v4142_v34 }
 0x1bf   : > { %6054 = vmatpush3.bf16.msra.mxu0 %v6051_v24  ;;  %5104 = vmatprep.mubr.f32.mxu0 %v9604_v2  ;;  %v8607_v24 = vsub.f32 %v9817_v10, %v9818_v3  ;;  %v8612_v32 = vsub.f32 %v9820_v59, %v9821_v43  ;;  %v8618_v2 = vshrl.u32 %v4668_v13, 7  ;;  %v4156_v20 = vand.u32 4294901760, %v4155_v7 }
 0x1c0   : > { %6056 = vmatprep.subr.bf16.mxu0 %v6055_v15  ;;  %v4163_v10 = vand.u32 4294901760, %v4162_v57  ;;  %v9824_v3 = vand.u32 4294901760, %v8581_v40  ;;  %v5907_v13 = vpack.c.bf16 %v8235_v5, %v8214_v53 }
 0x1c1   : > { %9819 = vst [vmem:[#allocation30_spill] sm:$0xff] %v8607_v24  ;;  %9822 = vst [vmem:[#allocation36_spill] sm:$0xff] %v8612_v32  ;;  %5898 = vmatpush1.bf16.msra.mxu1 %v5897_v63  ;;  %v9825_v63 = vand.u32 4294901760, %v8586_v62  ;;  %v9290_v26 = vand.u32 4294901760, %v8612_v32  ;;  %v4670_v34 = vsub.s32 0, %v8618_v2 }
 0x1c2   : > { %5900 = vmatprep.subr.bf16.mxu1 %v5899_v18  ;;  %9823 = vst [vmem:[#allocation88_spill] sm:$0xff] %v8618_v2  ;;  %v4169_v59 = vsub.f32 %v8581_v40, %v9824_v3  ;;  %v9291_v18 = vand.u32 4294901760, %v8607_v24  ;;  %v6067_v60 = vpack.c.bf16 %v4163_v10, %v4156_v20  ;;  %v5911_v20 = vpack.c.bf16 %v8291_v28, %v8288_v23 }
 0x1c3   : > { %6058 = vmatpush3.bf16.msra.mxu0 %v6055_v15  ;;  %v4176_v43 = vsub.f32 %v8586_v62, %v9825_v63  ;;  %v5905_v15 = vpack.c.bf16 %v8205_v33, %v8203_v46  ;;  %v4674_v63 = vsub.s32 1, %v8618_v2  ;;  %v9827_v2 = vld [vmem:[#allocation63_spill] sm:$0xff] }
 0x1c4   : > { %6060 = vmatprep.subr.bf16.mxu0 %v6059_v55  ;;  %v4170_v7 = vand.u32 4294901760, %v4169_v59  ;;  %v4183_v3 = vsub.f32 %v8607_v24, %v9291_v18 }
 0x1c5   : > { %5902 = vmatpush1.bf16.msra.mxu1 %v5901_v52  ;;  %v4177_v57 = vand.u32 4294901760, %v4176_v43  ;;  %v4190_v52 = vsub.f32 %v8612_v32, %v9290_v26 }
 0x1c6   : > { %5904 = vmatprep.subr.bf16.mxu1 %v5903_v27  ;;  %v8639_v27 = vld [vmem:[#allocation7] sm:$0xff]  ;;  %v4184_v43 = vand.u32 4294901760, %v4183_v3 }
 0x1c7   : > { %6062 = vmatpush3.bf16.msra.mxu0 %v6059_v55  ;;  %9826 = vst [vmem:[#allocation89_spill] sm:$0xff] %v8639_v27  ;;  %v5909_v55 = vpack.c.bf16 %v8273_v21, %v8244_v36  ;;  %v4671_v10 = vrot.slane %v8639_v27, %v4670_v34  ;;  %v6071_v59 = vpack.c.bf16 %v4177_v57, %v4170_v7  ;;  %v4191_v26 = vand.u32 4294901760, %v4190_v52  ;;  %v9828_v34 = vld [vmem:[#allocation75_spill] sm:$0xff] }
 0x1c8   : > { %6064 = vmatprep.subr.bf16.mxu0 %v6063_v37  ;;  %v4675_v18 = vrot.slane %v8639_v27, %v4674_v63  ;;  %v5913_v21 = vpack.c.bf16 %v8328_v56, %v8323_v51 }
 0x1c9   : > { %5906 = vmatpush1.bf16.msra.mxu1 %v5905_v15  ;;  %v6075_v57 = vpack.c.bf16 %v4191_v26, %v4184_v43  ;;  %v6079_v26 = vpack.c.bf16 %v8440_v61, %v8435_v17 }
 0x1ca   : > { %5908 = vmatprep.subr.bf16.mxu1 %v5907_v13 }
 0x1cb   : > { %6066 = vmatpush3.bf16.msra.mxu0 %v6063_v37  ;;  %v1256_v15 = vpop.f32.mrb[0].mxu0  ;;  %v5915_v37 = vpack.c.bf16 %v8397_v29, %v8372_v9  ;;  %v9830_v29 = vld [vmem:[#allocation85_spill] sm:$0xff] }
 0x1cc   : > { %6068 = vmatprep.subr.bf16.mxu0 %v6067_v60  ;;  %v6207_v13 = vadd.f32 %v1256_v15, %v9827_v2  ;;  %v1258_v36 = vpop.f32.mrb[1].mxu0  ;;  %v9829_v2 = vld [vmem:[#allocation38_spill] sm:$0xff] }
 0x1cd   : > { %5910 = vmatpush1.bf16.msra.mxu1 %v5909_v55  ;;  %v6208_v28 = vadd.f32 %v1258_v36, %v9828_v34  ;;  %v5917_v55 = vpack.c.bf16 %v8410_v48, %v8405_v58  ;;  %v9831_v34 = vld [vmem:[#allocation70_spill] sm:$0xff] }
 0x1ce   : > { %5912 = vmatprep.subr.bf16.mxu1 %v5911_v20  ;;  %v4713_v7 = vsub.f32 %v6207_v13, %v4671_v10 }
 0x1cf   : > { %6070 = vmatpush3.bf16.msra.mxu0 %v6067_v60  ;;  %v4714_v3 = vsub.f32 %v6208_v28, %v4675_v18  ;;  %v1263_v52 = vpop.f32.mrb[2].mxu0 }
 0x1d0   : > { %6072 = vmatprep.subr.bf16.mxu0 %v6071_v59  ;;  %v4731_v63 = vand.u32 2147483647, %v4713_v7  ;;  %v6209_v15 = vadd.f32 %v1263_v52, %v9829_v2  ;;  %v1265_v20 = vpop.f32.mrb[3].mxu0  ;;  %v9837_v2 = vld [vmem:[#allocation76_spill] sm:$0xff] }
 0x1d1   : > { %5914 = vmatpush1.bf16.msra.mxu1 %v5913_v21  ;;  %v4732_v27 = vand.u32 2147483647, %v4714_v3  ;;  %v6210_v9 = vadd.f32 %v1265_v20, %v9830_v29  ;;  %v6087_v3 = vpack.c.bf16 %v8495_v38, %v8490_v39  ;;  %v9838_v20 = vld [vmem:[#allocation77_spill] sm:$0xff] }
 0x1d2   : > { %5916 = vmatprep.subr.bf16.mxu1 %v5915_v37  ;;  %v4749_v36 = vsub.f32 1.0, %v4731_v63  ;;  %v4722_v60 = vsub.f32 %v6209_v15, %v4671_v10  ;;  %v9832_v10 = vld [vmem:[#allocation40_spill] sm:$0xff]  ;;  %v9834_v37 = vld [vmem:[#allocation73_spill] sm:$0xff]  ;;  %v9836_v63 = vld [vmem:[#allocation74_spill] sm:$0xff]  ;;  %v6091_v15 = vpack.c.bf16 %v8505_v49, %v8500_v35 }
 0x1d3   : > { %6074 = vmatpush3.bf16.msra.mxu0 %v6071_v59  ;;  %v4750_v28 = vsub.f32 1.0, %v4732_v27  ;;  %v4723_v21 = vsub.f32 %v6210_v9, %v4675_v18  ;;  %v6083_v9 = vpack.c.bf16 %v8469_v16, %v8464_v11  ;;  %v9833_v27 = vld [vmem:[#allocation71_spill] sm:$0xff] }
 0x1d4   : > { %6076 = vmatprep.subr.bf16.mxu0 %v6075_v57  ;;  %v4767_v43 = vmax.f32 %v4749_v36, 0.0  ;;  %v4740_v13 = vand.u32 2147483647, %v4722_v60  ;;  %v9839_v36 = vld [vmem:[#allocation31_spill] sm:$0xff]  ;;  %v6095_v60 = vpack.c.bf16 %v8530_v0, %v8525_v30 }
 0x1d5   : > { %5918 = vmatpush1.bf16.msra.mxu1 %v5917_v55  ;;  %v4768_v7 = vmax.f32 %v4750_v28, 0.0  ;;  %v4741_v52 = vand.u32 2147483647, %v4723_v21  ;;  %v9835_v55 = vld [vmem:[#allocation44_spill] sm:$0xff]  ;;  %v6099_v21 = vpack.c.bf16 %v8560_v12, %v8555_v6 }
 0x1d6   : > { %5920 = vmatprep.subr.bf16.mxu1 %v9831_v34  ;;  %4785 = vst [vmem:[%s8662_s20] sm:$0xff] %v4767_v43  ;;  %v4758_v29 = vsub.f32 1.0, %v4740_v13  ;;  %v9841_v28 = vld [vmem:[#allocation12_spill] sm:$0xff]  ;;  %v9843_v13 = vld [vmem:[#allocation57_spill] sm:$0xff] }
 0x1d7   : > { %6078 = vmatpush3.bf16.msra.mxu0 %v6075_v57  ;;  %4786 = vst [vmem:[%s8662_s20 + $0x8] sm:$0xff] %v4768_v7  ;;  %v4759_v18 = vsub.f32 1.0, %v4741_v52  ;;  %v9842_v43 = vld [vmem:[#allocation20_spill] sm:$0xff]  ;;  %v6103_v7 = vpack.c.bf16 %v8586_v62, %v8581_v40  ;;  %v9844_v52 = vld [vmem:[#allocation59_spill] sm:$0xff] }
 0x1d8   : > { %3565 = vmatmul.mubr.f32.vlgmr.msra.gmra.mrb[8].mxu1 %v9832_v10  ;;  %6080 = vmatprep.subr.bf16.mxu0 %v6079_v26  ;;  %v4776_v59 = vmax.f32 %v4758_v29, 0.0  ;;  %v9845_v29 = vld [vmem:[#allocation21_spill] sm:$0xff] }
 0x1d9   : > { %5922 = vmatpush1.bf16.msra.mxu1 %v9833_v27  ;;  %3570 = vmatprep.mubr.f32.mxu1 %v9345_v50  ;;  %v4777_v57 = vmax.f32 %v4759_v18, 0.0  ;;  %v9847_v18 = vld [vmem:[#allocation37_spill] sm:$0xff] }
 0x1da   : > { %5105 = vmatmul.mubr.f32.vlgmr.msra.gmra.mrb[8].mxu0 %v9618_v4  ;;  %5924 = vmatprep.subr.bf16.mxu1 %v9834_v37  ;;  %4794 = vst [vmem:[%s8662_s20 + $0x48] sm:$0xff] %v4776_v59  ;;  %v9848_v59 = vand.u32 4294901760, %v9795_v41  ;;  %v9855_v41 = vld [vmem:[#allocation41_spill] sm:$0xff] }
 0x1db   : > { %6082 = vmatpush3.bf16.msra.mxu0 %v6079_v26  ;;  %5139 = vmatprep.mubr.f32.mxu0 %v9832_v10  ;;  %4795 = vst [vmem:[%s8662_s20 + $0x50] sm:$0xff] %v4777_v57  ;;  %v9840_v26 = vld [vmem:[#allocation13_spill] sm:$0xff]  ;;  %v6107_v10 = vpack.c.bf16 %v8612_v32, %v8607_v24  ;;  %v9849_v57 = vand.u32 4294901760, %v9796_v31  ;;  %v9852_v32 = vand.u32 4294901760, %v8141_v47  ;;  %v9856_v31 = vld [vmem:[#allocation48_spill] sm:$0xff]  ;;  %v9859_v47 = vld [vmem:[#allocation35_spill] sm:$0xff] }
 0x1dc   : > { %6084 = vmatprep.subr.bf16.mxu0 %v6083_v9  ;;  %3573 = vmatmul.mubr.f32.gmra.mrb[10].mxu1 %v9835_v55 }
 0x1dd   : > { %5926 = vmatpush1.bf16.msra.mxu1 %v9836_v63  ;;  %3675 = vmatprep.mubr.f32.mxu1 %v9345_v50 }
 0x1de   : > { %5928 = vmatprep.subr.bf16.mxu1 %v9837_v2 }
 0x1df   : > { %6086 = vmatpush3.bf16.msra.mxu0 %v6083_v9  ;;  %v9846_v9 = vld [vmem:[#allocation69_spill] sm:$0xff] }
 0x1e0   : > { %6088 = vmatprep.subr.bf16.mxu0 %v6087_v3 }
 0x1e1   : > { %5930 = vmatpush1.bf16.msra.mxu1 %v9838_v20 }
 0x1e2   : > { %5932 = vmatprep.subr.bf16.mxu1 %v9839_v36 }
 0x1e3   : > { %6090 = vmatpush3.bf16.msra.mxu0 %v6087_v3  ;;  %v5951_v3 = vpack.c.bf16 %v9849_v57, %v9848_v59  ;;  %v9858_v59 = vand.u32 4294901760, %v8148_v42  ;;  %v9865_v42 = vand.u32 4294901760, %v9816_v14  ;;  %v9866_v57 = vand.u32 4294901760, %v8167_v44 }
 0x1e4   : > { %6092 = vmatprep.subr.bf16.mxu0 %v6091_v15  ;;  %v9875_v44 = vand.u32 4294901760, %v8189_v45  ;;  %v9882_v45 = vld [vmem:[#allocation60_spill] sm:$0xff] }
 0x1e5   : > { %5934 = vmatpush1.bf16.msra.mxu1 %v9840_v26 }
 0x1e6   : > { %5936 = vmatprep.subr.bf16.mxu1 %v9841_v28 }
 0x1e7   : > { %6094 = vmatpush3.bf16.msra.mxu0 %v6091_v15  ;;  %v9850_v15 = vand.u32 4294901760, %v9804_v1 }
 0x1e8   : > { %6096 = vmatprep.subr.bf16.mxu0 %v6095_v60 }
 0x1e9   : > { %5938 = vmatpush1.bf16.msra.mxu1 %v9842_v43 }
 0x1ea   : > { %5940 = vmatprep.subr.bf16.mxu1 %v9843_v13 }
 0x1eb   : > { %6098 = vmatpush3.bf16.msra.mxu0 %v6095_v60  ;;  %v9851_v60 = vand.u32 4294901760, %v8134_v19  ;;  %v9860_v19 = vand.u32 4294901760, %v9859_v47  ;;  %v9876_v47 = vand.u32 4294901760, %v8196_v25  ;;  %v9883_v25 = vld [vmem:[#allocation66_spill] sm:$0xff] }
 0x1ec   : > { %6100 = vmatprep.subr.bf16.mxu0 %v6099_v21 }
 0x1ed   : > { %5942 = vmatpush1.bf16.msra.mxu1 %v9844_v52 }
 0x1ee   : > { %5944 = vmatprep.subr.bf16.mxu1 %v9845_v29 }
 0x1ef   : > { %6102 = vmatpush3.bf16.msra.mxu0 %v6099_v21  ;;  %v5953_v21 = vpack.c.bf16 %v9851_v60, %v9850_v15  ;;  %v9869_v15 = vld [vmem:[#allocation50_spill] sm:$0xff] }
 0x1f0   : > { %6104 = vmatprep.subr.bf16.mxu0 %v6103_v7  ;;  %v9870_v60 = vand.u32 4294901760, %v9869_v15 }
 0x1f1   : > { %5946 = vmatpush1.bf16.msra.mxu1 %v9846_v9  ;;  %v9853_v9 = vld [vmem:[#allocation47_spill] sm:$0xff] }
 0x1f2   : > { %5948 = vmatprep.subr.bf16.mxu1 %v9847_v18  ;;  %v9854_v24 = vand.u32 4294901760, %v9853_v9  ;;  %v9861_v9 = vld [vmem:[#allocation14_spill] sm:$0xff] }
 0x1f3   : > { %6106 = vmatpush3.bf16.msra.mxu0 %v6103_v7  ;;  %v9857_v7 = vand.u32 4294901760, %v8146_v54  ;;  %v9864_v54 = vld [vmem:[#allocation45_spill] sm:$0xff] }
 0x1f4   : > { %6108 = vmatprep.subr.bf16.mxu0 %v6107_v10  ;;  %v5955_v18 = vpack.c.bf16 %v9854_v24, %v9852_v32  ;;  %v9862_v32 = vand.u32 4294901760, %v9861_v9  ;;  %v9877_v9 = vld [vmem:[#allocation55_spill] sm:$0xff] }
 0x1f5   : > { %5950 = vmatpush1.bf16.msra.mxu1 %v8309_v8  ;;  %v5957_v1 = vpack.c.bf16 %v9858_v59, %v9857_v7  ;;  %v9872_v7 = vand.u32 4294901760, %v8178_v22  ;;  %v9873_v59 = vld [vmem:[#allocation17_spill] sm:$0xff]  ;;  %v9880_v22 = vand.u32 4294901760, %v8214_v53 }
 0x1f6   : > { %5952 = vmatprep.subr.bf16.mxu1 %v5951_v3  ;;  %v5959_v24 = vpack.c.bf16 %v9862_v32, %v9860_v19  ;;  %v9874_v14 = vand.u32 4294901760, %v9873_v59  ;;  %v5967_v19 = vpack.c.bf16 %v9876_v47, %v9875_v44  ;;  %v9878_v32 = vand.u32 4294901760, %v8203_v46  ;;  %v9890_v53 = vld [vmem:[#allocation61_spill] sm:$0xff]  ;;  %v9895_v47 = vld [vmem:[#allocation87_spill] sm:$0xff] }
 0x1f7   : > { %6110 = vmatpush3.bf16.msra.mxu0 %v6107_v10  ;;  %v9863_v10 = vld [vmem:[#allocation49_spill] sm:$0xff]  ;;  %v9887_v46 = vand.u32 4294901760, %v8288_v23  ;;  %v9892_v59 = vand.u32 4294901760, %v8328_v56  ;;  %v9897_v23 = vld [vmem:[#allocation67_spill] sm:$0xff]  ;;  %v9901_v56 = vand.u32 4294901760, %v8435_v17  ;;  %v9906_v17 = vand.u32 4294901760, %v8490_v39 }
 0x1f8   : > { %3679 = vmatmul.mubr.f32.vlgmr.msra.gmra.mrb[8].mxu1 %v9855_v41  ;;  %6112 = vmatprep.subr.bf16.mxu0 %v9856_v31  ;;  %v9910_v39 = vand.u32 4294901760, %v8525_v30  ;;  %v9914_v30 = vand.u32 4294901760, %v8581_v40 }
 0x1f9   : > { %5954 = vmatpush1.bf16.msra.mxu1 %v5953_v21  ;;  %3684 = vmatprep.mubr.f32.mxu1 %v9345_v50 }
 0x1fa   : > { %5140 = vmatmul.mubr.f32.vlgmr.msra.gmra.mrb[8].mxu0 %v9835_v55  ;;  %5956 = vmatprep.subr.bf16.mxu1 %v5955_v18  ;;  %v5961_v55 = vpack.c.bf16 %v9866_v57, %v9865_v42  ;;  %v9867_v18 = vld [vmem:[#allocation19_spill] sm:$0xff]  ;;  %v9881_v57 = vand.u32 4294901760, %v8235_v5  ;;  %v9891_v5 = vand.u32 4294901760, %v8323_v51  ;;  %v9900_v51 = vld [vmem:[#allocation68_spill] sm:$0xff] }
 0x1fb   : > { %6114 = vmatpush3.bf16.msra.mxu0 %v9856_v31  ;;  %5174 = vmatprep.mubr.f32.mxu0 %v9855_v41  ;;  %v9868_v3 = vand.u32 4294901760, %v9867_v18  ;;  %v9871_v41 = vld [vmem:[#allocation18_spill] sm:$0xff]  ;;  %v9884_v18 = vand.u32 4294901760, %v9883_v25  ;;  %v9903_v25 = vld [vmem:[#allocation39_spill] sm:$0xff] }
 0x1fc   : > { %6116 = vmatprep.subr.bf16.mxu0 %v9863_v10  ;;  %3688 = vmatmul.mubr.f32.gmra.mrb[10].mxu1 %v9864_v54 }
 0x1fd   : > { %5958 = vmatpush1.bf16.msra.mxu1 %v5957_v1  ;;  %3854 = vmatprep.mubr.f32.mxu1 %v9345_v50  ;;  %v5963_v21 = vpack.c.bf16 %v9870_v60, %v9868_v3  ;;  %v5965_v1 = vpack.c.bf16 %v9874_v14, %v9872_v7  ;;  %v9885_v3 = vld [vmem:[#allocation79_spill] sm:$0xff]  ;;  %v5977_v14 = vpack.c.bf16 %v9892_v59, %v9891_v5 }
 0x1fe   : > { %5960 = vmatprep.subr.bf16.mxu1 %v5959_v24  ;;  %v9879_v24 = vand.u32 4294901760, %v8205_v33  ;;  %v9886_v15 = vand.u32 4294901760, %v9885_v3  ;;  %v9888_v33 = vld [vmem:[#allocation84_spill] sm:$0xff] }
 0x1ff   : > { %6118 = vmatpush3.bf16.msra.mxu0 %v9863_v10 }
 0x200   : > { %6120 = vmatprep.subr.bf16.mxu0 %v9871_v41  ;;  %v5969_v42 = vpack.c.bf16 %v9879_v24, %v9878_v32  ;;  %v5973_v60 = vpack.c.bf16 %v9886_v15, %v9884_v18  ;;  %v9898_v24 = vand.u32 4294901760, %v8405_v58  ;;  %v9904_v58 = vand.u32 4294901760, %v8464_v11 }
 0x201   : > { %5962 = vmatpush1.bf16.msra.mxu1 %v5961_v55  ;;  %v5971_v55 = vpack.c.bf16 %v9881_v57, %v9880_v22  ;;  %v9902_v57 = vand.u32 4294901760, %v8440_v61  ;;  %v9907_v61 = vand.u32 4294901760, %v8495_v38  ;;  %v9911_v38 = vand.u32 4294901760, %v8530_v0 }
 0x202   : > { %5964 = vmatprep.subr.bf16.mxu1 %v5963_v21  ;;  %v9889_v21 = vand.u32 4294901760, %v9888_v33  ;;  %v9915_v0 = vand.u32 4294901760, %v8586_v62  ;;  %v9922_v62 = vld [vmem:[#allocation42_spill] sm:$0xff] }
 0x203   : > { %6122 = vmatpush3.bf16.msra.mxu0 %v9871_v41  ;;  %v6151_v11 = vpack.c.bf16 %v9907_v61, %v9906_v17 }
 0x204   : > { %6124 = vmatprep.subr.bf16.mxu0 %v9877_v9  ;;  %v5975_v7 = vpack.c.bf16 %v9889_v21, %v9887_v46 }
 0x205   : > { %5966 = vmatpush1.bf16.msra.mxu1 %v5965_v1  ;;  %v9893_v1 = vld [vmem:[#allocation86_spill] sm:$0xff] }
 0x206   : > { %5968 = vmatprep.subr.bf16.mxu1 %v5967_v19  ;;  %v9894_v44 = vand.u32 4294901760, %v9893_v1  ;;  %v9896_v19 = vand.u32 4294901760, %v9895_v47 }
 0x207   : > { %6126 = vmatpush3.bf16.msra.mxu0 %v9877_v9 }
 0x208   : > { %6128 = vmatprep.subr.bf16.mxu0 %v9882_v45  ;;  %v5979_v32 = vpack.c.bf16 %v9896_v19, %v9894_v44  ;;  %v9925_v19 = vld [vmem:[#allocation46_spill] sm:$0xff] }
 0x209   : > { %5970 = vmatpush1.bf16.msra.mxu1 %v5969_v42  ;;  %v9899_v42 = vand.u32 4294901760, %v8410_v48  ;;  %v9905_v48 = vand.u32 4294901760, %v8469_v16  ;;  %v9908_v16 = vand.u32 4294901760, %v8500_v35  ;;  %v9912_v35 = vand.u32 4294901760, %v8555_v6  ;;  %v9916_v6 = vld [vmem:[#allocation30_spill] sm:$0xff] }
 0x20a   : > { %5972 = vmatprep.subr.bf16.mxu1 %v5971_v55  ;;  %v6143_v55 = vpack.c.bf16 %v9902_v57, %v9901_v56 }
 0x20b   : > { %6130 = vmatpush3.bf16.msra.mxu0 %v9882_v45  ;;  %v5981_v22 = vpack.c.bf16 %v9899_v42, %v9898_v24  ;;  %v6147_v18 = vpack.c.bf16 %v9905_v48, %v9904_v58 }
 0x20c   : > { %6132 = vmatprep.subr.bf16.mxu0 %v9890_v53 }
 0x20d   : > { %5974 = vmatpush1.bf16.msra.mxu1 %v5973_v60 }
 0x20e   : > { %5976 = vmatprep.subr.bf16.mxu1 %v5975_v7 }
 0x20f   : > { %6134 = vmatpush3.bf16.msra.mxu0 %v9890_v53 }
 0x210   : > { %6136 = vmatprep.subr.bf16.mxu0 %v9897_v23 }
 0x211   : > { %5978 = vmatpush1.bf16.msra.mxu1 %v5977_v14 }
 0x212   : > { %5980 = vmatprep.subr.bf16.mxu1 %v5979_v32 }
 0x213   : > { %6138 = vmatpush3.bf16.msra.mxu0 %v9897_v23 }
 0x214   : > { %6140 = vmatprep.subr.bf16.mxu0 %v9900_v51 }
 0x215   : > { %5982 = vmatpush1.bf16.msra.mxu1 %v5981_v22 }
 0x216   : > { %5984 = vmatprep.subr.bf16.mxu1 %v9831_v34  ;;  %v9909_v34 = vand.u32 4294901760, %v8505_v49  ;;  %v9913_v49 = vand.u32 4294901760, %v8560_v12  ;;  %v9917_v12 = vand.u32 4294901760, %v9916_v6 }
 0x217   : > { %6142 = vmatpush3.bf16.msra.mxu0 %v9900_v51 }
 0x218   : > { %3856 = vmatmul.mubr.f32.vlgmr.msra.gmra.mrb[8].mxu1 %v9903_v25  ;;  %6144 = vmatprep.subr.bf16.mxu0 %v6143_v55 }
 0x219   : > { %5986 = vmatpush1.bf16.msra.mxu1 %v9833_v27  ;;  %3861 = vmatprep.mubr.f32.mxu1 %v9345_v50  ;;  %v6155_v27 = vpack.c.bf16 %v9909_v34, %v9908_v16 }
 0x21a   : > { %5175 = vmatmul.mubr.f32.vlgmr.msra.gmra.mrb[8].mxu0 %v9864_v54  ;;  %5988 = vmatprep.subr.bf16.mxu1 %v9834_v37  ;;  %v6159_v37 = vpack.c.bf16 %v9911_v38, %v9910_v39 }
 0x21b   : > { %6146 = vmatpush3.bf16.msra.mxu0 %v6143_v55  ;;  %5209 = vmatprep.mubr.f32.mxu0 %v9903_v25 }
 0x21c   : > { %6148 = vmatprep.subr.bf16.mxu0 %v6147_v18  ;;  %3863 = vmatmul.mubr.f32.gmra.mrb[10].mxu1 %v9618_v4 }
 0x21d   : > { %5990 = vmatpush1.bf16.msra.mxu1 %v9836_v63  ;;  %3965 = vmatprep.mubr.f32.mxu1 %v9345_v50  ;;  %v6163_v63 = vpack.c.bf16 %v9913_v49, %v9912_v35 }
 0x21e   : > { %5992 = vmatprep.subr.bf16.mxu1 %v9837_v2  ;;  %v6167_v2 = vpack.c.bf16 %v9915_v0, %v9914_v30 }
 0x21f   : > { %6150 = vmatpush3.bf16.msra.mxu0 %v6147_v18 }
 0x220   : > { %6152 = vmatprep.subr.bf16.mxu0 %v6151_v11 }
 0x221   : > { %5994 = vmatpush1.bf16.msra.mxu1 %v9838_v20  ;;  %v9918_v20 = vld [vmem:[#allocation36_spill] sm:$0xff] }
 0x222   : > { %5996 = vmatprep.subr.bf16.mxu1 %v9839_v36  ;;  %v9919_v36 = vand.u32 4294901760, %v9918_v20 }
 0x223   : > { %6154 = vmatpush3.bf16.msra.mxu0 %v6151_v11 }
 0x224   : > { %6156 = vmatprep.subr.bf16.mxu0 %v6155_v27 }
 0x225   : > { %5998 = vmatpush1.bf16.msra.mxu1 %v9840_v26  ;;  %v6171_v26 = vpack.c.bf16 %v9919_v36, %v9917_v12 }
 0x226   : > { %6000 = vmatprep.subr.bf16.mxu1 %v9841_v28  ;;  %v9920_v28 = vld [vmem:[#allocation69_spill] sm:$0xff] }
 0x227   : > { %6158 = vmatpush3.bf16.msra.mxu0 %v6155_v27 }
 0x228   : > { %6160 = vmatprep.subr.bf16.mxu0 %v6159_v37 }
 0x229   : > { %6002 = vmatpush1.bf16.msra.mxu1 %v9842_v43  ;;  %v9921_v43 = vld [vmem:[#allocation37_spill] sm:$0xff] }
 0x22a   : > { %6004 = vmatprep.subr.bf16.mxu1 %v9843_v13  ;;  %v9924_v13 = vld [vmem:[#allocation89_spill] sm:$0xff] }
 0x22b   : > { %6162 = vmatpush3.bf16.msra.mxu0 %v6159_v37 }
 0x22c   : > { %6164 = vmatprep.subr.bf16.mxu0 %v6163_v63 }
 0x22d   : > { %6006 = vmatpush1.bf16.msra.mxu1 %v9844_v52 }
 0x22e   : > { %6008 = vmatprep.subr.bf16.mxu1 %v9845_v29 }
 0x22f   : > { %6166 = vmatpush3.bf16.msra.mxu0 %v6163_v63 }
 0x230   : > { %6168 = vmatprep.subr.bf16.mxu0 %v6167_v2 }
 0x231   : > { %6010 = vmatpush1.bf16.msra.mxu1 %v9920_v28 }
 0x232   : > { %6012 = vmatprep.subr.bf16.mxu1 %v9921_v43 }
 0x233   : > { %6170 = vmatpush3.bf16.msra.mxu0 %v6167_v2 }
 0x234   : > { %6172 = vmatprep.subr.bf16.mxu0 %v6171_v26 }
 0x235   : > { %6014 = vmatpush1.bf16.msra.mxu1 %v8309_v8 }
 0x236   : > { %6016 = vmatprep.subr.bf16.mxu1 %v9856_v31 }
 0x237   : > { %6174 = vmatpush3.bf16.msra.mxu0 %v6171_v26 }
 0x238   : > { %3967 = vmatmul.mubr.f32.vlgmr.msra.gmra.mrb[8].mxu1 %v9903_v25  ;;  %6176 = vmatprep.subr.bf16.mxu0 %v9856_v31 }
 0x239   : > { %6018 = vmatpush3.bf16.msra.mxu1 %v9856_v31  ;;  %3972 = vmatprep.mubr.f32.mxu1 %v9345_v50  ;;  %v9923_v50 = vld [vmem:[#allocation88_spill] sm:$0xff] }
 0x23a   : > { %5210 = vmatmul.mubr.f32.vlgmr.msra.gmra.mrb[8].mxu0 %v9618_v4  ;;  %6020 = vmatprep.subr.bf16.mxu1 %v9863_v10  ;;  %v4678_v8 = vsub.s32 2, %v9923_v50  ;;  %v4682_v40 = vsub.s32 3, %v9923_v50  ;;  %v4686_v32 = vsub.s32 4, %v9923_v50  ;;  %v4694_v49 = vsub.s32 6, %v9923_v50 }
 0x23b   : > { %6178 = vmatpush3.bf16.msra.mxu0 %v9856_v31  ;;  %5244 = vmatprep.mubr.f32.mxu0 %v9903_v25  ;;  %v4698_v63 = vsub.s32 7, %v9923_v50 }
 0x23c   : > { %3974 = vmatmul.mubr.f32.gmra.mrb[10].mxu1 %v9618_v4  ;;  %6180 = vmatprep.subr.bf16.mxu0 %v9863_v10  ;;  %v4679_v52 = vrot.slane %v9924_v13, %v4678_v8  ;;  %v4683_v29 = vrot.slane %v9924_v13, %v4682_v40  ;;  %v4687_v24 = vrot.slane %v9924_v13, %v4686_v32 }
 0x23d   : > { %6022 = vmatpush3.bf16.msra.mxu1 %v9863_v10  ;;  %5069 = vmatprep.mubr.f32.mxu1 %v9922_v62  ;;  %v4695_v30 = vrot.slane %v9924_v13, %v4694_v49  ;;  %v4699_v0 = vrot.slane %v9924_v13, %v4698_v63 }
 0x23e   : > { %6024 = vmatprep.subr.bf16.mxu1 %v9871_v41 }
 0x23f   : > { %6182 = vmatpush3.bf16.msra.mxu0 %v9863_v10 }
 0x240   : > { %6184 = vmatprep.subr.bf16.mxu0 %v9871_v41 }
 0x241   : > { %6026 = vmatpush3.bf16.msra.mxu1 %v9871_v41 }
 0x242   : > { %6028 = vmatprep.subr.bf16.mxu1 %v9877_v9 }
 0x243   : > { %6186 = vmatpush3.bf16.msra.mxu0 %v9871_v41 }
 0x244   : > { %6188 = vmatprep.subr.bf16.mxu0 %v9877_v9 }
 0x245   : > { %6030 = vmatpush3.bf16.msra.mxu1 %v9877_v9 }
 0x246   : > { %6032 = vmatprep.subr.bf16.mxu1 %v9882_v45 }
 0x247   : > { %6190 = vmatpush3.bf16.msra.mxu0 %v9877_v9 }
 0x248   : > { %6192 = vmatprep.subr.bf16.mxu0 %v9882_v45 }
 0x249   : > { %6034 = vmatpush3.bf16.msra.mxu1 %v9882_v45 }
 0x24a   : > { %6036 = vmatprep.subr.bf16.mxu1 %v9890_v53  ;;  %v2160_v31 = vpop.f32.mrb[4].mxu1 }
 0x24b   : > { %6194 = vmatpush3.bf16.msra.mxu0 %v9882_v45  ;;  %v4715_v10 = vsub.f32 %v2160_v31, %v4679_v52  ;;  %v2162_v54 = vpop.f32.mrb[5].mxu1 }
 0x24c   : > { %6196 = vmatprep.subr.bf16.mxu0 %v9890_v53  ;;  %v4716_v41 = vsub.f32 %v2162_v54, %v4683_v29 }
 0x24d   : > { %6038 = vmatpush3.bf16.msra.mxu1 %v9890_v53  ;;  %v4733_v9 = vand.u32 2147483647, %v4715_v10 }
 0x24e   : > { %6040 = vmatprep.subr.bf16.mxu1 %v9897_v23  ;;  %v4734_v3 = vand.u32 2147483647, %v4716_v41  ;;  %v2167_v15 = vpop.f32.mrb[6].mxu1 }
 0x24f   : > { %6198 = vmatpush3.bf16.msra.mxu0 %v9890_v53  ;;  %v4751_v60 = vsub.f32 1.0, %v4733_v9  ;;  %v4724_v46 = vsub.f32 %v2167_v15, %v4679_v52  ;;  %v2169_v33 = vpop.f32.mrb[7].mxu1 }
 0x250   : > { %6200 = vmatprep.subr.bf16.mxu0 %v9897_v23  ;;  %v4752_v45 = vsub.f32 1.0, %v4734_v3  ;;  %v4725_v21 = vsub.f32 %v2169_v33, %v4683_v29 }
 0x251   : > { %6042 = vmatpush3.bf16.msra.mxu1 %v9897_v23  ;;  %v4769_v7 = vmax.f32 %v4751_v60, 0.0  ;;  %v4742_v5 = vand.u32 2147483647, %v4724_v46  ;;  %v4922_v46 = vld [vmem:[#allocation7 + $0x8] ss:$0 sm:$0xff] }
 0x252   : > { %6044 = vmatprep.subr.bf16.mxu1 %v9900_v51  ;;  %v4770_v59 = vmax.f32 %v4752_v45, 0.0  ;;  %v4743_v14 = vand.u32 2147483647, %v4725_v21 }
 0x253   : > { %6202 = vmatpush3.bf16.msra.mxu0 %v9897_v23  ;;  %4787 = vst [vmem:[%s8662_s20 + $0x10] sm:$0xff] %v4769_v7  ;;  %v4760_v53 = vsub.f32 1.0, %v4742_v5  ;;  %v4690_v23 = vsub.s32 5, %v9923_v50 }
 0x254   : > { %6204 = vmatprep.subr.bf16.mxu0 %v9900_v51  ;;  %4788 = vst [vmem:[%s8662_s20 + $0x18] sm:$0xff] %v4770_v59  ;;  %v4761_v1 = vsub.f32 1.0, %v4743_v14 }
 0x255   : > { %6046 = vmatpush3.bf16.msra.mxu1 %v9900_v51  ;;  %v4778_v44 = vmax.f32 %v4760_v53, 0.0  ;;  %v4691_v42 = vrot.slane %v9924_v13, %v4690_v23 }
 0x256   : > { %v4779_v47 = vmax.f32 %v4761_v1, 0.0 }
 0x257   : > { %6206 = vmatpush3.bf16.msra.mxu0 %v9900_v51  ;;  %4796 = vst [vmem:[%s8662_s20 + $0x58] sm:$0xff] %v4778_v44 }
 0x258   : > { %5070 = vmatmul.mubr.f32.vlgmr.msra.gmra.mrb[12].mxu1 %v9925_v19  ;;  %4797 = vst [vmem:[%s8662_s20 + $0x60] sm:$0xff] %v4779_v47 }
 0x25a   : > { %5245 = vmatmul.mubr.f32.vlgmr.msra.gmra.mrb[8].mxu0 %v9618_v4 }
 0x28d   : > { %v3064_v22 = vpop.f32.mrb[4].mxu0 }
 0x28e   : > { %v4717_v56 = vsub.f32 %v3064_v22, %v4687_v24  ;;  %v3066_v57 = vpop.f32.mrb[5].mxu0 }
 0x28f   : > { %v4718_v51 = vsub.f32 %v3066_v57, %v4691_v42 }
 0x290   : > { %v4735_v55 = vand.u32 2147483647, %v4717_v56 }
 0x291   : > { %v4736_v25 = vand.u32 2147483647, %v4718_v51  ;;  %v3071_v58 = vpop.f32.mrb[6].mxu0 }
 0x292   : > { %v4753_v48 = vsub.f32 1.0, %v4735_v55  ;;  %v4726_v4 = vsub.f32 %v3071_v58, %v4687_v24  ;;  %v3073_v18 = vpop.f32.mrb[7].mxu0 }
 0x293   : > { %v4754_v17 = vsub.f32 1.0, %v4736_v25  ;;  %v4727_v61 = vsub.f32 %v3073_v18, %v4691_v42 }
 0x294   : > { %v4771_v11 = vmax.f32 %v4753_v48, 0.0  ;;  %v4744_v16 = vand.u32 2147483647, %v4726_v4 }
 0x295   : > { %v4772_v34 = vmax.f32 %v4754_v17, 0.0  ;;  %v4745_v27 = vand.u32 2147483647, %v4727_v61 }
 0x296   : > { %4789 = vst [vmem:[%s8662_s20 + $0x20] sm:$0xff] %v4771_v11  ;;  %v4762_v39 = vsub.f32 1.0, %v4744_v16 }
 0x297   : > { %4790 = vst [vmem:[%s8662_s20 + $0x28] sm:$0xff] %v4772_v34  ;;  %v4763_v38 = vsub.f32 1.0, %v4745_v27 }
 0x298   : > { %v4780_v37 = vmax.f32 %v4762_v39, 0.0 }
 0x299   : > { %v4781_v35 = vmax.f32 %v4763_v38, 0.0 }
 0x29a   : > { %4798 = vst [vmem:[%s8662_s20 + $0x68] sm:$0xff] %v4780_v37 }
 0x29b   : > { %4799 = vst [vmem:[%s8662_s20 + $0x70] sm:$0xff] %v4781_v35 }
 0x30b   : > { %v3968_v2 = vpop.f32.mrb[8].mxu1 }
 0x30c   : > { %v4719_v6 = vsub.f32 %v3968_v2, %v4695_v30  ;;  %v3970_v12 = vpop.f32.mrb[9].mxu1 }
 0x30d   : > { %v4720_v20 = vsub.f32 %v3970_v12, %v4699_v0 }
 0x30e   : > { %v4737_v36 = vand.u32 2147483647, %v4719_v6 }
 0x30f   : > { %v4738_v26 = vand.u32 2147483647, %v4720_v20  ;;  %v3975_v28 = vpop.f32.mrb[10].mxu1 }
 0x310   : > { %v4755_v43 = vsub.f32 1.0, %v4737_v36  ;;  %v4728_v62 = vsub.f32 %v3975_v28, %v4695_v30  ;;  %v3977_v8 = vpop.f32.mrb[11].mxu1 }
 0x311   : > { %v4756_v40 = vsub.f32 1.0, %v4738_v26  ;;  %v4729_v50 = vsub.f32 %v3977_v8, %v4699_v0 }
 0x312   : > { %v4773_v52 = vmax.f32 %v4755_v43, 0.0  ;;  %v4746_v29 = vand.u32 2147483647, %v4728_v62 }
 0x313   : > { %v4774_v31 = vmax.f32 %v4756_v40, 0.0  ;;  %v4747_v13 = vand.u32 2147483647, %v4729_v50 }
 0x314   : > { %4791 = vst [vmem:[%s8662_s20 + $0x30] sm:$0xff] %v4773_v52  ;;  %v4764_v10 = vsub.f32 1.0, %v4746_v29 }
 0x315   : > { %4792 = vst [vmem:[%s8662_s20 + $0x38] sm:$0xff] %v4774_v31  ;;  %v4765_v54 = vsub.f32 1.0, %v4747_v13 }
 0x316   : > { %v4782_v41 = vmax.f32 %v4764_v10, 0.0 }
 0x317   : > { %v4783_v9 = vmax.f32 %v4765_v54, 0.0 }
 0x318   : > { %4800 = vst [vmem:[%s8662_s20 + $0x78] sm:$0xff] %v4782_v41 }
 0x319   : > { %4801 = vst [vmem:[%s8662_s20 + $0x80] sm:$0xff] %v4783_v9 }
 0x32b   : > { %v5071_v3 = vpop.f32.mrb[12].mxu1 }
 0x32c   : > { %v4067_v15 = vpop.f32.mrb[13].mxu1 }
 0x32d   : > { %v5246_v60 = vpop.f32.mrb[8].mxu0 }
 0x32e   : > { %v6211_v33 = vadd.f32 %v5246_v60, %v5071_v3  ;;  %v4654_v45 = vpop.f32.mrb[9].mxu0 }
 0x32f   : > { %v6212_v21 = vadd.f32 %v4654_v45, %v4067_v15 }
 0x330   : > { %v4730_v7 = vsub.f32 %v6211_v33, %v4922_v46 }
 0x331   : > { %v4721_v5 = vsub.f32 %v6212_v21, %v4922_v46 }
 0x332   : > { %v4748_v59 = vand.u32 2147483647, %v4730_v7 }
 0x333   : > { %v4739_v14 = vand.u32 2147483647, %v4721_v5 }
 0x334   : > { %v4766_v53 = vsub.f32 1.0, %v4748_v59 }
 0x335   : > { %v4757_v1 = vsub.f32 1.0, %v4739_v14 }
 0x336   : > { %v4784_v44 = vmax.f32 %v4766_v53, 0.0 }
 0x337   : > { %v4775_v47 = vmax.f32 %v4757_v1, 0.0 }
 0x338   : > { %4802 = vst [vmem:[%s8662_s20 + $0x88] sm:$0xff] %v4784_v44 }
 0x339   : > { %4793 = vst [vmem:[%s8662_s20 + $0x40] sm:$0xff] %v4775_v47 }
 0x33a   : > { %6472 = shalt.err (!%p6469_p2)
}
 0x33b   : > { %s6473_s11 = scalar_lea.hbm %s8912_s23, 2304  ;;  %s6477_s29 = scalar_lea.hbm %s8963_s3, 4608 }
 0x33c   : > { %p6474_p13 = scmp.ne.s32.totalorder %s8912_s23, %s6473_s11  ;;  %p6478_p4 = scmp.lt.u32.totalorder %s8912_s23, %s8963_s3 }
 0x33d   : > { %p6479_p5 = scmp.lt.u32.totalorder %s6477_s29, %s6473_s11  ;;  %p6481_p11 = scmp.lt.u32.totalorder %s6473_s11, %s8912_s23 }
 0x33e   : > { %p6475_p6 = pnand %p6474_p13, %p9926_p0 }
 0x33f   : > { %p6480_p8 = por %p6479_p5, %p6478_p4 }
 0x340   : > { %p6476_p10 = pneg %p6475_p6 }
 0x341   : > { %p6482_p1 = por %p6481_p11, %p6480_p8 }
 0x343   : > { %p6483_p3 = pnand %p6482_p1, %p6476_p10 }
 0x345   : > { %6486 = shalt.err (!%p6483_p3)
}
 0x346   : > { %s6540_s18 = smov 1152   ;;  %s6541_s20 = smov 72  }
 0x347   : > { %6309 = dma.vmem_to_hbm [thread:$0]  (%p9926_p0), %s8914_s26, 2304, %s8912_s23, %s4804_s6, %s6540_s18, %s6540_s18, %s6541_s20  }
 0x348 PF: > { %s4833_s21 = sand.u32 1, %s6517_s12   ;;  %p9927_p7 = scmp.ne.s32.totalorder %s9304_s19, 0 }
 0x349   : > { %p9928_p9 = scmp.ge.s32.totalorder %s6529_s15, 2  ;;  %s4834_s27 = scalar_lea.sflag [#allocation4], %s4833_s21 }
 0x34b   : > { %p6323_p12 = pnand %p9928_p9, %p9927_p7 }
 0x34d   : > { %6512 = dma.done.wait (!%p6323_p12), %s4834_s27, 2304  }
 0x34e   : > { %6514 = vsyncadd (!%p6323_p12), %s4834_s27, 4294964992  ;;  %p17_p2 = scmp.ge.s32.totalorder %s6673_s5, 4   ;;  %s9929_s12 = smov %s6521_s13 }
 0x34f   : > { %s9930_s13 = smov %s6525_s14  ;;  %s9931_s14 = smov %s6689_s8 }
 0x350   : > { %s9932_s15 = smov %s6673_s5  ;;  %19 = sbr.rel (!%p17_p2) target bundleno = 6 (0x6), region = 85 }
 0x357   :  { %4839 = vsyncpa [#allocation3], 1 }
 0x358   :  { %4841 = vsyncpa [#allocation3 + $0x1], 1 }
 0x359   :  { %4842 = vsyncpa [#allocation6], 1 }
 0x35a   :  { %4843 = vsyncpa [#allocation4], 1 }
 0x35b   :  { %4845 = vsyncpa [#allocation4 + $0x1], 1 }

</bundles_post_ra>
